<compile_context>
chip_gen: v5e
topology: v5e:2x2
jax: 0.10.0
libtpu: 0.0.40
codegen_flags: <defaults>
</compile_context>

<pallas_src>
import functools

import jax
import jax.numpy as jnp
from jax.experimental import pallas as pl
from jax.experimental.pallas import tpu as pltpu

LANE = 128


def _round_up(x, m):
    return (x + m - 1) // m * m


def _pad_last(a, new_c):
    c = a.shape[-1]
    if c == new_c:
        return a
    pad = [(0, 0)] * (a.ndim - 1) + [(0, new_c - c)]
    return jnp.pad(a, pad)


# ----------------------------------------------------------------------------
# Kernel 1: fused conv1(1x1)+BN+ReLU  ->  conv2(3x3, pad 1, stride 1)+BN+ReLU
#           (+ per-image global average pool side output for the SE block).
#
# Slab trick: the image is kept flattened as rows f = r*W + w of a padded-row
# structure (r in [0, H+1]).  slab[f, kw*C:(kw+1)*C] holds y1pad[r, w+kw, :]
# (y1 zero-padded by 1 in H and W).  It is built with exactly three shifted
# stores (boundary columns handled by masking y1 before the shifted store, so
# the flat wrap-around lands zeros), after which the patch for kernel row kh is
# the CONTIGUOUS row range slab[kh*W : kh*W + H*W, :] -> no relayout on read.
# ----------------------------------------------------------------------------
def _conv12_kernel(x_ref, w1_ref, b1_ref, w2_ref, b2_ref, o_ref, pool_ref,
                   slab_ref, *, H, W, C):
    # conv1: 1x1 + folded BN + ReLU  -> (H*W, C) bf16
    y1 = jnp.dot(x_ref[...], w1_ref[...],
                 preferred_element_type=jnp.float32) + b1_ref[...]
    y1 = jnp.maximum(y1, 0.0).astype(jnp.bfloat16)

    # Column-boundary masks (flat row index -> image column).
    col = jax.lax.broadcasted_iota(jnp.int32, (H * W, 1), 0) % W
    y1_l = jnp.where(col < W - 1, y1, jnp.zeros_like(y1))   # last col zeroed (kw=0 tap)
    y1_r = jnp.where(col > 0, y1, jnp.zeros_like(y1))       # first col zeroed (kw=2 tap)

    # Build the (padded-rows, 3*C) slab: one shifted store per kw tap instead of
    # nine per-tap relayout copies.
    slab_ref[...] = jnp.zeros_like(slab_ref)                 # zero pad rows / boundaries
    slab_ref[W + 1:W + 1 + H * W, 0:C] = y1_l                # kw = 0
    slab_ref[W:W + H * W, C:2 * C] = y1                      # kw = 1
    slab_ref[W - 1:W - 1 + H * W, 2 * C:3 * C] = y1_r        # kw = 2

    # conv2 3x3: three K=3C matmuls (one per kh), summed as values (no acc RMW).
    acc = jnp.dot(slab_ref[0:H * W, :], w2_ref[0],
                  preferred_element_type=jnp.float32)
    acc = acc + jnp.dot(slab_ref[W:W + H * W, :], w2_ref[1],
                        preferred_element_type=jnp.float32)
    acc = acc + jnp.dot(slab_ref[2 * W:2 * W + H * W, :], w2_ref[2],
                        preferred_element_type=jnp.float32)
    y2 = jnp.maximum(acc + b2_ref[...], 0.0)                 # (H*W, C) f32

    o_ref[...] = y2.astype(o_ref.dtype)
    pooled = jnp.mean(y2, axis=0, keepdims=True)             # (1, C) f32
    pool_ref[...] = jnp.broadcast_to(pooled, (8, C))


def conv12_bn_relu_pool(x_flat, w1, b1, w2k, b2, *, H, W):
    """x_flat: (N, H*W, Cin) bf16 -> (y2: (N, H*W, C) bf16, pooled: (N, C) f32)."""
    N, _, Cin = x_flat.shape
    C = w1.shape[1]
    kern = functools.partial(_conv12_kernel, H=H, W=W, C=C)
    y2, pooled = pl.pallas_call(
        kern,
        out_shape=(jax.ShapeDtypeStruct((N, H * W, C), jnp.bfloat16),
                   jax.ShapeDtypeStruct((N, 8, C), jnp.float32)),
        grid=(N,),
        in_specs=[
            pl.BlockSpec((None, H * W, Cin), lambda n: (n, 0, 0)),
            pl.BlockSpec((Cin, C), lambda n: (0, 0)),
            pl.BlockSpec((1, C), lambda n: (0, 0)),
            pl.BlockSpec((3, 3 * C, C), lambda n: (0, 0, 0)),
            pl.BlockSpec((1, C), lambda n: (0, 0)),
        ],
        out_specs=(pl.BlockSpec((None, H * W, C), lambda n: (n, 0, 0)),
                   pl.BlockSpec((None, 8, C), lambda n: (n, 0, 0))),
        scratch_shapes=[pltpu.VMEM(((H + 2) * W, 3 * C), jnp.bfloat16)],
        compiler_params=pltpu.CompilerParams(dimension_semantics=("parallel",)),
        cost_estimate=pl.CostEstimate(
            flops=2 * N * H * W * (Cin * C + 9 * C * C),
            transcendentals=0,
            bytes_accessed=int(x_flat.size * 2 + w1.size * 2 + w2k.size * 2
                               + N * H * W * C * 2 + N * 8 * C * 4)),
    )(x_flat, w1, b1, w2k, b2)
    return y2, pooled[:, 0, :]


# ----------------------------------------------------------------------------
# Kernel 2: SE excitation gate on (N, C) pooled vectors (tiny; f32 throughout).
# Uses linearity of conv3+BN: pooled(conv3(y2)) == pooled(y2) @ w3 + b3.
# ----------------------------------------------------------------------------
def _se_excite_kernel(p_ref, w3_ref, b3_ref, w1_ref, b1_ref, w2_ref, b2_ref, s_ref):
    p3 = jnp.dot(p_ref[...], w3_ref[...],
                 preferred_element_type=jnp.float32) + b3_ref[...]
    h = jnp.maximum(
        jnp.dot(p3, w1_ref[...], preferred_element_type=jnp.float32) + b1_ref[...], 0.0)
    z = jnp.dot(h, w2_ref[...], preferred_element_type=jnp.float32) + b2_ref[...]
    s_ref[...] = 1.0 / (1.0 + jnp.exp(-z))


def se_excite(pooled, w3, b3, w1, b1, w2, b2):
    N = pooled.shape[0]
    Co = w3.shape[1]
    return pl.pallas_call(
        _se_excite_kernel,
        out_shape=jax.ShapeDtypeStruct((N, Co), jnp.float32),
    )(pooled, w3, b3, w1, b1, w2, b2)


# ----------------------------------------------------------------------------
# Kernel 3: fused conv3(1x1)+BN  +  downsample 1x1 conv+BN  +  SE scale
#           + residual add + final ReLU, tiled over (batch, spatial tiles).
# bf16 output (memory-bound kernel).  NOTE: padded SE lanes carry sigmoid(0)=0.5
# gates, but they multiply exactly-zero conv3 channels and are sliced off later,
# so they are benign — do not rely on those lanes being zero.
# TODO(synk): add a Co tiling axis + vmem_limit_bytes for deep stages on v7x.
# ----------------------------------------------------------------------------
def _conv3_se_residual_kernel(y2_ref, xd_ref, s_ref, w3_ref, b3_ref, wd_ref,
                              bd_ref, o_ref):
    out = jnp.dot(y2_ref[...], w3_ref[...],
                  preferred_element_type=jnp.float32) + b3_ref[...]     # conv3 + BN
    res = jnp.dot(xd_ref[...], wd_ref[...],
                  preferred_element_type=jnp.float32) + bd_ref[...]     # downsample + BN
    o_ref[...] = jnp.maximum(out * s_ref[...] + res, 0.0).astype(o_ref.dtype)


def conv3_se_residual(y2_l, xd_l, s, w3, b3, wd, bd, *, tl=256):
    # tl=256 is safe on all generations; v6e (128 MiB VMEM) can raise to 512-1024.
    N, L, Cw = y2_l.shape
    Ci = xd_l.shape[2]
    Co = w3.shape[1]
    tl = min(tl, _round_up(L, 8))
    Lp = _round_up(L, tl)
    if Lp != L:
        y2_l = jnp.pad(y2_l, ((0, 0), (0, Lp - L), (0, 0)))
        xd_l = jnp.pad(xd_l, ((0, 0), (0, Lp - L), (0, 0)))
    s3 = s.reshape(N, 1, Co)
    out = pl.pallas_call(
        _conv3_se_residual_kernel,
        out_shape=jax.ShapeDtypeStruct((N, Lp, Co), jnp.bfloat16),
        grid=(N, Lp // tl),
        in_specs=[
            pl.BlockSpec((None, tl, Cw), lambda n, l: (n, l, 0)),
            pl.BlockSpec((None, tl, Ci), lambda n, l: (n, l, 0)),
            pl.BlockSpec((None, 1, Co), lambda n, l: (n, 0, 0)),
            pl.BlockSpec((Cw, Co), lambda n, l: (0, 0)),
            pl.BlockSpec((1, Co), lambda n, l: (0, 0)),
            pl.BlockSpec((Ci, Co), lambda n, l: (0, 0)),
            pl.BlockSpec((1, Co), lambda n, l: (0, 0)),
        ],
        out_specs=pl.BlockSpec((None, tl, Co), lambda n, l: (n, l, 0)),
        compiler_params=pltpu.CompilerParams(
            dimension_semantics=("parallel", "parallel")),
        cost_estimate=pl.CostEstimate(
            flops=2 * N * Lp * (Cw + Ci) * Co,
            transcendentals=0,
            bytes_accessed=int(y2_l.size * 2 + xd_l.size * 2 + w3.size * 2
                               + wd.size * 2 + N * Lp * Co * 2)),
    )(y2_l, xd_l, s3, w3, b3, wd, bd)
    return out[:, :L, :] if Lp != L else out


# ----------------------------------------------------------------------------
# Glue (plain JAX): BN folding, channel padding, parameter setup, layout.
# ----------------------------------------------------------------------------
def fold_bn(bn_params, eps=1e-5):
    gamma, beta, mean, var = bn_params
    scale = gamma / jnp.sqrt(var + eps)
    bias = beta - mean * scale
    return scale[None, :], bias[None, :]


def prepare_inference_params(p):
    in_c, width = p["w1"].shape
    out_c = p["w3"].shape[1]
    cs = p["se_w1"].shape[1]
    in_p = _round_up(in_c, LANE)
    width_p = _round_up(width, LANE)
    out_p = _round_up(out_c, LANE)
    cs_p = _round_up(cs, LANE)

    s1, b1 = fold_bn(p["bn1"])
    s2, b2 = fold_bn(p["bn2"])
    s3, b3 = fold_bn(p["bn3"])
    sd, bd = fold_bn(p["bnd"])

    def pad2(a, r, c):
        return jnp.pad(a, ((0, r - a.shape[0]), (0, c - a.shape[1])))

    w1f = pad2(p["w1"] * s1, in_p, width_p)
    w2f = p["w2"] * s2[0]                                    # scale output channels
    w2f = jnp.pad(w2f, ((0, 0), (0, 0),
                        (0, width_p - width), (0, width_p - width)))
    # [kh, kw*C + i, o] layout so the kernel can do one K=3C matmul per kh.
    w2f = w2f.reshape(3, 3 * width_p, width_p)
    w3f = pad2(p["w3"] * s3, width_p, out_p)
    wdf = pad2(p["wd"] * sd, in_p, out_p)

    return dict(
        in_p=in_p, width_p=width_p, out_p=out_p,
        w1=w1f.astype(jnp.bfloat16), b1=pad2(b1, 1, width_p),
        w2=w2f.astype(jnp.bfloat16), b2=pad2(b2, 1, width_p),
        w3=w3f.astype(jnp.bfloat16), w3_f32=w3f, b3=pad2(b3, 1, out_p),
        wd=wdf.astype(jnp.bfloat16), bd=pad2(bd, 1, out_p),
        se_w1=pad2(p["se_w1"], out_p, cs_p), se_b1=pad2(p["se_b1"], 1, cs_p),
        se_w2=pad2(p["se_w2"], cs_p, out_p), se_b2=pad2(p["se_b2"], 1, out_p),
    )


def make_params(key, in_channels, out_channels, width, groups=1, stride=1,
                expansion=4, se_reduction=4):
    width = int(out_channels * (width / 64.0)) * groups
    out_c = out_channels * expansion
    cs = out_c // se_reduction
    ks = jax.random.split(key, 20)

    def w(k, shape, s=0.1):
        return s * jax.random.normal(k, shape, dtype=jnp.float32)

    def bn(k, c):
        k1, k2, k3, k4 = jax.random.split(k, 4)
        gamma = jax.random.uniform(k1, (c,), minval=0.5, maxval=1.5, dtype=jnp.float32)
        beta = 0.1 * jax.random.normal(k2, (c,), dtype=jnp.float32)
        mean = 0.1 * jax.random.normal(k3, (c,), dtype=jnp.float32)
        var = jax.random.uniform(k4, (c,), minval=0.5, maxval=1.5, dtype=jnp.float32)
        return (gamma, beta, mean, var)

    return dict(
        stride=stride,
        w1=w(ks[0], (in_channels, width)),            # 1x1 conv
        bn1=bn(ks[1], width),
        w2=w(ks[2], (3, 3, width, width)),            # 3x3 conv (HWIO)
        bn2=bn(ks[3], width),
        w3=w(ks[4], (width, out_c)),                  # 1x1 conv
        bn3=bn(ks[5], out_c),
        wd=w(ks[6], (in_channels, out_c)),            # downsample 1x1 conv
        bnd=bn(ks[7], out_c),
        se_w1=w(ks[8], (out_c, cs)),
        se_b1=0.1 * jax.random.normal(ks[9], (1, cs), dtype=jnp.float32),
        se_w2=w(ks[10], (cs, out_c)),
        se_b2=0.1 * jax.random.normal(ks[11], (1, out_c), dtype=jnp.float32),
    )


def bottleneck_forward(x_nchw, p):
    ip = prepare_inference_params(p)
    stride = p["stride"]
    in_p, width_p = ip["in_p"], ip["width_p"]
    out_c = p["w3"].shape[1]

    # NCHW -> NHWC, cast to bf16 BEFORE padding channels (half the pad traffic).
    x = jnp.transpose(x_nchw, (0, 2, 3, 1)).astype(jnp.bfloat16)
    N, H, W, _ = x.shape
    x_bf = _pad_last(x, in_p)                                 # (N, H, W, in_p) bf16
    x_flat = x_bf.reshape(N, H * W, in_p)

    # fused conv1 + conv2 (+ global avg-pool side output)
    y2, pooled = conv12_bn_relu_pool(x_flat, ip["w1"], ip["b1"], ip["w2"], ip["b2"],
                                     H=H, W=W)

    if stride > 1:
        # TODO(synk): apply the stride inside the conv kernel (strided slab reads)
        # instead of computing at stride 1 and subsampling + re-pooling here.
        y2 = y2.reshape(N, H, W, width_p)[:, ::stride, ::stride, :]
        Ho, Wo = y2.shape[1], y2.shape[2]
        pooled = jnp.mean(y2.astype(jnp.float32), axis=(1, 2))
        y2 = y2.reshape(N, Ho * Wo, width_p)
        xd = x_bf[:, ::stride, ::stride, :].reshape(N, Ho * Wo, in_p)
    else:
        Ho, Wo = H, W
        xd = x_flat

    # SE excitation gate per (batch, channel)
    s = se_excite(pooled, ip["w3_f32"], ip["b3"],
                  ip["se_w1"], ip["se_b1"], ip["se_w2"], ip["se_b2"])

    # fused conv3 + downsample 1x1 conv + SE scale + residual + final ReLU (bf16 out)
    out = conv3_se_residual(y2, xd, s, ip["w3"], ip["b3"], ip["wd"], ip["bd"])
    out = out[:, :, :out_c].reshape(N, Ho, Wo, out_c)
    return jnp.transpose(out, (0, 3, 1, 2)).astype(jnp.float32)   # back to NCHW f32


# ----------------------------------------------------------------------------
# Pure-JAX reference (f32) for correctness check
# ----------------------------------------------------------------------------
def reference_forward(x_nchw, p):
    stride = p["stride"]
    x = jnp.transpose(x_nchw, (0, 2, 3, 1)).astype(jnp.float32)

    def bn(y, bnp):
        g, b, m, v = bnp
        return (y - m) / jnp.sqrt(v + 1e-5) * g + b

    y = jnp.einsum("nhwc,cd->nhwd", x, p["w1"])
    y = jax.nn.relu(bn(y, p["bn1"]))
    y = jax.lax.conv_general_dilated(
        y, p["w2"], (stride, stride), [(1, 1), (1, 1)],
        dimension_numbers=("NHWC", "HWIO", "NHWC"))
    y = jax.nn.relu(bn(y, p["bn2"]))
    y = bn(jnp.einsum("nhwc,cd->nhwd", y, p["w3"]), p["bn3"])

    pooled = jnp.mean(y, axis=(1, 2))
    h = jax.nn.relu(pooled @ p["se_w1"] + p["se_b1"][0])
    s = jax.nn.sigmoid(h @ p["se_w2"] + p["se_b2"][0])
    y = y * s[:, None, None, :]

    xd = x[:, ::stride, ::stride, :]
    r = bn(jnp.einsum("nhwc,cd->nhwd", xd, p["wd"]), p["bnd"])
    out = jax.nn.relu(y + r)
    return jnp.transpose(out, (0, 3, 1, 2))


if __name__ == "__main__":
    key = jax.random.PRNGKey(0)
    k_x, k_p = jax.random.split(key)

    # BottleNeckBlock(in_channels=16, out_channels=8, use_resnet_d=False,
    #                 downsample=True, stride=1, groups=1, width=64, use_se=True)
    in_channels, out_channels = 16, 8
    x = jax.random.normal(k_x, (2, in_channels, 16, 16), dtype=jnp.float32)  # NCHW
    params = make_params(k_p, in_channels, out_channels, width=64, stride=1)

    out = jax.block_until_ready(bottleneck_forward(x, params))
    ref = jax.block_until_ready(reference_forward(x, params))

    assert out.shape == (2, out_channels * 4, 16, 16), out.shape
    # bf16 MXU operands / bf16 activations (inference precision) vs f32 reference.
    assert jnp.allclose(out, ref, atol=5e-2, rtol=5e-2), \
        float(jnp.max(jnp.abs(out - ref)))

    print("KERNEL_OK")
</pallas_src>

<mosaic_0001>
module attributes {stable_mosaic.version = 11 : i64} {
  func.func @_conv12_kernel(%arg0: i32, %arg1: memref<1x256x128xbf16, #tpu.memory_space<vmem>>, %arg2: memref<128x128xbf16, #tpu.memory_space<vmem>>, %arg3: memref<1x128xf32, #tpu.memory_space<vmem>>, %arg4: memref<3x384x128xbf16, #tpu.memory_space<vmem>>, %arg5: memref<1x128xf32, #tpu.memory_space<vmem>>, %arg6: memref<1x256x128xbf16, #tpu.memory_space<vmem>>, %arg7: memref<1x8x128xf32, #tpu.memory_space<vmem>>, %arg8: memref<288x384xbf16, #tpu.memory_space<vmem>>) attributes {dimension_semantics = [#tpu.dimension_semantics<parallel>], iteration_bounds = array<i64: 2>, scalar_prefetch = 0 : i64, scratch_operands = 1 : i64, tpu.core_type = #tpu.core_type<tc>, window_params = [{transform_indices = @transform_0, window_bounds = array<i64: 1, 256, 128>}, {pipeline_mode = #tpu.pipeline_mode<synchronous>, transform_indices = @transform_1, window_bounds = array<i64: 128, 128>}, {pipeline_mode = #tpu.pipeline_mode<synchronous>, transform_indices = @transform_2, window_bounds = array<i64: 1, 128>}, {pipeline_mode = #tpu.pipeline_mode<synchronous>, transform_indices = @transform_3, window_bounds = array<i64: 3, 384, 128>}, {pipeline_mode = #tpu.pipeline_mode<synchronous>, transform_indices = @transform_4, window_bounds = array<i64: 1, 128>}, {transform_indices = @transform_5, window_bounds = array<i64: 1, 256, 128>}, {transform_indices = @transform_6, window_bounds = array<i64: 1, 8, 128>}]} {
    %c0 = arith.constant 0 : index
    %c0_0 = arith.constant 0 : index
    %c0_1 = arith.constant 0 : index
    %0 = vector.load %arg1[%c0, %c0_0, %c0_1] : memref<1x256x128xbf16, #tpu.memory_space<vmem>>, vector<1x256x128xbf16>
    %1 = vector.shape_cast %0 : vector<1x256x128xbf16> to vector<256x128xbf16>
    %c0_2 = arith.constant 0 : index
    %c0_3 = arith.constant 0 : index
    %2 = vector.load %arg2[%c0_2, %c0_3] : memref<128x128xbf16, #tpu.memory_space<vmem>>, vector<128x128xbf16>
    %cst = arith.constant dense<0.000000e+00> : vector<256x128xf32>
    %3 = tpu.matmul %1, %2, %cst {dimension_numbers = #tpu.dot_dimension_numbers<[1], [0], [0], [1], [0, 0, 1, 1], [], []>} : vector<256x128xbf16>, vector<128x128xbf16>, vector<256x128xf32> -> vector<256x128xf32>
    %c0_4 = arith.constant 0 : index
    %c0_5 = arith.constant 0 : index
    %4 = vector.load %arg3[%c0_4, %c0_5] : memref<1x128xf32, #tpu.memory_space<vmem>>, vector<1x128xf32>
    %5 = vector.broadcast %4 : vector<1x128xf32> to vector<256x128xf32>
    %6 = arith.addf %3, %5 : vector<256x128xf32>
    %cst_6 = arith.constant 0.000000e+00 : f32
    %7 = vector.broadcast %cst_6 : f32 to vector<256x128xf32>
    %8 = arith.maximumf %6, %7 : vector<256x128xf32>
    %9 = arith.truncf %8 : vector<256x128xf32> to vector<256x128xbf16>
    %10 = tpu.iota {dimensions = array<i32: 0>} : vector<256x1xi32>
    %c16_i32 = arith.constant 16 : i32
    %c0_i32 = arith.constant 0 : i32
    %11 = arith.cmpi eq, %c16_i32, %c0_i32 : i32
    %c1_i32 = arith.constant 1 : i32
    %12 = arith.select %11, %c1_i32, %c16_i32 : i32
    %13 = vector.broadcast %12 : i32 to vector<256x1xi32>
    %14 = arith.remsi %10, %13 : vector<256x1xi32>
    %c0_i32_7 = arith.constant 0 : i32
    %15 = vector.broadcast %c0_i32_7 : i32 to vector<256x1xi32>
    %16 = arith.cmpi ne, %14, %15 : vector<256x1xi32>
    %c0_i32_8 = arith.constant 0 : i32
    %17 = vector.broadcast %c0_i32_8 : i32 to vector<256x1xi32>
    %18 = arith.cmpi slt, %14, %17 : vector<256x1xi32>
    %c0_i32_9 = arith.constant 0 : i32
    %19 = arith.cmpi slt, %12, %c0_i32_9 : i32
    %20 = vector.broadcast %19 : i1 to vector<256x1xi1>
    %21 = vector.broadcast %20 : vector<256x1xi1> to vector<256x1xi1>
    %22 = arith.xori %18, %21 : vector<256x1xi1>
    %23 = arith.andi %22, %16 : vector<256x1xi1>
    %24 = vector.broadcast %12 : i32 to vector<256x1xi32>
    %25 = arith.addi %14, %24 : vector<256x1xi32>
    %26 = arith.select %23, %25, %14 : vector<256x1xi1>, vector<256x1xi32>
    %c15_i32 = arith.constant 15 : i32
    %27 = vector.broadcast %c15_i32 : i32 to vector<256x1xi32>
    %28 = arith.cmpi slt, %26, %27 : vector<256x1xi32>
    %cst_10 = arith.constant 0.000000e+00 : bf16
    %29 = vector.broadcast %cst_10 : bf16 to vector<256x128xbf16>
    %30 = vector.shape_cast %28 : vector<256x1xi1> to vector<256x1xi1>
    %31 = vector.broadcast %30 : vector<256x1xi1> to vector<256x128xi1>
    %32 = arith.select %31, %9, %29 : vector<256x128xi1>, vector<256x128xbf16>
    %c0_i32_11 = arith.constant 0 : i32
    %33 = vector.broadcast %c0_i32_11 : i32 to vector<256x1xi32>
    %34 = arith.cmpi sgt, %26, %33 : vector<256x1xi32>
    %cst_12 = arith.constant 0.000000e+00 : bf16
    %35 = vector.broadcast %cst_12 : bf16 to vector<256x128xbf16>
    %36 = vector.shape_cast %34 : vector<256x1xi1> to vector<256x1xi1>
    %37 = vector.broadcast %36 : vector<256x1xi1> to vector<256x128xi1>
    %38 = arith.select %37, %9, %35 : vector<256x128xi1>, vector<256x128xbf16>
    %cst_13 = arith.constant 0.000000e+00 : bf16
    %39 = vector.broadcast %cst_13 : bf16 to vector<288x384xbf16>
    %c0_14 = arith.constant 0 : index
    %c0_15 = arith.constant 0 : index
    %40 = vector.load %arg8[%c0_14, %c0_15] : memref<288x384xbf16, #tpu.memory_space<vmem>>, vector<288x384xbf16>
    tpu.vector_store %arg8[%c0_14, %c0_15], %39 {strides = array<i32>} : memref<288x384xbf16, #tpu.memory_space<vmem>>, vector<288x384xbf16>,
    %c17 = arith.constant 17 : index
    %c0_16 = arith.constant 0 : index
    %41 = vector.load %arg8[%c17, %c0_16] : memref<288x384xbf16, #tpu.memory_space<vmem>>, vector<256x128xbf16>
    tpu.vector_store %arg8[%c17, %c0_16], %32 {strides = array<i32>} : memref<288x384xbf16, #tpu.memory_space<vmem>>, vector<256x128xbf16>,
    %c16 = arith.constant 16 : index
    %c128 = arith.constant 128 : index
    %42 = vector.load %arg8[%c16, %c128] : memref<288x384xbf16, #tpu.memory_space<vmem>>, vector<256x128xbf16>
    tpu.vector_store %arg8[%c16, %c128], %9 {strides = array<i32>} : memref<288x384xbf16, #tpu.memory_space<vmem>>, vector<256x128xbf16>,
    %c15 = arith.constant 15 : index
    %c256 = arith.constant 256 : index
    %43 = vector.load %arg8[%c15, %c256] : memref<288x384xbf16, #tpu.memory_space<vmem>>, vector<256x128xbf16>
    tpu.vector_store %arg8[%c15, %c256], %38 {strides = array<i32>} : memref<288x384xbf16, #tpu.memory_space<vmem>>, vector<256x128xbf16>,
    %c0_17 = arith.constant 0 : index
    %c0_18 = arith.constant 0 : index
    %44 = vector.load %arg8[%c0_17, %c0_18] : memref<288x384xbf16, #tpu.memory_space<vmem>>, vector<256x384xbf16>
    %c0_19 = arith.constant 0 : index
    %c0_20 = arith.constant 0 : index
    %c0_21 = arith.constant 0 : index
    %45 = vector.load %arg4[%c0_19, %c0_20, %c0_21] : memref<3x384x128xbf16, #tpu.memory_space<vmem>>, vector<1x384x128xbf16>
    %46 = vector.shape_cast %45 : vector<1x384x128xbf16> to vector<384x128xbf16>
    %cst_22 = arith.constant dense<0.000000e+00> : vector<256x128xf32>
    %47 = tpu.matmul %44, %46, %cst_22 {dimension_numbers = #tpu.dot_dimension_numbers<[1], [0], [0], [1], [0, 0, 1, 1], [], []>} : vector<256x384xbf16>, vector<384x128xbf16>, vector<256x128xf32> -> vector<256x128xf32>
    %c16_23 = arith.constant 16 : index
    %c0_24 = arith.constant 0 : index
    %48 = vector.load %arg8[%c16_23, %c0_24] : memref<288x384xbf16, #tpu.memory_space<vmem>>, vector<256x384xbf16>
    %c1 = arith.constant 1 : index
    %c0_25 = arith.constant 0 : index
    %c0_26 = arith.constant 0 : index
    %49 = vector.load %arg4[%c1, %c0_25, %c0_26] : memref<3x384x128xbf16, #tpu.memory_space<vmem>>, vector<1x384x128xbf16>
    %50 = vector.shape_cast %49 : vector<1x384x128xbf16> to vector<384x128xbf16>
    %cst_27 = arith.constant dense<0.000000e+00> : vector<256x128xf32>
    %51 = tpu.matmul %48, %50, %cst_27 {dimension_numbers = #tpu.dot_dimension_numbers<[1], [0], [0], [1], [0, 0, 1, 1], [], []>} : vector<256x384xbf16>, vector<384x128xbf16>, vector<256x128xf32> -> vector<256x128xf32>
    %52 = arith.addf %47, %51 : vector<256x128xf32>
    %c32 = arith.constant 32 : index
    %c0_28 = arith.constant 0 : index
    %53 = vector.load %arg8[%c32, %c0_28] : memref<288x384xbf16, #tpu.memory_space<vmem>>, vector<256x384xbf16>
    %c2 = arith.constant 2 : index
    %c0_29 = arith.constant 0 : index
    %c0_30 = arith.constant 0 : index
    %54 = vector.load %arg4[%c2, %c0_29, %c0_30] : memref<3x384x128xbf16, #tpu.memory_space<vmem>>, vector<1x384x128xbf16>
    %55 = vector.shape_cast %54 : vector<1x384x128xbf16> to vector<384x128xbf16>
    %cst_31 = arith.constant dense<0.000000e+00> : vector<256x128xf32>
    %56 = tpu.matmul %53, %55, %cst_31 {dimension_numbers = #tpu.dot_dimension_numbers<[1], [0], [0], [1], [0, 0, 1, 1], [], []>} : vector<256x384xbf16>, vector<384x128xbf16>, vector<256x128xf32> -> vector<256x128xf32>
    %57 = arith.addf %52, %56 : vector<256x128xf32>
    %c0_32 = arith.constant 0 : index
    %c0_33 = arith.constant 0 : index
    %58 = vector.load %arg5[%c0_32, %c0_33] : memref<1x128xf32, #tpu.memory_space<vmem>>, vector<1x128xf32>
    %59 = vector.broadcast %58 : vector<1x128xf32> to vector<256x128xf32>
    %60 = arith.addf %57, %59 : vector<256x128xf32>
    %cst_34 = arith.constant 0.000000e+00 : f32
    %61 = vector.broadcast %cst_34 : f32 to vector<256x128xf32>
    %62 = arith.maximumf %60, %61 : vector<256x128xf32>
    %63 = arith.truncf %62 : vector<256x128xf32> to vector<256x128xbf16>
    %c0_35 = arith.constant 0 : index
    %c0_36 = arith.constant 0 : index
    %c0_37 = arith.constant 0 : index
    %64 = vector.load %arg6[%c0_35, %c0_36, %c0_37] : memref<1x256x128xbf16, #tpu.memory_space<vmem>>, vector<1x256x128xbf16>
    %65 = vector.shape_cast %64 : vector<1x256x128xbf16> to vector<256x128xbf16>
    %66 = vector.shape_cast %63 : vector<256x128xbf16> to vector<1x256x128xbf16>
    tpu.vector_store %arg6[%c0_35, %c0_36, %c0_37], %66 {strides = array<i32>} : memref<1x256x128xbf16, #tpu.memory_space<vmem>>, vector<1x256x128xbf16>,
    %cst_38 = arith.constant dense<0.000000e+00> : vector<128xf32>
    %67 = vector.multi_reduction <add>, %62, %cst_38 [0] : vector<256x128xf32> to vector<128xf32>
    %68 = vector.shape_cast %67 : vector<128xf32> to vector<1x128xf32>
    %cst_39 = arith.constant 2.560000e+02 : f32
    %69 = vector.broadcast %cst_39 : f32 to vector<1x128xf32>
    %70 = arith.divf %68, %69 : vector<1x128xf32>
    %71 = vector.shape_cast %70 : vector<1x128xf32> to vector<1x128xf32>
    %72 = vector.broadcast %71 : vector<1x128xf32> to vector<8x128xf32>
    %c0_40 = arith.constant 0 : index
    %c0_41 = arith.constant 0 : index
    %c0_42 = arith.constant 0 : index
    %73 = vector.load %arg7[%c0_40, %c0_41, %c0_42] : memref<1x8x128xf32, #tpu.memory_space<vmem>>, vector<1x8x128xf32>
    %74 = vector.shape_cast %73 : vector<1x8x128xf32> to vector<8x128xf32>
    %75 = vector.shape_cast %72 : vector<8x128xf32> to vector<1x8x128xf32>
    tpu.vector_store %arg7[%c0_40, %c0_41, %c0_42], %75 {strides = array<i32>} : memref<1x8x128xf32, #tpu.memory_space<vmem>>, vector<1x8x128xf32>,
    return
  }
  func.func @transform_0(%arg0: i32) -> (i32, i32, i32) {
    %c0_i32 = arith.constant 0 : i32
    %c0_i32_0 = arith.constant 0 : i32
    %c0_i32_1 = arith.constant 0 : i32
    return %arg0, %c0_i32, %c0_i32_0 : i32, i32, i32
  }
  func.func @transform_1(%arg0: i32) -> (i32, i32) {
    %c0_i32 = arith.constant 0 : i32
    %c0_i32_0 = arith.constant 0 : i32
    %c0_i32_1 = arith.constant 0 : i32
    return %c0_i32, %c0_i32_0 : i32, i32
  }
  func.func @transform_2(%arg0: i32) -> (i32, i32) {
    %c0_i32 = arith.constant 0 : i32
    %c0_i32_0 = arith.constant 0 : i32
    %c0_i32_1 = arith.constant 0 : i32
    return %c0_i32, %c0_i32_0 : i32, i32
  }
  func.func @transform_3(%arg0: i32) -> (i32, i32, i32) {
    %c0_i32 = arith.constant 0 : i32
    %c0_i32_0 = arith.constant 0 : i32
    %c0_i32_1 = arith.constant 0 : i32
    %c0_i32_2 = arith.constant 0 : i32
    return %c0_i32, %c0_i32_0, %c0_i32_1 : i32, i32, i32
  }
  func.func @transform_4(%arg0: i32) -> (i32, i32) {
    %c0_i32 = arith.constant 0 : i32
    %c0_i32_0 = arith.constant 0 : i32
    %c0_i32_1 = arith.constant 0 : i32
    return %c0_i32, %c0_i32_0 : i32, i32
  }
  func.func @transform_5(%arg0: i32) -> (i32, i32, i32) {
    %c0_i32 = arith.constant 0 : i32
    %c0_i32_0 = arith.constant 0 : i32
    %c0_i32_1 = arith.constant 0 : i32
    return %arg0, %c0_i32, %c0_i32_0 : i32, i32, i32
  }
  func.func @transform_6(%arg0: i32) -> (i32, i32, i32) {
    %c0_i32 = arith.constant 0 : i32
    %c0_i32_0 = arith.constant 0 : i32
    %c0_i32_1 = arith.constant 0 : i32
    return %arg0, %c0_i32, %c0_i32_0 : i32, i32, i32
  }
}

</mosaic_0001>

<bundles_post_ra>
// kernel: tpu_custom_call.1
= control target key start
LH: loop header
LB: loop body
LE: loop exit
PB: predicated region body
PF: predicated region fallthrough
CT: control target
= control target key end

     0   :  { %12 = vsyncpa [#allocation4], 0  ;;  %s7631_s0 = inlined_call_operand.hbm [shape: bf16[2,256,128], index: 0, kind: input, shape index: {}]   ;;  %s7632_s1 = inlined_call_operand.hbm [shape: bf16[128,128], index: 1, kind: input, shape index: {}]   ;;  %s7633_s2 = inlined_call_operand.vmem [shape: f32[1,128], index: 2, kind: input, shape index: {}]   ;;  %s7634_s3 = inlined_call_operand.hbm [shape: bf16[3,384,128], index: 3, kind: input, shape index: {}]   ;;  %s7635_s4 = inlined_call_operand.vmem [shape: f32[1,128], index: 4, kind: input, shape index: {}]   ;;  %s7636_s5 = inlined_call_operand.hbm [shape: bf16[2,256,128], index: 5, kind: output, shape index: {0}]   ;;  %s7637_s6 = inlined_call_operand.hbm [shape: f32[2,8,128], index: 6, kind: output, shape index: {1}]  }
   0x1   :  { %14 = vsyncpa [#allocation4 + $0x1], 0 }
   0x2   :  { %15 = vsyncpa [#allocation7], 0 }
   0x3   :  { %16 = vsyncpa [#allocation5], 0 }
   0x4   :  { %18 = vsyncpa [#allocation5 + $0x1], 0 }
   0x5   :  { %19 = vsyncpa [#allocation11], 0 }
   0x6   :  { %21 = vsyncpa [#allocation11 + $0x1], 0  ;;  %s6108_s21 = smov 0   ;;  %s6110_s22 = smov 0  }
   0x7   :  { %s6112_s23 = smov 0   ;;  %s6114_s24 = smov 0  }
   0x8 LB: > { %s6129_s25 = sadd.s32 4294967295, %s6062_s24   ;;  %s4677_s26 = sadd.s32 4294967294, %s6062_s24   ;;  %s6062_s24 = sphi %s6114_s24, %s7775_s24   ;;  %s6058_s23 = sphi %s6112_s23, %s7774_s23   ;;  %s6054_s22 = sphi %s6110_s22, %s7773_s22   ;;  %s6050_s21 = sphi %s6108_s21, %s7772_s21  }
   0x9   : > { %p47_p0 = scmp.ne.s32.totalorder %s6054_s22, %s6050_s21  ;;  %p48_p1 = scmp.eq.s32.totalorder %s6129_s25, 0 }
   0xa   : > { %p155_p2 = scmp.eq.s32.totalorder %s6129_s25, 1  ;;  %p161_p3 = scmp.eq.s32.totalorder %s4677_s26, 1 }
   0xb   : > { %p6138_p4 = por %p48_p1, %p47_p0  ;;  %p4678_p5 = scmp.ge.s32.totalorder %s6062_s24, 1 }
   0xc   : > { %p6143_p6 = por %p161_p3, %p47_p0  ;;  %p194_p7 = scmp.lt.s32.totalorder %s6062_s24, 3 }
   0xd   : > { %s205_s7 = sshll.u32 %s7632_s1, 4  ;;  %s6064_s9 = smov [#allocation6]   ;;  %s206_s7 = int_to_ptr.hbm [resolvable:$true] %s205_s7 }
   0xe   : > { %p6151_p8 = pnand %p4678_p5, %p194_p7  ;;  %s207_s10 = sshll.u32 %s6064_s9, 4  ;;  %s208_s10 = int_to_ptr.vmem [resolvable:$true] %s207_s10 }
   0xf   : > { %s222_s13 = sshll.u32 %s7634_s3, 4  ;;  %s7638_s14 = smov 64   ;;  %s223_s13 = int_to_ptr.hbm [resolvable:$true] %s222_s13 }
  0x10   : > { %p5800_p9 = pneg %p6151_p8  ;;  %s7639_s15 = smov 4  }
  0x11   : > { %s6067_s16 = smov [#allocation8]   ;;  %s6170_s18 = sadd.s32 1, %s6062_s24  }
  0x12   : > { %p5801_p10 = pnand %p5800_p9, %p48_p1  ;;  %s224_s17 = sshll.u32 %s6067_s16, 4  ;;  %s225_s17 = int_to_ptr.vmem [resolvable:$true] %s224_s17 }
  0x13   : > { %s34_s19 = sadd.s32 1, %s6058_s23  ;;  %s31_s20 = ssub.s32 %s6062_s24, %s6170_s18 }
  0x14   : > { %5803 = dma.hbm_to_vmem [thread:$0]  (!%p5801_p10), %s206_s7, 1024, %s208_s10, [#allocation7], %s7638_s14, %s7638_s14, %s7639_s15  }
  0x15   : > { %5806 = dma.hbm_to_vmem [thread:$0]  (!%p5801_p10), %s223_s13, 9216, %s225_s17, [#allocation7], %s7638_s14, %s7638_s14, %s7639_s15  }
  0x16   : > { %p41_p12 = scmp.ne.s32.totalorder %s6058_s23, %s6054_s22  ;;  %p32_p13 = scmp.eq.s32.totalorder %s31_s20, 0 }
  0x17   : > { %p42_p0 = scmp.eq.s32.totalorder %s6062_s24, 0  ;;  %p5820_p5 = scmp.lt.s32.totalorder %s6062_s24, 2 }
  0x18   : > { %p6180_p3 = por %p155_p2, %p41_p12  ;;  %s241_s30 = sand.u32 1, %s6058_s23  }
  0x19   : > { %s6186_s29 = scalar_select %p32_p13, %s6058_s23, %s34_s19  }
  0x1a   : > { %p43_p7 = por %p42_p0, %p41_p12  ;;  %s4682_s7 = sshll.u32 %s241_s30, 7 }
  0x1b   : > { %s5478_s9 = sshll.u32 %s6062_s24, 7  ;;  %s245_s13 = scalar_lea.vmem [#allocation3], %s4682_s7 }
  0x1c   : > { %s250_s12 = scalar_lea.hbm %s7631_s0, %s5478_s9  ;;  %s253_s16 = sshll.u32 %s245_s13, 4  ;;  %s254_s16 = int_to_ptr.vmem [resolvable:$true] %s253_s16 }
  0x1d   : > { %s251_s17 = sshll.u32 %s250_s12, 4  ;;  %p6193_p2 = pnand %p5820_p5, %p43_p7  ;;  %s252_s17 = int_to_ptr.hbm [resolvable:$true] %s251_s17 }
  0x1e   : > { %s242_s19 = scalar_lea.sflag [#allocation4], %s241_s30  ;;  %s5930_s14 = sshra.s32 %s252_s17, 4  ;;  %s5931_s14 = int_to_ptr.hbm [resolvable:$true] %s5930_s14 }
  0x1f   : > { %s5932_s15 = scalar_lea.hbm %s5931_s14, 128  ;;  %p5934_p10 = pneg %p6193_p2 }
  0x20   : > { %p5933_p9 = scmp.ne.s32.totalorder %s5931_s14, %s5932_s15  ;;  %s5937_s10 = scalar_lea.hbm %s7631_s0, 256 }
  0x21   : > { %p5938_p0 = scmp.lt.s32.totalorder %s5931_s14, %s7631_s0  ;;  %p5939_p5 = scmp.lt.s32.totalorder %s5937_s10, %s5932_s15 }
  0x22   : > { %p5935_p12 = pnand %p5934_p10, %p5933_p9 }
  0x23   : > { %p5940_p7 = por %p5939_p5, %p5938_p0 }
  0x24   : > { %p5936_p13 = pneg %p5935_p12 }
  0x26   : > { %p5941_p11 = pnand %p5940_p7, %p5936_p13 }
  0x28   : > { %5944 = shalt.err (!%p5941_p11)
}
  0x29   : > { %s7645_s30 = smov 4   ;;  %s7646_s13 = smov 64  }
  0x2a   : > { %5810 = dma.hbm_to_vmem [thread:$0]  (!%p6193_p2), %s252_s17, 2048, %s254_s16, %s242_s19, %s7646_s13, %s7646_s13, %s7645_s30  }
  0x2b   : > { %265 = sbr.rel (%p6151_p8) target bundleno = 1182 (0x49e), region = 40 }
  0x30   : > { %s6213_s9 = sand.u32 1, %s6054_s22  }
  0x31   : > { %s4686_s14 = sshll.u32 %s6213_s9, 7  ;;  %s268_s15 = scalar_lea.sflag [#allocation4], %s6213_s9 }
  0x32   : > { %s6219_s7 = scalar_lea.vmem [#allocation3], %s4686_s14 }
  0x33   : > { %6033 = dma.done.wait (%p6138_p4), %s268_s15, 2048  }
  0x34   : > { %6035 = vsyncadd (%p6138_p4), %s268_s15, 4294965248 }
  0x35   : > { %6037 = dma.done.wait (%p48_p1), [#allocation7], 10240  }
  0x36   : > { %6039 = vsyncadd (%p48_p1), [#allocation7], 4294957056  ;;  %v5502_v0 = vld [vmem:[#allocation6 + $0x38] sm:$0xff]  ;;  %v5501_v1 = vld [vmem:[#allocation6 + $0x30] sm:$0xff]  ;;  %v6068_v31 = vmov 0   ;;  %vm1798_vm0 = vcmask 1043456   ;;  %v666_v37 = vlaneseq }
  0x37   : > { %513 = vmatpush.bf16.msra.mxu0 %v5502_v0  ;;  %5770 = vmatpush.bf16.msra.mxu2 %v5502_v0  ;;  %v5500_v2 = vld [vmem:[#allocation6 + $0x28] sm:$0xff]  ;;  %v5499_v3 = vld [vmem:[#allocation6 + $0x20] sm:$0xff]  ;;  %v5498_v4 = vld [vmem:[#allocation6 + $0x18] sm:$0xff]  ;;  %1406 = vst [vmem:[#allocation2 + $0x14] sm:$0xf] %v6068_v31  ;;  %vm6069_vm4 = vmmov 1  }
  0x38   : > { %v5497_v5 = vld [vmem:[#allocation6 + $0x10] sm:$0xff]  ;;  %v5496_v6 = vld [vmem:[#allocation6 + $0x8] sm:$0xff]  ;;  %v5495_v7 = vld [vmem:[#allocation6] sm:$0xff]  ;;  %1407 = vst [vmem:[#allocation2 + $0x18] sm:$0xff] %v6068_v31  ;;  %vm1872_vm1 = vsmask.f32 3328 }
  0x39   : > { %v5479_v8 = vld [vmem:[%s6219_s7] sm:$0xff]  ;;  %v5480_v10 = vld [vmem:[%s6219_s7 + $0x8] sm:$0xff]  ;;  %v5481_v12 = vld [vmem:[%s6219_s7 + $0x10] sm:$0xff]  ;;  %1403 = vst [vmem:[#allocation2] sm:$0xff] %v6068_v31  ;;  %v6271_v38 = vshrl.u32 %v666_v37, 7  ;;  %vm2227_vm7 = vcmask 1043459  }
  0x3a   : > { %v5487_v9 = vld [vmem:[%s6219_s7 + $0x40] sm:$0xff]  ;;  %v5488_v11 = vld [vmem:[%s6219_s7 + $0x48] sm:$0xff]  ;;  %v5489_v13 = vld [vmem:[%s6219_s7 + $0x50] sm:$0xff]  ;;  %1404 = vst [vmem:[#allocation2 + $0x8] sm:$0xf] %v6068_v31  ;;  %s7383_s10 = scalar_lea.vmem [#allocation9], %s4686_s14 }
  0x3b   : > { %514 = vmatpush.bf16.msra.mxu0 %v5501_v1  ;;  %5771 = vmatpush.bf16.msra.mxu2 %v5501_v1  ;;  %v5482_v14 = vld [vmem:[%s6219_s7 + $0x18] sm:$0xff]  ;;  %v5483_v16 = vld [vmem:[%s6219_s7 + $0x20] sm:$0xff]  ;;  %v5484_v19 = vld [vmem:[%s6219_s7 + $0x28] sm:$0xff]  ;;  %1405 = vst [vmem:[#allocation2 + $0xc] sm:$0xff] %v6068_v31  ;;  %v703_v40 = vand.u32 15, %v6271_v38  ;;  %v668_v44 = vadd.s32 8, %v6271_v38 }
  0x3c   : > { %v5490_v15 = vld [vmem:[%s6219_s7 + $0x58] sm:$0xff]  ;;  %v5491_v17 = vld [vmem:[%s6219_s7 + $0x60] sm:$0xff]  ;;  %v5492_v20 = vld [vmem:[%s6219_s7 + $0x68] sm:$0xff]  ;;  %1408 = vst [vmem:[#allocation2 + $0x20] sm:$0xf] %v6068_v31  ;;  %v670_v37 = vadd.s32 24, %v6271_v38 }
  0x3d   : > { %v5558_v18 = vld [vmem:[#allocation8 + $0x38] sm:$0xff]  ;;  %v5557_v21 = vld [vmem:[#allocation8 + $0x30] sm:$0xff]  ;;  %v5556_v23 = vld [vmem:[#allocation8 + $0x28] sm:$0xff]  ;;  %1409 = vst [vmem:[#allocation2 + $0x24] sm:$0xff] %v6068_v31  ;;  %vm6288_vm3 = vcmp.gt.s32.totalorder %v703_v40, 0  ;;  %v710_v48 = vand.u32 15, %v668_v44 }
  0x3e   : > { %v5593_v22 = vld [vmem:[#allocation8 + $0x138] sm:$0xff]  ;;  %v5592_v24 = vld [vmem:[#allocation8 + $0x130] sm:$0xff]  ;;  %v5555_v25 = vld [vmem:[#allocation8 + $0x20] sm:$0xff]  ;;  %1410 = vst [vmem:[#allocation2 + $0x2c] sm:$0xf] %v6068_v31  ;;  %s5674_s11 = sshll.u32 %s6129_s25, 7 }
  0x3f   : > { %515 = vmatpush.bf16.msra.mxu0 %v5500_v2  ;;  %5772 = vmatpush.bf16.msra.mxu2 %v5500_v2  ;;  %v5485_v26 = vld [vmem:[%s6219_s7 + $0x30] sm:$0xff]  ;;  %v5585_v28 = vld [vmem:[#allocation8 + $0xf8] sm:$0xff]  ;;  %v5591_v29 = vld [vmem:[#allocation8 + $0x128] sm:$0xff]  ;;  %1411 = vst [vmem:[#allocation2 + $0x30] sm:$0xff] %v6068_v31  ;;  %vm2228_vm8 = vsmask.f32 7950  ;;  %s4534_s13 = scalar_lea.hbm %s7636_s5, %s5674_s11 }
  0x40   : > { %v5493_v27 = vld [vmem:[%s6219_s7 + $0x70] sm:$0xff]  ;;  %v5554_v30 = vld [vmem:[#allocation8 + $0x18] sm:$0xff]  ;;  %2833 = vmatpush.bf16.msra.mxu1 %v5585_v28  ;;  %v5590_v33 = vld [vmem:[#allocation8 + $0x120] sm:$0xff]  ;;  %5778 = vmatpush.bf16.msra.mxu3 %v5585_v28  ;;  %1412 = vst [vmem:[#allocation2 + $0x38] sm:$0xf] %v6068_v31  ;;  %vm6315_vm11 = vcmp.lt.s32.totalorder %v710_v48, 15 }
  0x41   : > { %v5584_v32 = vld [vmem:[#allocation8 + $0xf0] sm:$0xff]  ;;  %1413 = vst [vmem:[#allocation2 + $0x3c] sm:$0xff] %v6068_v31  ;;  %v5486_v35 = vld [vmem:[%s6219_s7 + $0x38] sm:$0xff]  ;;  %vm6259_vm2 = vmand %vm1798_vm0, %vm1872_vm1  ;;  %vm1799_vm9 = vsmask.f32 7938  ;;  %s4535_s14 = sshll.u32 %s7383_s10, 4  ;;  %s4536_s14 = int_to_ptr.vmem [resolvable:$true] %s4535_s14 }
  0x42   : > { %v5553_v34 = vld [vmem:[#allocation8 + $0x10] sm:$0xff]  ;;  %1414 = vst [vmem:[#allocation2 + $0x44] sm:$0xf] %v6068_v31  ;;  %vm6295_vm5 = vmpackc.low %vm6069_vm4, %vm6069_vm4  ;;  %v2230_v51 = vld [vmem:[#allocation2 + $0x14] sm:$0x8]  ;;  %s4537_s15 = sshll.u32 %s4534_s13, 4  ;;  %s4538_s15 = int_to_ptr.hbm [resolvable:$true] %s4537_s15 }
  0x43   : > { %516 = vmatpush.bf16.msra.mxu0 %v5499_v3  ;;  %5773 = vmatpush.bf16.msra.mxu2 %v5499_v3  ;;  %1415 = vst [vmem:[#allocation2 + $0x48] sm:$0xff] %v6068_v31  ;;  %v6280_v39 = vld [vmem:[%s7633_s2] ss:$0 sm:$0xff]  ;;  %vm1339_vm6 = vmpackc.low %vm6288_vm3, %vm6288_vm3  ;;  %v5494_v58 = vld [vmem:[%s6219_s7 + $0x78] sm:$0xff]  ;;  %vm1475_vm3 = vsmask.f32 256 }
  0x44   : > { %2834 = vmatpush.bf16.msra.mxu1 %v5584_v32  ;;  %5779 = vmatpush.bf16.msra.mxu3 %v5584_v32  ;;  %1416 = vst [vmem:[#allocation2 + $0x50] sm:$0xf] %v6068_v31  ;;  %vm6308_vm10 = vmand %vm2227_vm7, %vm2228_vm8  ;;  %v5583_v59 = vld [vmem:[#allocation8 + $0xe8] sm:$0xff]  ;;  %v5589_v60 = vld [vmem:[#allocation8 + $0x118] sm:$0xff]  ;;  %vm1476_vm4 = vsmask.f32 4368 }
  0x45   : > { %1417 = vst [vmem:[#allocation2 + $0x54] sm:$0xff] %v6068_v31  ;;  %v5552_v0 = vld [vmem:[#allocation8 + $0x8] sm:$0xff]  ;;  %vm6327_vm12 = vmand %vm1798_vm0, %vm1799_vm9  ;;  %v5586_v32 = vld [vmem:[#allocation8 + $0x100] sm:$0xff]  ;;  %vm1873_vm0 = vsmask.f32 7440  ;;  %s4518_s7 = scalar_lea.sflag [#allocation5], %s6213_s9 }
  0x46   : > { %1418 = vst [vmem:[#allocation2 + $0x5c] sm:$0xf] %v6068_v31  ;;  %v1801_v2 = vld [vmem:[#allocation2 + $0x18] sm:$0xf]  ;;  %vm1180_vm13 = vmpackc.low %vm6315_vm11, %vm6315_vm11  ;;  %s5974_s27 = sshra.s32 %s4538_s15, 4  ;;  %s5980_s20 = scalar_lea.hbm %s7636_s5, 256  ;;  %s5975_s27 = int_to_ptr.hbm [resolvable:$true] %s5974_s27 }
  0x47   : > { %517 = vmatpush.bf16.msra.mxu0 %v5498_v4  ;;  %5774 = vmatpush.bf16.msra.mxu2 %v5498_v4  ;;  %1419 = vst [vmem:[#allocation2 + $0x60] sm:$0xff] %v6068_v31  ;;  %vm6396_vm7 = vmor %vm1872_vm1, %vm1873_vm0  ;;  %s5976_s8 = scalar_lea.hbm %s5975_s27, 128  ;;  %p5981_p11 = scmp.lt.s32.totalorder %s5975_s27, %s7636_s5 }
  0x48   : > { %1420 = vst [vmem:[#allocation2 + $0x68] sm:$0xf] %v6068_v31  ;;  %2835 = vmatpush.bf16.msra.mxu1 %v5583_v59  ;;  %5780 = vmatpush.bf16.msra.mxu3 %v5583_v59  ;;  %vm6404_vm8 = vmor %vm1475_vm3, %vm1476_vm4  ;;  %p5977_p1 = scmp.ne.s32.totalorder %s5975_s27, %s5976_s8  ;;  %p5982_p2 = scmp.lt.s32.totalorder %s5980_s20, %s5976_s8 }
  0x49   : > { %1421 = vst [vmem:[#allocation2 + $0x6c] sm:$0xff] %v6068_v31 }
  0x4a   : > { %1422 = vst [vmem:[#allocation2 + $0x74] sm:$0xf] %v6068_v31  ;;  %p5978_p4 = pnand %p5977_p1, %p6180_p3  ;;  %p5983_p9 = por %p5982_p2, %p5981_p11 }
  0x4b   : > { %518 = vmatpush.bf16.msra.mxu0 %v5497_v5  ;;  %5775 = vmatpush.bf16.msra.mxu2 %v5497_v5  ;;  %1423 = vst [vmem:[#allocation2 + $0x78] sm:$0xff] %v6068_v31 }
  0x4c   : > { %1424 = vst [vmem:[#allocation2 + $0x80] sm:$0xf] %v6068_v31  ;;  %p5979_p8 = pneg %p5978_p4 }
  0x4d   : > { %1425 = vst [vmem:[#allocation2 + $0x84] sm:$0xff] %v6068_v31 }
  0x4e   : > { %1426 = vst [vmem:[#allocation2 + $0x8c] sm:$0xf] %v6068_v31  ;;  %p5984_p10 = pnand %p5983_p9, %p5979_p8 }
  0x4f   : > { %519 = vmatpush.bf16.msra.mxu0 %v5496_v6  ;;  %5776 = vmatpush.bf16.msra.mxu2 %v5496_v6  ;;  %1427 = vst [vmem:[#allocation2 + $0x90] sm:$0xff] %v6068_v31 }
  0x50   : > { %1428 = vst [vmem:[#allocation2 + $0x98] sm:$0xf] %v6068_v31 }
  0x51   : > { %1429 = vst [vmem:[#allocation2 + $0x9c] sm:$0xff] %v6068_v31 }
  0x52   : > { %1430 = vst [vmem:[#allocation2 + $0xa4] sm:$0xf] %v6068_v31 }
  0x53   : > { %520 = vmatpush.bf16.msra.mxu0 %v5495_v7  ;;  %5777 = vmatpush.bf16.msra.mxu2 %v5495_v7  ;;  %1431 = vst [vmem:[#allocation2 + $0xa8] sm:$0xff] %v6068_v31 }
  0x54   : > { %1432 = vst [vmem:[#allocation2 + $0xb0] sm:$0xf] %v6068_v31 }
  0x55   : > { %1433 = vst [vmem:[#allocation2 + $0xb4] sm:$0xff] %v6068_v31 }
  0x56   : > { %521 = vmatmul.bf16.vlgmr.msra.gmra.mxu0 %v5479_v8  ;;  %561 = vmatmul.bf16.vlgmr.msra.gmra.mxu2 %v5487_v9  ;;  %1434 = vst [vmem:[#allocation2 + $0xbc] sm:$0xf] %v6068_v31  ;;  %v5582_v8 = vld [vmem:[#allocation8 + $0xe0] sm:$0xff]  ;;  %v5588_v9 = vld [vmem:[#allocation8 + $0x110] sm:$0xff] }
  0x57   : > { %3260 = vmatpush.bf16.msrb.mxu0 %v5558_v18  ;;  %2922 = vmatpush.bf16.msrb.mxu2 %v5593_v22  ;;  %1435 = vst [vmem:[#allocation2 + $0xc0] sm:$0xff] %v6068_v31  ;;  %v5581_v22 = vld [vmem:[#allocation8 + $0xd8] sm:$0xff] }
  0x58   : > { %1436 = vst [vmem:[#allocation2 + $0xc8] sm:$0xf] %v6068_v31  ;;  %2836 = vmatpush.bf16.msra.mxu1 %v5582_v8  ;;  %5781 = vmatpush.bf16.msra.mxu3 %v5582_v8 }
  0x59   : > { %1437 = vst [vmem:[#allocation2 + $0xcc] sm:$0xff] %v6068_v31 }
  0x5a   : > { %1438 = vst [vmem:[#allocation2 + $0xd4] sm:$0xf] %v6068_v31 }
  0x5b   : > { %3261 = vmatpush.bf16.msrb.mxu0 %v5557_v21  ;;  %2923 = vmatpush.bf16.msrb.mxu2 %v5592_v24  ;;  %1439 = vst [vmem:[#allocation2 + $0xd8] sm:$0xff] %v6068_v31  ;;  %v5504_v21 = vld [vmem:[#allocation2 + $0x8] sm:$0xf0] }
  0x5c   : > { %1440 = vst [vmem:[#allocation2 + $0xe0] sm:$0xf] %v6068_v31  ;;  %2837 = vmatpush.bf16.msra.mxu1 %v5581_v22  ;;  %5782 = vmatpush.bf16.msra.mxu3 %v5581_v22 }
  0x5d   : > { %1441 = vst [vmem:[#allocation2 + $0xe4] sm:$0xff] %v6068_v31 }
  0x5e   : > { %1442 = vst [vmem:[#allocation2 + $0xec] sm:$0xf] %v6068_v31 }
  0x5f   : > { %3262 = vmatpush.bf16.msrb.mxu0 %v5556_v23  ;;  %2924 = vmatpush.bf16.msrb.mxu2 %v5591_v29  ;;  %1443 = vst [vmem:[#allocation2 + $0xf0] sm:$0xff] %v6068_v31  ;;  %v5587_v23 = vld [vmem:[#allocation8 + $0x108] sm:$0xff] }
  0x60   : > { %1444 = vst [vmem:[#allocation2 + $0xf8] sm:$0xf] %v6068_v31 }
  0x61   : > { %1445 = vst [vmem:[#allocation2 + $0xfc] sm:$0xff] %v6068_v31 }
  0x62   : > { %1446 = vst [vmem:[#allocation2 + $0x104] sm:$0xf] %v6068_v31 }
  0x63   : > { %3263 = vmatpush.bf16.msrb.mxu0 %v5555_v25  ;;  %2925 = vmatpush.bf16.msrb.mxu2 %v5590_v33  ;;  %1447 = vst [vmem:[#allocation2 + $0x108] sm:$0xff] %v6068_v31 }
  0x64   : > { %1448 = vst [vmem:[#allocation2 + $0x110] sm:$0xf] %v6068_v31 }
  0x65   : > { %1449 = vst [vmem:[#allocation2 + $0x114] sm:$0xff] %v6068_v31 }
  0x66   : > { %526 = vmatmul.bf16.gmra.mxu0 %v5480_v10  ;;  %566 = vmatmul.bf16.gmra.mxu2 %v5488_v11  ;;  %v5551_v10 = vld [vmem:[#allocation8] sm:$0xff]  ;;  %1450 = vst [vmem:[#allocation2 + $0x11c] sm:$0xf] %v6068_v31 }
  0x67   : > { %3264 = vmatpush.bf16.msrb.mxu0 %v5554_v30  ;;  %2926 = vmatpush.bf16.msrb.mxu2 %v5589_v60  ;;  %v5580_v30 = vld [vmem:[#allocation8 + $0xd0] sm:$0xff]  ;;  %1451 = vst [vmem:[#allocation2 + $0x120] sm:$0xff] %v6068_v31 }
  0x68   : > { %2838 = vmatpush.bf16.msra.mxu1 %v5580_v30  ;;  %1452 = vst [vmem:[#allocation2 + $0x128] sm:$0xf] %v6068_v31  ;;  %5783 = vmatpush.bf16.msra.mxu3 %v5580_v30 }
  0x69   : > { %1453 = vst [vmem:[#allocation2 + $0x12c] sm:$0xff] %v6068_v31 }
  0x6a   : > { %1454 = vst [vmem:[#allocation2 + $0x134] sm:$0xf] %v6068_v31 }
  0x6b   : > { %3265 = vmatpush.bf16.msrb.mxu0 %v5553_v34  ;;  %2927 = vmatpush.bf16.msrb.mxu2 %v5588_v9  ;;  %1455 = vst [vmem:[#allocation2 + $0x138] sm:$0xff] %v6068_v31 }
  0x6c   : > { %1456 = vst [vmem:[#allocation2 + $0x140] sm:$0xf] %v6068_v31 }
  0x6d   : > { %1457 = vst [vmem:[#allocation2 + $0x144] sm:$0xff] %v6068_v31 }
  0x6e   : > { %1458 = vst [vmem:[#allocation2 + $0x14c] sm:$0xf] %v6068_v31 }
  0x6f   : > { %3266 = vmatpush.bf16.msrb.mxu0 %v5552_v0  ;;  %2928 = vmatpush.bf16.msrb.mxu2 %v5587_v23  ;;  %v671_v0 = vadd.s32 32, %v6271_v38  ;;  %1459 = vst [vmem:[#allocation2 + $0x150] sm:$0xff] %v6068_v31 }
  0x70   : > { %1460 = vst [vmem:[#allocation2 + $0x158] sm:$0xf] %v6068_v31 }
  0x71   : > { %v731_v9 = vand.u32 15, %v671_v0  ;;  %1461 = vst [vmem:[#allocation2 + $0x15c] sm:$0xff] %v6068_v31 }
  0x72   : > { %1462 = vst [vmem:[#allocation2 + $0x164] sm:$0xf] %v6068_v31 }
  0x73   : > { %3267 = vmatpush.bf16.msrb.mxu0 %v5551_v10  ;;  %2929 = vmatpush.bf16.msrb.mxu2 %v5586_v32  ;;  %vm6444_vm11 = vcmp.gt.s32.totalorder %v731_v9, 0  ;;  %1463 = vst [vmem:[#allocation2 + $0x168] sm:$0xff] %v6068_v31 }
  0x74   : > { %1464 = vst [vmem:[#allocation2 + $0x170] sm:$0xf] %v6068_v31 }
  0x75   : > { %1465 = vst [vmem:[#allocation2 + $0x174] sm:$0xff] %v6068_v31 }
  0x76   : > { %531 = vmatmul.bf16.gmra.mxu0 %v5481_v12  ;;  %571 = vmatmul.bf16.gmra.mxu2 %v5489_v13  ;;  %1466 = vst [vmem:[#allocation2 + $0x17c] sm:$0xf] %v6068_v31 }
  0x77   : > { %1467 = vst [vmem:[#allocation2 + $0x180] sm:$0xff] %v6068_v31 }
  0x78   : > { %1468 = vst [vmem:[#allocation2 + $0x188] sm:$0xf] %v6068_v31 }
  0x79   : > { %1469 = vst [vmem:[#allocation2 + $0x18c] sm:$0xff] %v6068_v31 }
  0x7a   : > { %1470 = vst [vmem:[#allocation2 + $0x194] sm:$0xf] %v6068_v31 }
  0x7b   : > { %1471 = vst [vmem:[#allocation2 + $0x198] sm:$0xff] %v6068_v31 }
  0x7c   : > { %1472 = vst [vmem:[#allocation2 + $0x1a0] sm:$0xf] %v6068_v31 }
  0x7d   : > { %1473 = vst [vmem:[#allocation2 + $0x1a4] sm:$0xff] %v6068_v31 }
  0x7e   : > { %1474 = vst [vmem:[#allocation2 + $0x1ac] sm:$0xf] %v6068_v31 }
  0x86   : > { %536 = vmatmul.bf16.gmra.mxu0 %v5482_v14  ;;  %576 = vmatmul.bf16.gmra.mxu2 %v5490_v15  ;;  %v5077_v14 = vld [vmem:[#allocation2] sm:$0xf] }
  0x96   : > { %541 = vmatmul.bf16.gmra.mxu0 %v5483_v16  ;;  %581 = vmatmul.bf16.gmra.mxu2 %v5491_v17 }
  0xa6   : > { %546 = vmatmul.bf16.gmra.mxu0 %v5484_v19  ;;  %586 = vmatmul.bf16.gmra.mxu2 %v5492_v20  ;;  %v669_v20 = vadd.s32 16, %v6271_v38 }
  0xa8   : > { %v717_v25 = vand.u32 15, %v669_v20  ;;  %v672_v20 = vadd.s32 40, %v6271_v38 }
  0xaa   : > { %vm6362_vm14 = vcmp.gt.s32.totalorder %v717_v25, 0 }
  0xab   : > { %vm1341_vm15 = vmpackc.low %vm6362_vm14, %vm6362_vm14 }
  0xb6   : > { %551 = vmatmul.bf16.gmra.mxu0 %v5485_v26  ;;  %591 = vmatmul.bf16.gmra.mxu2 %v5493_v27  ;;  %v5078_v26 = vor.u32 %v5504_v21, %v5077_v14 }
  0xc6   : > { %556 = vmatmul.bf16.gmra.mxu0 %v5486_v35  ;;  %596 = vmatmul.bf16.gmra.mxu2 %v5494_v58 }
  0xd3   : > { %v522_v41 = vpop.f32.mrf.mxu0 }
  0xd4   : > { %v523_v42 = vadd.f32 %v6280_v39, %v522_v41 }
  0xd6   : > { %v602_v45 = vmax.f32 %v523_v42, 0.0  ;;  %3268 = vmatmul.bf16.vlgmr.msrb.gmra.mxu0 %v5078_v26  ;;  %v724_v42 = vand.u32 15, %v670_v37 }
  0xd8   : > { %v634_v47 = vpack.c.bf16 %v602_v45, %v602_v45 }
  0xd9   : > { %v562_v58 = vpop.f32.mrf.mxu2 }
  0xda   : > { %v1211_v49 = vsel %vm6295_vm5, %v634_v47, 0  ;;  %v1371_v50 = vsel %vm1339_vm6, %v634_v47, 0  ;;  %1840 = vst [vmem:[#allocation2 + $0x1c] sm:$0xf] %v634_v47  ;;  %vm6390_vm6 = vcmp.lt.s32.totalorder %v724_v42, 15 }
  0xdb   : > { %v1479_v52 = vshrl.u32 %v1211_v49, 16  ;;  %v1876_v53 = vshll.u32 %v1371_v50, 16  ;;  %v524_v55 = vpop.f32.mrf.mxu0  ;;  %v1482_v62 = vshll.u32 %v1211_v49, 16  ;;  %v1879_v5 = vshrl.u32 %v1371_v50, 16  ;;  %vm1182_vm1 = vmpackc.low %vm6390_vm6, %vm6390_vm6 }
  0xdc   : > { %v525_v56 = vadd.f32 %v6280_v39, %v524_v55 }
  0xdd   : > { %v6320_v61 = vrot.slane %v1479_v52, 7  ;;  %v6322_v63 = vrot.slane %v1876_v53, 5  ;;  %v1881_v15 = vrot.slane %v1879_v5, 4  ;;  %v5579_v52 = vld [vmem:[#allocation8 + $0xc8] sm:$0xff] }
  0xde   : > { %v603_v3 = vmax.f32 %v525_v56, 0.0  ;;  %2839 = vmatpush.bf16.msra.mxu1 %v5579_v52  ;;  %5784 = vmatpush.bf16.msra.mxu3 %v5579_v52 }
  0xdf   : > { %v1484_v4 = vor.u32 %v1482_v62, %v6320_v61  ;;  %v2231_v6 = vsel %vm6308_vm10, %v6322_v63, %v2230_v51  ;;  %v1882_v27 = vor.u32 %v1881_v15, %v6322_v63  ;;  %v1485_v43 = vrot.slane %v6320_v61, 4  ;;  %v5578_v63 = vld [vmem:[#allocation8 + $0xc0] sm:$0xff] }
  0xe0   : > { %2232 = vst [vmem:[#allocation2 + $0x14] sm:$0x8] %v2231_v6  ;;  %v6340_v7 = vpack.c.bf16 %v603_v3, %v603_v3  ;;  %v563_v61 = vadd.f32 %v6280_v39, %v562_v58  ;;  %v683_v62 = vadd.s32 128, %v6271_v38 }
  0xe1   : > { %v1802_v11 = vsel %vm6327_vm12, %v1484_v4, %v1801_v2  ;;  %v6375_v44 = vrot.slane %v1882_v27, 4  ;;  %v6418_v4 = vadd.s32 136, %v6271_v38  ;;  %v564_v32 = vpop.f32.mrf.mxu2  ;;  %vm1343_vm12 = vmpackc.low %vm6444_vm11, %vm6444_vm11 }
  0xe2   : > { %1803 = vst [vmem:[#allocation2 + $0x18] sm:$0xf] %v1802_v11  ;;  %v1212_v12 = vsel %vm1180_vm13, %v6340_v7, 0  ;;  %v1372_v13 = vsel %vm6295_vm5, %v6340_v7, 0  ;;  %v618_v6 = vmax.f32 %v563_v61, 0.0  ;;  %v815_v8 = vand.u32 15, %v683_v62  ;;  %2840 = vmatpush.bf16.msra.mxu1 %v5578_v63  ;;  %5785 = vmatpush.bf16.msra.mxu3 %v5578_v63 }
  0xe3   : > { %v1487_v16 = vshrl.u32 %v1212_v12, 16  ;;  %v1885_v17 = vshll.u32 %v1372_v13, 16  ;;  %v1889_v18 = vshrl.u32 %v1372_v13, 16  ;;  %v527_v19 = vpop.f32.mrf.mxu0  ;;  %v1490_v40 = vshll.u32 %v1212_v12, 16  ;;  %1841 = vst [vmem:[#allocation2 + $0x28] sm:$0xf] %v6340_v7 }
  0xe4   : > { %v528_v24 = vadd.f32 %v6280_v39, %v527_v19  ;;  %vm1259_vm9 = vcmp.gt.s32.totalorder %v815_v8, 0  ;;  %v822_v19 = vand.u32 15, %v6418_v4 }
  0xe5   : > { %v6357_v28 = vrot.slane %v1487_v16, 7  ;;  %v6359_v29 = vrot.slane %v1885_v17, 5  ;;  %v1891_v33 = vrot.slane %v1889_v18, 4  ;;  %v6440_v16 = vpack.c.bf16 %v618_v6, %v618_v6  ;;  %vm1355_vm10 = vmpackc.low %vm1259_vm9, %vm1259_vm9 }
  0xe6   : > { %v604_v34 = vmax.f32 %v528_v24, 0.0  ;;  %vm6495_vm13 = vcmp.lt.s32.totalorder %v822_v19, 15  ;;  %v738_v6 = vand.u32 15, %v672_v20 }
  0xe7   : > { %v1492_v45 = vor.u32 %v1490_v40, %v6357_v28  ;;  %v1892_v47 = vor.u32 %v1891_v33, %v6359_v29  ;;  %v1494_v11 = vrot.slane %v6357_v28, 4  ;;  %v1888_v12 = vsel %vm6396_vm7, %v6375_v44, %v6359_v29  ;;  %vm1196_vm14 = vmpackc.low %vm6495_vm13, %vm6495_vm13  ;;  %1856 = vst [vmem:[#allocation2 + $0xdc] sm:$0xf] %v6440_v16 }
  0xe8   : > { %v6372_v41 = vpack.c.bf16 %v604_v34, %v604_v34  ;;  %v1227_v23 = vsel %vm6295_vm5, %v6440_v16, 0  ;;  %v1387_v24 = vsel %vm1355_vm10, %v6440_v16, 0  ;;  %2233 = vst [vmem:[#allocation2 + $0x20] sm:$0xf] %v1888_v12 }
  0xe9   : > { %v6424_v10 = vsel %vm6404_vm8, %v1485_v43, %v1492_v45  ;;  %v6431_v13 = vrot.slane %v1892_v47, 4  ;;  %v1622_v33 = vshrl.u32 %v1227_v23, 16  ;;  %v1625_v34 = vshll.u32 %v1227_v23, 16 }
  0xea   : > { %v1213_v48 = vsel %vm6295_vm5, %v6372_v41, 0  ;;  %v1373_v49 = vsel %vm1341_vm15, %v6372_v41, 0  ;;  %v2035_v35 = vshll.u32 %v1387_v24, 16  ;;  %v2039_v37 = vshrl.u32 %v1387_v24, 16  ;;  %1804 = vst [vmem:[#allocation2 + $0x24] sm:$0xf] %v6424_v10 }
  0xeb   : > { %v529_v50 = vpop.f32.mrf.mxu0  ;;  %v1496_v54 = vshrl.u32 %v1213_v48, 16  ;;  %v1499_v55 = vshll.u32 %v1213_v48, 16  ;;  %v1895_v56 = vshll.u32 %v1373_v49, 16  ;;  %v1899_v57 = vshrl.u32 %v1373_v49, 16  ;;  %1842 = vst [vmem:[#allocation2 + $0x34] sm:$0xf] %v6372_v41 }
  0xec   : > { %v530_v60 = vadd.f32 %v6280_v39, %v529_v50  ;;  %v6468_v47 = vrot.slane %v1622_v33, 7  ;;  %v6470_v48 = vrot.slane %v2035_v35, 5  ;;  %v2041_v49 = vrot.slane %v2039_v37, 4 }
  0xed   : > { %v6413_v1 = vrot.slane %v1496_v54, 7  ;;  %v6415_v2 = vrot.slane %v1895_v56, 5  ;;  %v1901_v3 = vrot.slane %v1899_v57, 4  ;;  %v565_v50 = vadd.f32 %v6280_v39, %v564_v32 }
  0xee   : > { %v605_v5 = vmax.f32 %v530_v60, 0.0  ;;  %v6485_v57 = vor.u32 %v1625_v34, %v6468_v47  ;;  %v2042_v58 = vor.u32 %v2041_v49, %v6470_v48  ;;  %vm6530_vm15 = vcmp.lt.s32.totalorder %v738_v6, 15 }
  0xef   : > { %v1501_v14 = vor.u32 %v1499_v55, %v6413_v1  ;;  %v1902_v17 = vor.u32 %v1901_v3, %v6415_v2  ;;  %v1503_v51 = vrot.slane %v6413_v1, 4  ;;  %v1898_v52 = vsel %vm6396_vm7, %v6431_v13, %v6415_v2  ;;  %vm1184_vm0 = vmpackc.low %vm6530_vm15, %vm6530_vm15 }
  0xf0   : > { %v6438_v15 = vpack.c.bf16 %v605_v5, %v605_v5  ;;  %v619_v63 = vmax.f32 %v565_v50, 0.0  ;;  %v1629_v3 = vrot.slane %v6468_v47, 4  ;;  %v6519_v19 = vrot.slane %v2042_v58, 4  ;;  %2234 = vst [vmem:[#allocation2 + $0x2c] sm:$0xf] %v1898_v52 }
  0xf1   : > { %v6482_v56 = vrot.slane %v1902_v17, 4  ;;  %v1502_v61 = vsel %vm6404_vm8, %v1494_v11, %v1501_v14  ;;  %v567_v17 = vpop.f32.mrf.mxu2 }
  0xf2   : > { %v1214_v21 = vsel %vm1182_vm1, %v6438_v15, 0  ;;  %v1374_v22 = vsel %vm6295_vm5, %v6438_v15, 0  ;;  %v6512_v11 = vpack.c.bf16 %v619_v63, %v619_v63  ;;  %1805 = vst [vmem:[#allocation2 + $0x30] sm:$0xf] %v1502_v61 }
  0xf3   : > { %v532_v25 = vpop.f32.mrf.mxu0  ;;  %v1505_v26 = vshrl.u32 %v1214_v21, 16  ;;  %v1508_v27 = vshll.u32 %v1214_v21, 16  ;;  %v1905_v28 = vshll.u32 %v1374_v22, 16  ;;  %v1909_v30 = vshrl.u32 %v1374_v22, 16  ;;  %1843 = vst [vmem:[#allocation2 + $0x40] sm:$0xf] %v6438_v15 }
  0xf4   : > { %v533_v45 = vadd.f32 %v6280_v39, %v532_v25  ;;  %v1388_v18 = vsel %vm6295_vm5, %v6512_v11, 0  ;;  %1857 = vst [vmem:[#allocation2 + $0xe8] sm:$0xf] %v6512_v11 }
  0xf5   : > { %v6462_v40 = vrot.slane %v1505_v26, 7  ;;  %v6464_v42 = vrot.slane %v1905_v28, 5  ;;  %v1911_v43 = vrot.slane %v1909_v30, 4  ;;  %v568_v26 = vadd.f32 %v6280_v39, %v567_v17 }
  0xf6   : > { %v606_v60 = vmax.f32 %v533_v45, 0.0  ;;  %v1228_v28 = vsel %vm1196_vm14, %v6512_v11, 0 }
  0xf7   : > { %v1510_v54 = vor.u32 %v1508_v27, %v6462_v40  ;;  %v1912_v55 = vor.u32 %v1911_v43, %v6464_v42  ;;  %v1512_v62 = vrot.slane %v6462_v40, 4  ;;  %v1908_v1 = vsel %vm6396_vm7, %v6482_v56, %v6464_v42 }
  0xf8   : > { %v6505_v4 = vpack.c.bf16 %v606_v60, %v606_v60  ;;  %v1631_v35 = vshrl.u32 %v1228_v28, 16  ;;  %v1634_v37 = vshll.u32 %v1228_v28, 16  ;;  %v2045_v40 = vshll.u32 %v1388_v18, 16  ;;  %2235 = vst [vmem:[#allocation2 + $0x38] sm:$0xf] %v1908_v1 }
  0xf9   : > { %v1511_v8 = vsel %vm6404_vm8, %v1503_v51, %v1510_v54  ;;  %v6510_v9 = vrot.slane %v1912_v55, 4  ;;  %v2049_v43 = vshrl.u32 %v1388_v18, 16  ;;  %v620_v50 = vmax.f32 %v568_v26, 0.0  ;;  %v569_v29 = vpop.f32.mrf.mxu2  ;;  %v4791_v26 = vld [vmem:[#allocation2 + $0x24] sm:$0xf0] }
  0xfa   : > { %v1215_v20 = vsel %vm6295_vm5, %v6505_v4, 0  ;;  %v1375_v21 = vsel %vm1343_vm12, %v6505_v4, 0  ;;  %v685_v51 = vadd.s32 144, %v6271_v38  ;;  %v6561_v10 = vrot.slane %v1631_v35, 7  ;;  %1806 = vst [vmem:[#allocation2 + $0x3c] sm:$0xf] %v1511_v8 }
  0xfb   : > { %v534_v5 = vpop.f32.mrf.mxu0  ;;  %v1514_v23 = vshrl.u32 %v1215_v20, 16  ;;  %v1915_v24 = vshll.u32 %v1375_v21, 16  ;;  %v1919_v25 = vshrl.u32 %v1375_v21, 16  ;;  %v1517_v27 = vshll.u32 %v1215_v20, 16  ;;  %v5506_v21 = vld [vmem:[#allocation2 + $0x1c] sm:$0xf] }
  0xfc   : > { %v535_v14 = vadd.f32 %v6280_v39, %v534_v5  ;;  %v6563_v54 = vrot.slane %v2045_v40, 5  ;;  %v2051_v55 = vrot.slane %v2049_v43, 4  ;;  %v673_v5 = vadd.s32 48, %v6271_v38  ;;  %1844 = vst [vmem:[#allocation2 + $0x4c] sm:$0xf] %v6505_v4 }
  0xfd   : > { %v6542_v32 = vrot.slane %v1514_v23, 7  ;;  %v6544_v33 = vrot.slane %v1915_v24, 5  ;;  %v1921_v34 = vrot.slane %v1919_v25, 4  ;;  %v1636_v61 = vor.u32 %v1634_v37, %v6561_v10  ;;  %v5507_v25 = vld [vmem:[#allocation2 + $0x20] sm:$0xf0] }
  0xfe   : > { %v607_v30 = vmax.f32 %v535_v14, 0.0  ;;  %v2052_v6 = vor.u32 %v2051_v55, %v6563_v54  ;;  %v4789_v14 = vld [vmem:[#allocation2 + $0x18] sm:$0xf]  ;;  %v6590_v23 = vpack.c.bf16 %v620_v50, %v620_v50  ;;  %v829_v24 = vand.u32 15, %v685_v51  ;;  %v5509_v50 = vld [vmem:[#allocation2 + $0x34] sm:$0xf] }
  0xff   : > { %v1519_v31 = vor.u32 %v1517_v27, %v6542_v32  ;;  %v1922_v49 = vor.u32 %v1921_v34, %v6544_v33  ;;  %v1521_v60 = vrot.slane %v6542_v32, 4  ;;  %v1918_v12 = vsel %vm6396_vm7, %v6510_v9, %v6544_v33  ;;  %v4803_v55 = vld [vmem:[#allocation2 + $0x3c] sm:$0xf0] }
 0x100   : > { %v6550_v45 = vpack.c.bf16 %v607_v30, %v607_v30  ;;  %v1638_v9 = vrot.slane %v6561_v10, 4  ;;  %v2048_v2 = vsel %vm6396_vm7, %v6519_v19, %v6563_v54  ;;  %v4790_v15 = vor.u32 %v5507_v25, %v4789_v14  ;;  %2236 = vst [vmem:[#allocation2 + $0x44] sm:$0xf] %v1918_v12  ;;  %v4801_v14 = vld [vmem:[#allocation2 + $0x30] sm:$0xf] }
 0x101   : > { %v1520_v44 = vsel %vm6404_vm8, %v1512_v62, %v1519_v31  ;;  %v6587_v22 = vrot.slane %v1922_v49, 4  ;;  %v1637_v27 = vsel %vm6404_vm8, %v1629_v3, %v1636_v61  ;;  %v1229_v28 = vsel %vm6295_vm5, %v6590_v23, 0  ;;  %v572_v54 = vpop.f32.mrf.mxu2  ;;  %2249 = vst [vmem:[#allocation2 + $0xe0] sm:$0xf] %v2048_v2 }
 0x102   : > { %v1216_v7 = vsel %vm1184_vm0, %v6550_v45, 0  ;;  %v1376_v63 = vsel %vm6295_vm5, %v6550_v45, 0  ;;  %v6613_v18 = vor.u32 %v5506_v21, %v4791_v26  ;;  %v6616_v30 = vrot.slane %v2052_v6, 4  ;;  %1807 = vst [vmem:[#allocation2 + $0x48] sm:$0xf] %v1520_v44  ;;  %2841 = vmatmul.bf16.vlgmr.msra.gmra.mxu1 %v4790_v15  ;;  %3273 = vmatmul.bf16.gmra.mxu0 %v4790_v15 }
 0x103   : > { %v537_v58 = vpop.f32.mrf.mxu0  ;;  %v1523_v0 = vshrl.u32 %v1216_v7, 16  ;;  %v1526_v17 = vshll.u32 %v1216_v7, 16  ;;  %v1925_v62 = vshll.u32 %v1376_v63, 16  ;;  %v1929_v20 = vshrl.u32 %v1376_v63, 16  ;;  %1820 = vst [vmem:[#allocation2 + $0xe4] sm:$0xf] %v1637_v27 }
 0x104   : > { %v538_v8 = vadd.f32 %v6280_v39, %v537_v58  ;;  %vm6618_vm4 = vcmp.gt.s32.totalorder %v829_v24, 0  ;;  %v570_v47 = vadd.f32 %v6280_v39, %v569_v29  ;;  %v1640_v1 = vshrl.u32 %v1229_v28, 16  ;;  %2930 = vmatmul.bf16.vlgmr.msrb.gmra.mxu2 %v6613_v18  ;;  %1845 = vst [vmem:[#allocation2 + $0x58] sm:$0xf] %v6550_v45 }
 0x105   : > { %v6585_v41 = vrot.slane %v1523_v0, 7  ;;  %v6598_v52 = vrot.slane %v1925_v62, 5  ;;  %v1931_v19 = vrot.slane %v1929_v20, 4  ;;  %vm1357_vm6 = vmpackc.low %vm6618_vm4, %vm6618_vm4  ;;  %v1643_v3 = vshll.u32 %v1229_v28, 16  ;;  %1858 = vst [vmem:[#allocation2 + $0xf4] sm:$0xf] %v6590_v23 }
 0x106   : > { %v608_v16 = vmax.f32 %v538_v8, 0.0  ;;  %v1389_v35 = vsel %vm1357_vm6, %v6590_v23, 0  ;;  %v745_v37 = vand.u32 15, %v673_v5  ;;  %v6637_v43 = vrot.slane %v1640_v1, 7 }
 0x107   : > { %v1528_v13 = vor.u32 %v1526_v17, %v6585_v41  ;;  %v1932_v56 = vor.u32 %v1931_v19, %v6598_v52  ;;  %v1530_v34 = vrot.slane %v6585_v41, 4  ;;  %v1928_v40 = vsel %vm6396_vm7, %v6587_v22, %v6598_v52  ;;  %v5510_v41 = vld [vmem:[#allocation2 + $0x38] sm:$0xf0] }
 0x108   : > { %v2055_v31 = vshll.u32 %v1389_v35, 16  ;;  %v2059_v49 = vshrl.u32 %v1389_v35, 16  ;;  %v640_v51 = vpack.c.bf16 %v608_v16, %v608_v16  ;;  %vm1249_vm1 = vcmp.gt.s32.totalorder %v745_v37, 0  ;;  %2237 = vst [vmem:[#allocation2 + $0x50] sm:$0xf] %v1928_v40 }
 0x109   : > { %v1529_v33 = vsel %vm6404_vm8, %v1521_v60, %v1528_v13  ;;  %v1933_v4 = vrot.slane %v1932_v56, 4  ;;  %v1645_v7 = vor.u32 %v1643_v3, %v6637_v43  ;;  %vm1345_vm9 = vmpackc.low %vm1249_vm1, %vm1249_vm1  ;;  %v621_v60 = vmax.f32 %v570_v47, 0.0  ;;  %v5512_v37 = vld [vmem:[#allocation2 + $0x4c] sm:$0xf] }
 0x10a   : > { %v2057_v58 = vrot.slane %v2055_v31, 5  ;;  %v6643_v63 = vadd.f32 %v6280_v39, %v572_v54  ;;  %v1647_v0 = vrot.slane %v6637_v43, 4  ;;  %v2061_v5 = vrot.slane %v2059_v49, 4  ;;  %1808 = vst [vmem:[#allocation2 + $0x54] sm:$0xf] %v1529_v33  ;;  %v574_v31 = vpop.f32.mrf.mxu2 }
 0x10b   : > { %v539_v32 = vpop.f32.mrf.mxu0  ;;  %v1217_v29 = vsel %vm6295_vm5, %v640_v51, 0  ;;  %v1377_v44 = vsel %vm1345_vm9, %v640_v51, 0  ;;  %v6648_v12 = vor.u32 %v5509_v50, %v4803_v55  ;;  %v1646_v11 = vsel %vm6404_vm8, %v1638_v9, %v1645_v7  ;;  %1846 = vst [vmem:[#allocation2 + $0x64] sm:$0xf] %v640_v51 }
 0x10c   : > { %v540_v10 = vadd.f32 %v6280_v39, %v539_v32  ;;  %v2058_v61 = vsel %vm6396_vm7, %v6616_v30, %v2057_v58  ;;  %v1532_v6 = vshrl.u32 %v1217_v29, 16  ;;  %v2062_v17 = vor.u32 %v2061_v5, %v2057_v58  ;;  %1821 = vst [vmem:[#allocation2 + $0xf0] sm:$0xf] %v1646_v11 }
 0x10d   : > { %v1535_v62 = vshll.u32 %v1217_v29, 16  ;;  %v1935_v20 = vshll.u32 %v1377_v44, 16  ;;  %v1939_v21 = vshrl.u32 %v1377_v44, 16  ;;  %v653_v24 = vpack.c.bf16 %v621_v60, %v621_v60  ;;  %2250 = vst [vmem:[#allocation2 + $0xec] sm:$0xf] %v2058_v61 }
 0x10e   : > { %v6656_v22 = vrot.slane %v1532_v6, 7  ;;  %v686_v25 = vadd.s32 152, %v6271_v38  ;;  %v609_v9 = vmax.f32 %v540_v10, 0.0  ;;  %v4802_v52 = vor.u32 %v5510_v41, %v4801_v14  ;;  %v4815_v10 = vld [vmem:[#allocation2 + $0x54] sm:$0xf0] }
 0x10f   : > { %v1937_v2 = vrot.slane %v1935_v20, 5  ;;  %v1941_v13 = vrot.slane %v1939_v21, 4  ;;  %v674_v8 = vadd.s32 56, %v6271_v38  ;;  %v2063_v45 = vrot.slane %v2062_v17, 4  ;;  %1859 = vst [vmem:[#allocation2 + $0x100] sm:$0xf] %v653_v24 }
 0x110   : > { %v1537_v26 = vor.u32 %v1535_v62, %v6656_v22  ;;  %v836_v15 = vand.u32 15, %v686_v25  ;;  %v1390_v27 = vsel %vm6295_vm5, %v653_v24, 0  ;;  %v641_v23 = vpack.c.bf16 %v609_v9, %v609_v9 }
 0x111   : > { %v1938_v19 = vsel %vm6396_vm7, %v1933_v4, %v1937_v2  ;;  %v1942_v28 = vor.u32 %v1941_v13, %v1937_v2  ;;  %v2065_v30 = vshll.u32 %v1390_v27, 16  ;;  %v2069_v42 = vshrl.u32 %v1390_v27, 16 }
 0x112   : > { %v1538_v47 = vsel %vm6404_vm8, %v1530_v34, %v1537_v26  ;;  %vm1102_vm10 = vcmp.lt.s32.totalorder %v836_v15, 15  ;;  %v752_v56 = vand.u32 15, %v674_v8  ;;  %v1539_v1 = vrot.slane %v6656_v22, 4  ;;  %2238 = vst [vmem:[#allocation2 + $0x5c] sm:$0xf] %v1938_v19  ;;  %2846 = vmatmul.bf16.gmra.mxu1 %v4802_v52  ;;  %3278 = vmatmul.bf16.gmra.mxu0 %v4802_v52 }
 0x113   : > { %1809 = vst [vmem:[#allocation2 + $0x60] sm:$0xf] %v1538_v47  ;;  %vm1198_vm11 = vmpackc.low %vm1102_vm10, %vm1102_vm10  ;;  %v2067_v3 = vrot.slane %v2065_v30, 5  ;;  %v2071_v16 = vrot.slane %v2069_v42, 4  ;;  %v622_v32 = vmax.f32 %v6643_v63, 0.0  ;;  %v1378_v34 = vsel %vm6295_vm5, %v641_v23, 0  ;;  %v542_v60 = vpop.f32.mrf.mxu0 }
 0x114   : > { %v1230_v33 = vsel %vm1198_vm11, %v653_v24, 0  ;;  %vm6670_vm12 = vcmp.lt.s32.totalorder %v752_v56, 15  ;;  %v687_v40 = vadd.s32 160, %v6271_v38  ;;  %v1943_v54 = vrot.slane %v1942_v28, 4  ;;  %2935 = vmatmul.bf16.gmra.mxu2 %v6648_v12  ;;  %1847 = vst [vmem:[#allocation2 + $0x70] sm:$0xf] %v641_v23  ;;  %v6706_v56 = vpop.f32.mrf.mxu2 }
 0x115   : > { %v1649_v49 = vshrl.u32 %v1230_v33, 16  ;;  %v1652_v4 = vshll.u32 %v1230_v33, 16  ;;  %v2068_v50 = vsel %vm6396_vm7, %v2063_v45, %v2067_v3  ;;  %v2072_v51 = vor.u32 %v2071_v16, %v2067_v3  ;;  %vm1186_vm13 = vmpackc.low %vm6670_vm12, %vm6670_vm12  ;;  %v5513_v52 = vld [vmem:[#allocation2 + $0x50] sm:$0xf0]  ;;  %v4813_v47 = vld [vmem:[#allocation2 + $0x48] sm:$0xf] }
 0x116   : > { %2251 = vst [vmem:[#allocation2 + $0xf8] sm:$0xf] %v2068_v50  ;;  %v1218_v55 = vsel %vm1186_vm13, %v641_v23, 0  ;;  %v1945_v7 = vshll.u32 %v1378_v34, 16  ;;  %v1949_v58 = vshrl.u32 %v1378_v34, 16  ;;  %v6683_v44 = vor.u32 %v5512_v37, %v4815_v10 }
 0x117   : > { %v1651_v63 = vrot.slane %v1649_v49, 7  ;;  %v2073_v5 = vrot.slane %v2072_v51, 4  ;;  %v1541_v29 = vshrl.u32 %v1218_v55, 16  ;;  %v654_v6 = vpack.c.bf16 %v622_v32, %v622_v32 }
 0x118   : > { %v1947_v11 = vrot.slane %v1945_v7, 5  ;;  %v1951_v61 = vrot.slane %v1949_v58, 4  ;;  %v843_v14 = vand.u32 15, %v687_v40  ;;  %v1544_v62 = vshll.u32 %v1218_v55, 16  ;;  %v5515_v7 = vld [vmem:[#allocation2 + $0x64] sm:$0xf] }
 0x119   : > { %v1654_v41 = vor.u32 %v1652_v4, %v1651_v63  ;;  %v6685_v17 = vrot.slane %v1541_v29, 7  ;;  %v543_v20 = vadd.f32 %v6280_v39, %v542_v60  ;;  %v1231_v24 = vsel %vm6295_vm5, %v654_v6, 0  ;;  %1860 = vst [vmem:[#allocation2 + $0x10c] sm:$0xf] %v654_v6 }
 0x11a   : > { %v1948_v21 = vsel %vm6396_vm7, %v1943_v54, %v1947_v11  ;;  %v1952_v22 = vor.u32 %v1951_v61, %v1947_v11  ;;  %vm1263_vm14 = vcmp.gt.s32.totalorder %v843_v14, 0  ;;  %v1656_v9 = vrot.slane %v1651_v63, 4 }
 0x11b   : > { %v1655_v25 = vsel %vm6404_vm8, %v1647_v0, %v1654_v41  ;;  %v1546_v2 = vor.u32 %v1544_v62, %v6685_v17  ;;  %2239 = vst [vmem:[#allocation2 + $0x68] sm:$0xf] %v1948_v21  ;;  %vm1359_vm15 = vmpackc.low %vm1263_vm14, %vm1263_vm14  ;;  %v1658_v13 = vshrl.u32 %v1231_v24, 16  ;;  %v1548_v8 = vrot.slane %v6685_v17, 4  ;;  %v544_v40 = vpop.f32.mrf.mxu0  ;;  %v4827_v51 = vld [vmem:[#allocation2 + $0x6c] sm:$0xf0] }
 0x11c   : > { %1822 = vst [vmem:[#allocation2 + $0xfc] sm:$0xf] %v1655_v25  ;;  %v1391_v45 = vsel %vm1359_vm15, %v654_v6, 0  ;;  %v1661_v26 = vshll.u32 %v1231_v24, 16  ;;  %v610_v15 = vmax.f32 %v543_v20, 0.0  ;;  %v6702_v28 = vrot.slane %v1952_v22, 4 }
 0x11d   : > { %v1547_v27 = vsel %vm6404_vm8, %v1539_v1, %v1546_v2  ;;  %v6700_v43 = vrot.slane %v1658_v13, 7  ;;  %v2075_v19 = vshll.u32 %v1391_v45, 16  ;;  %v2079_v0 = vshrl.u32 %v1391_v45, 16 }
 0x11e   : > { %1810 = vst [vmem:[#allocation2 + $0x6c] sm:$0xf] %v1547_v27  ;;  %v642_v30 = vpack.c.bf16 %v610_v15, %v610_v15  ;;  %v675_v42 = vadd.s32 64, %v6271_v38  ;;  %v575_v23 = vadd.f32 %v6280_v39, %v574_v31  ;;  %v4814_v1 = vor.u32 %v5513_v52, %v4813_v47 }
 0x11f   : > { %v1663_v3 = vor.u32 %v1661_v26, %v6700_v43  ;;  %v2077_v16 = vrot.slane %v2075_v19, 5  ;;  %v2081_v32 = vrot.slane %v2079_v0, 4  ;;  %v688_v37 = vadd.s32 168, %v6271_v38  ;;  %v6729_v26 = vpop.f32.mrf.mxu2 }
 0x120   : > { %v759_v33 = vand.u32 15, %v675_v42  ;;  %v1219_v35 = vsel %vm6295_vm5, %v642_v30, 0  ;;  %1848 = vst [vmem:[#allocation2 + $0x7c] sm:$0xf] %v642_v30  ;;  %v623_v34 = vmax.f32 %v575_v23, 0.0  ;;  %v1665_v10 = vrot.slane %v6700_v43, 4 }
 0x121   : > { %v1664_v49 = vsel %vm6404_vm8, %v1656_v9, %v1663_v3  ;;  %v2078_v31 = vsel %vm6396_vm7, %v2073_v5, %v2077_v16  ;;  %v2082_v4 = vor.u32 %v2081_v32, %v2077_v16  ;;  %v1550_v50 = vshrl.u32 %v1219_v35, 16  ;;  %v6743_v42 = vld [vmem:[%s7633_s2] ss:$0 sm:$0xff] }
 0x122   : > { %1823 = vst [vmem:[#allocation2 + $0x108] sm:$0xf] %v1664_v49  ;;  %vm1251_vm0 = vcmp.gt.s32.totalorder %v759_v33, 0  ;;  %v655_v54 = vpack.c.bf16 %v623_v34, %v623_v34  ;;  %v850_v55 = vand.u32 15, %v688_v37  ;;  %v1553_v63 = vshll.u32 %v1219_v35, 16  ;;  %2851 = vmatmul.bf16.gmra.mxu1 %v4814_v1  ;;  %3283 = vmatmul.bf16.gmra.mxu0 %v4814_v1 }
 0x123   : > { %v2083_v58 = vrot.slane %v2082_v4, 4  ;;  %2252 = vst [vmem:[#allocation2 + $0x104] sm:$0xf] %v2078_v31  ;;  %vm1347_vm4 = vmpackc.low %vm1251_vm0, %vm1251_vm0  ;;  %v6717_v60 = vrot.slane %v1550_v50, 7  ;;  %v545_v29 = vadd.f32 %v6280_v39, %v544_v40  ;;  %v676_v61 = vadd.s32 72, %v6271_v38  ;;  %v547_v47 = vpop.f32.mrf.mxu0 }
 0x124   : > { %v1379_v11 = vsel %vm1347_vm4, %v642_v30, 0  ;;  %vm1104_vm6 = vcmp.lt.s32.totalorder %v850_v55, 15  ;;  %v1392_v5 = vsel %vm6295_vm5, %v655_v54, 0  ;;  %1861 = vst [vmem:[#allocation2 + $0x118] sm:$0xf] %v655_v54  ;;  %v6724_v17 = vor.u32 %v5515_v7, %v4827_v51  ;;  %2940 = vmatmul.bf16.gmra.mxu2 %v6683_v44 }
 0x125   : > { %v1555_v6 = vor.u32 %v1553_v63, %v6717_v60  ;;  %v1955_v14 = vshll.u32 %v1379_v11, 16  ;;  %v1959_v41 = vshrl.u32 %v1379_v11, 16  ;;  %vm1200_vm1 = vmpackc.low %vm1104_vm6, %vm1104_vm6  ;;  %v2085_v20 = vshll.u32 %v1392_v5, 16  ;;  %v4825_v11 = vld [vmem:[#allocation2 + $0x60] sm:$0xf] }
 0x126   : > { %v1232_v62 = vsel %vm1200_vm1, %v655_v54, 0  ;;  %v2089_v39 = vshrl.u32 %v1392_v5, 16  ;;  %v611_v21 = vmax.f32 %v545_v29, 0.0  ;;  %v766_v19 = vand.u32 15, %v676_v61 }
 0x127   : > { %v1556_v22 = vsel %vm6404_vm8, %v1548_v8, %v1555_v6  ;;  %v1957_v24 = vrot.slane %v1955_v14, 5  ;;  %v1961_v25 = vrot.slane %v1959_v41, 4  ;;  %v1667_v9 = vshrl.u32 %v1232_v62, 16 }
 0x128   : > { %1811 = vst [vmem:[#allocation2 + $0x78] sm:$0xf] %v1556_v22  ;;  %v1670_v2 = vshll.u32 %v1232_v62, 16  ;;  %v2087_v13 = vrot.slane %v2085_v20, 5  ;;  %v2091_v52 = vrot.slane %v2089_v39, 4  ;;  %v643_v45 = vpack.c.bf16 %v611_v21, %v611_v21  ;;  %v6759_v39 = vpop.f32.mrf.mxu2 }
 0x129   : > { %v1958_v15 = vsel %vm6396_vm7, %v6702_v28, %v1957_v24  ;;  %v1962_v27 = vor.u32 %v1961_v25, %v1957_v24  ;;  %v6734_v43 = vrot.slane %v1667_v9, 7  ;;  %v578_v28 = vadd.f32 %v6743_v42, %v6706_v56 }
 0x12a   : > { %2240 = vst [vmem:[#allocation2 + $0x74] sm:$0xf] %v1958_v15  ;;  %v2088_v8 = vsel %vm6396_vm7, %v2083_v58, %v2087_v13  ;;  %v2092_v0 = vor.u32 %v2091_v52, %v2087_v13  ;;  %v1380_v30 = vsel %vm6295_vm5, %v643_v45, 0  ;;  %v1557_v23 = vrot.slane %v6717_v60, 4  ;;  %v5516_v58 = vld [vmem:[#allocation2 + $0x68] sm:$0xf0] }
 0x12b   : > { %v1963_v3 = vrot.slane %v1962_v27, 4  ;;  %v1672_v16 = vor.u32 %v1670_v2, %v6734_v43  ;;  %2253 = vst [vmem:[#allocation2 + $0x110] sm:$0xf] %v2088_v8  ;;  %vm1092_vm9 = vcmp.lt.s32.totalorder %v766_v19, 15  ;;  %v1674_v32 = vrot.slane %v6734_v43, 4  ;;  %v549_v19 = vpop.f32.mrf.mxu0 }
 0x12c   : > { %vm1188_vm10 = vmpackc.low %vm1092_vm9, %vm1092_vm9  ;;  %1849 = vst [vmem:[#allocation2 + $0x88] sm:$0xf] %v643_v45  ;;  %v1965_v1 = vshll.u32 %v1380_v30, 16  ;;  %v1969_v33 = vshrl.u32 %v1380_v30, 16  ;;  %v624_v35 = vmax.f32 %v578_v28, 0.0  ;;  %v689_v56 = vadd.s32 176, %v6271_v38 }
 0x12d   : > { %v1673_v34 = vsel %vm6404_vm8, %v1665_v10, %v1672_v16  ;;  %v1220_v37 = vsel %vm1188_vm10, %v643_v45, 0  ;;  %v548_v40 = vadd.f32 %v6743_v42, %v547_v47  ;;  %v2093_v49 = vrot.slane %v2092_v0, 4 }
 0x12e   : > { %1824 = vst [vmem:[#allocation2 + $0x114] sm:$0xf] %v1673_v34  ;;  %v1559_v31 = vshrl.u32 %v1220_v37, 16  ;;  %v1967_v4 = vrot.slane %v1965_v1, 5  ;;  %v1971_v50 = vrot.slane %v1969_v33, 4  ;;  %v656_v51 = vpack.c.bf16 %v624_v35, %v624_v35 }
 0x12f   : > { %v857_v54 = vand.u32 15, %v689_v56  ;;  %v612_v55 = vmax.f32 %v548_v40, 0.0  ;;  %v677_v7 = vadd.s32 80, %v6271_v38  ;;  %v1562_v63 = vshll.u32 %v1220_v37, 16 }
 0x130   : > { %v1561_v60 = vrot.slane %v1559_v31, 7  ;;  %v1968_v10 = vsel %vm6396_vm7, %v1963_v3, %v1967_v4  ;;  %v1972_v29 = vor.u32 %v1971_v50, %v1967_v4  ;;  %v1233_v5 = vsel %vm6295_vm5, %v656_v51, 0  ;;  %1862 = vst [vmem:[#allocation2 + $0x124] sm:$0xf] %v656_v51 }
 0x131   : > { %2241 = vst [vmem:[#allocation2 + $0x80] sm:$0xf] %v1968_v10  ;;  %vm1265_vm11 = vcmp.gt.s32.totalorder %v857_v54, 0  ;;  %v644_v61 = vpack.c.bf16 %v612_v55, %v612_v55  ;;  %v773_v6 = vand.u32 15, %v677_v7  ;;  %v1676_v62 = vshrl.u32 %v1233_v5, 16  ;;  %v6791_v10 = vpop.f32.mrf.mxu2 }
 0x132   : > { %v1564_v14 = vor.u32 %v1562_v63, %v1561_v60  ;;  %v1566_v41 = vrot.slane %v1561_v60, 4  ;;  %vm1361_vm12 = vmpackc.low %vm1265_vm11, %vm1265_vm11  ;;  %v4826_v20 = vor.u32 %v5516_v58, %v4825_v11  ;;  %v1679_v22 = vshll.u32 %v1233_v5, 16  ;;  %v5518_v7 = vld [vmem:[#allocation2 + $0x7c] sm:$0xf] }
 0x133   : > { %v1393_v21 = vsel %vm1361_vm12, %v656_v51, 0  ;;  %v1221_v24 = vsel %vm6295_vm5, %v644_v61, 0  ;;  %vm1253_vm13 = vcmp.gt.s32.totalorder %v773_v6, 0  ;;  %1850 = vst [vmem:[#allocation2 + $0x94] sm:$0xf] %v644_v61  ;;  %v6765_v9 = vrot.slane %v1676_v62, 7 }
 0x134   : > { %v1565_v25 = vsel %vm6404_vm8, %v1557_v23, %v1564_v14  ;;  %v2095_v2 = vshll.u32 %v1393_v21, 16  ;;  %v2099_v13 = vshrl.u32 %v1393_v21, 16  ;;  %vm1349_vm14 = vmpackc.low %vm1253_vm13, %vm1253_vm13  ;;  %v1973_v52 = vrot.slane %v1972_v29, 4  ;;  %2856 = vmatmul.bf16.gmra.mxu1 %v4826_v20  ;;  %3288 = vmatmul.bf16.gmra.mxu0 %v4826_v20  ;;  %v4839_v50 = vld [vmem:[#allocation2 + $0x84] sm:$0xf0] }
 0x135   : > { %1812 = vst [vmem:[#allocation2 + $0x84] sm:$0xf] %v1565_v25  ;;  %v1381_v45 = vsel %vm1349_vm14, %v644_v61, 0  ;;  %v1568_v15 = vshrl.u32 %v1221_v24, 16  ;;  %v580_v27 = vadd.f32 %v6743_v42, %v6729_v26  ;;  %v1681_v8 = vor.u32 %v1679_v22, %v6765_v9  ;;  %2945 = vmatmul.bf16.gmra.mxu2 %v6724_v17  ;;  %v552_v25 = vpop.f32.mrf.mxu0 }
 0x136   : > { %v2097_v0 = vrot.slane %v2095_v2, 5  ;;  %v2101_v30 = vrot.slane %v2099_v13, 4  ;;  %v1571_v28 = vshll.u32 %v1221_v24, 16  ;;  %v1975_v23 = vshll.u32 %v1381_v45, 16 }
 0x137   : > { %v6771_v47 = vrot.slane %v1568_v15, 7  ;;  %v1979_v3 = vshrl.u32 %v1381_v45, 16  ;;  %v625_v16 = vmax.f32 %v580_v27, 0.0  ;;  %v1682_v26 = vsel %vm6404_vm8, %v1674_v32, %v1681_v8 }
 0x138   : > { %v2098_v1 = vsel %vm6396_vm7, %v2093_v49, %v2097_v0  ;;  %v2102_v33 = vor.u32 %v2101_v30, %v2097_v0  ;;  %v690_v35 = vadd.s32 184, %v6271_v38  ;;  %v1683_v34 = vrot.slane %v6765_v9, 4  ;;  %1825 = vst [vmem:[#allocation2 + $0x120] sm:$0xf] %v1682_v26 }
 0x139   : > { %v1573_v37 = vor.u32 %v1571_v28, %v6771_v47  ;;  %v1977_v56 = vrot.slane %v1975_v23, 5  ;;  %v1981_v40 = vrot.slane %v1979_v3, 4  ;;  %2254 = vst [vmem:[#allocation2 + $0x11c] sm:$0xf] %v2098_v1  ;;  %v1575_v31 = vrot.slane %v6771_v47, 4 }
 0x13a   : > { %v657_v43 = vpack.c.bf16 %v625_v16, %v625_v16  ;;  %v864_v4 = vand.u32 15, %v690_v35  ;;  %v550_v32 = vadd.f32 %v6743_v42, %v549_v19  ;;  %v2103_v51 = vrot.slane %v2102_v33, 4 }
 0x13b   : > { %v1574_v49 = vsel %vm6404_vm8, %v1566_v41, %v1573_v37  ;;  %v1978_v54 = vsel %vm6396_vm7, %v1973_v52, %v1977_v56  ;;  %v678_v55 = vadd.s32 88, %v6271_v38  ;;  %v1982_v58 = vor.u32 %v1981_v40, %v1977_v56 }
 0x13c   : > { %1813 = vst [vmem:[#allocation2 + $0x90] sm:$0xf] %v1574_v49  ;;  %vm1106_vm15 = vcmp.lt.s32.totalorder %v864_v4, 15  ;;  %v1394_v60 = vsel %vm6295_vm5, %v657_v43, 0  ;;  %v613_v63 = vmax.f32 %v550_v32, 0.0  ;;  %v6793_v61 = vor.u32 %v5518_v7, %v4839_v50  ;;  %v6812_v49 = vpop.f32.mrf.mxu2 }
 0x13d   : > { %2242 = vst [vmem:[#allocation2 + $0x8c] sm:$0xf] %v1978_v54  ;;  %vm1202_vm0 = vmpackc.low %vm1106_vm15, %vm1106_vm15  ;;  %v2105_v29 = vshll.u32 %v1394_v60, 16  ;;  %v2109_v11 = vshrl.u32 %v1394_v60, 16  ;;  %v780_v5 = vand.u32 15, %v678_v55  ;;  %v583_v41 = vadd.f32 %v6743_v42, %v6759_v39 }
 0x13e   : > { %v1234_v6 = vsel %vm1202_vm0, %v657_v43, 0  ;;  %1863 = vst [vmem:[#allocation2 + $0x130] sm:$0xf] %v657_v43  ;;  %v645_v14 = vpack.c.bf16 %v613_v63, %v613_v63  ;;  %v691_v62 = vadd.s32 192, %v6271_v38  ;;  %v1983_v30 = vrot.slane %v1982_v58, 4 }
 0x13f   : > { %v1685_v20 = vshrl.u32 %v1234_v6, 16  ;;  %v1688_v21 = vshll.u32 %v1234_v6, 16  ;;  %v2107_v22 = vrot.slane %v2105_v29, 5  ;;  %v2111_v24 = vrot.slane %v2109_v11, 4 }
 0x140   : > { %vm1094_vm4 = vcmp.lt.s32.totalorder %v780_v5, 15  ;;  %v1382_v2 = vsel %vm6295_vm5, %v645_v14, 0  ;;  %1851 = vst [vmem:[#allocation2 + $0xa0] sm:$0xf] %v645_v14  ;;  %v626_v13 = vmax.f32 %v583_v41, 0.0  ;;  %v871_v52 = vand.u32 15, %v691_v62  ;;  %v554_v41 = vpop.f32.mrf.mxu0 }
 0x141   : > { %v1687_v45 = vrot.slane %v1685_v20, 7  ;;  %v2108_v15 = vsel %vm6396_vm7, %v2103_v51, %v2107_v22  ;;  %v2112_v27 = vor.u32 %v2111_v24, %v2107_v22  ;;  %vm1190_vm6 = vmpackc.low %vm1094_vm4, %vm1094_vm4  ;;  %v1985_v39 = vshll.u32 %v1382_v2, 16  ;;  %v5519_v51 = vld [vmem:[#allocation2 + $0x80] sm:$0xf0] }
 0x142   : > { %2255 = vst [vmem:[#allocation2 + $0x128] sm:$0xf] %v2108_v15  ;;  %v1222_v19 = vsel %vm1190_vm6, %v645_v14, 0  ;;  %v1989_v8 = vshrl.u32 %v1382_v2, 16  ;;  %v658_v0 = vpack.c.bf16 %v626_v13, %v626_v13  ;;  %vm1267_vm1 = vcmp.gt.s32.totalorder %v871_v52, 0 }
 0x143   : > { %v1690_v28 = vor.u32 %v1688_v21, %v1687_v45  ;;  %v2113_v23 = vrot.slane %v2112_v27, 4  ;;  %v1577_v3 = vshrl.u32 %v1222_v19, 16  ;;  %vm1363_vm9 = vmpackc.low %vm1267_vm1, %vm1267_vm1  ;;  %v1580_v16 = vshll.u32 %v1222_v19, 16  ;;  %v4837_v14 = vld [vmem:[#allocation2 + $0x78] sm:$0xf] }
 0x144   : > { %v1987_v26 = vrot.slane %v1985_v39, 5  ;;  %v1991_v1 = vrot.slane %v1989_v8, 4  ;;  %v1235_v33 = vsel %vm6295_vm5, %v658_v0, 0  ;;  %1864 = vst [vmem:[#allocation2 + $0x13c] sm:$0xf] %v658_v0  ;;  %v1395_v56 = vsel %vm1363_vm9, %v658_v0, 0 }
 0x145   : > { %v1691_v35 = vsel %vm6404_vm8, %v1683_v34, %v1690_v28  ;;  %v6808_v37 = vrot.slane %v1577_v3, 7  ;;  %v1694_v40 = vshrl.u32 %v1235_v33, 16  ;;  %v1697_v32 = vshll.u32 %v1235_v33, 16  ;;  %2950 = vmatmul.bf16.gmra.mxu2 %v6793_v61  ;;  %v5521_v8 = vld [vmem:[#allocation2 + $0x94] sm:$0xf] }
 0x146   : > { %1826 = vst [vmem:[#allocation2 + $0x12c] sm:$0xf] %v1691_v35  ;;  %v1988_v43 = vsel %vm6396_vm7, %v1983_v30, %v1987_v26  ;;  %v1992_v4 = vor.u32 %v1991_v1, %v1987_v26  ;;  %v2115_v50 = vshll.u32 %v1395_v56, 16  ;;  %v1692_v54 = vrot.slane %v1687_v45, 4 }
 0x147   : > { %v1582_v9 = vor.u32 %v1580_v16, %v6808_v37  ;;  %2243 = vst [vmem:[#allocation2 + $0x98] sm:$0xf] %v1988_v43  ;;  %v6816_v34 = vrot.slane %v1694_v40, 7  ;;  %v2119_v55 = vshrl.u32 %v1395_v56, 16  ;;  %v1584_v7 = vrot.slane %v6808_v37, 4  ;;  %v6844_v56 = vpop.f32.mrf.mxu2 }
 0x148   : > { %v2117_v58 = vrot.slane %v2115_v50, 5  ;;  %v553_v60 = vadd.f32 %v6743_v42, %v552_v25  ;;  %v679_v63 = vadd.s32 96, %v6271_v38  ;;  %v1993_v11 = vrot.slane %v1992_v4, 4  ;;  %v4851_v45 = vld [vmem:[#allocation2 + $0x9c] sm:$0xf0] }
 0x149   : > { %v1583_v29 = vsel %vm6404_vm8, %v1575_v31, %v1582_v9  ;;  %v1699_v5 = vor.u32 %v1697_v32, %v6816_v34  ;;  %v2121_v6 = vrot.slane %v2119_v55, 4  ;;  %v4838_v22 = vor.u32 %v5519_v51, %v4837_v14 }
 0x14a   : > { %1814 = vst [vmem:[#allocation2 + $0x9c] sm:$0xf] %v1583_v29  ;;  %v2118_v62 = vsel %vm6396_vm7, %v2113_v23, %v2117_v58  ;;  %v614_v20 = vmax.f32 %v553_v60, 0.0  ;;  %v787_v21 = vand.u32 15, %v679_v63  ;;  %v585_v31 = vadd.f32 %v6743_v42, %v6791_v10  ;;  %v5566_v29 = vld [vmem:[#allocation8 + $0x78] sm:$0xff] }
 0x14b   : > { %v1700_v24 = vsel %vm6404_vm8, %v1692_v54, %v1699_v5  ;;  %v2122_v47 = vor.u32 %v2121_v6, %v2117_v58  ;;  %2256 = vst [vmem:[#allocation2 + $0x134] sm:$0xf] %v2118_v62  ;;  %v692_v25 = vadd.s32 200, %v6271_v38  ;;  %2861 = vmatmul.bf16.gmra.mxu1 %v4838_v22  ;;  %3293 = vmatmul.bf16.gmra.mxu0 %v4838_v22  ;;  %v680_v52 = vadd.s32 104, %v6271_v38 }
 0x14c   : > { %1827 = vst [vmem:[#allocation2 + $0x138] sm:$0xf] %v1700_v24  ;;  %v646_v2 = vpack.c.bf16 %v614_v20, %v614_v20  ;;  %vm1255_vm10 = vcmp.gt.s32.totalorder %v787_v21, 0  ;;  %v555_v13 = vadd.f32 %v6743_v42, %v554_v41  ;;  %v1701_v15 = vrot.slane %v6816_v34, 4  ;;  %3349 = vmatpush.bf16.msrb.mxu1 %v5566_v29 }
 0x14d   : > { %v2123_v27 = vrot.slane %v2122_v47, 4  ;;  %vm1351_vm11 = vmpackc.low %vm1255_vm10, %vm1255_vm10  ;;  %v627_v39 = vmax.f32 %v585_v31, 0.0  ;;  %v878_v19 = vand.u32 15, %v692_v25  ;;  %v794_v28 = vand.u32 15, %v680_v52 }
 0x14e   : > { %v1223_v10 = vsel %vm6295_vm5, %v646_v2, 0  ;;  %v1383_v0 = vsel %vm1351_vm11, %v646_v2, 0  ;;  %1852 = vst [vmem:[#allocation2 + $0xac] sm:$0xf] %v646_v2  ;;  %v615_v30 = vmax.f32 %v555_v13, 0.0  ;;  %v6838_v26 = vor.u32 %v5521_v8, %v4851_v45  ;;  %v557_v2 = vpop.f32.mrf.mxu0  ;;  %v5565_v13 = vld [vmem:[#allocation8 + $0x70] sm:$0xff] }
 0x14f   : > { %v1586_v23 = vshrl.u32 %v1223_v10, 16  ;;  %v1995_v3 = vshll.u32 %v1383_v0, 16  ;;  %v1999_v16 = vshrl.u32 %v1383_v0, 16  ;;  %v659_v1 = vpack.c.bf16 %v627_v39, %v627_v39 }
 0x150   : > { %vm1108_vm12 = vcmp.lt.s32.totalorder %v878_v19, 15  ;;  %v647_v33 = vpack.c.bf16 %v615_v30, %v615_v30  ;;  %vm6840_vm13 = vcmp.lt.s32.totalorder %v794_v28, 15  ;;  %v1589_v43 = vshll.u32 %v1223_v10, 16  ;;  %3350 = vmatpush.bf16.msrb.mxu1 %v5565_v13 }
 0x151   : > { %v6846_v40 = vrot.slane %v1586_v23, 7  ;;  %v1997_v4 = vrot.slane %v1995_v3, 5  ;;  %v2001_v32 = vrot.slane %v1999_v16, 4  ;;  %vm1204_vm14 = vmpackc.low %vm1108_vm12, %vm1108_vm12  ;;  %v1396_v51 = vsel %vm6295_vm5, %v659_v1, 0  ;;  %1865 = vst [vmem:[#allocation2 + $0x148] sm:$0xf] %v659_v1 }
 0x152   : > { %v1236_v50 = vsel %vm1204_vm14, %v659_v1, 0  ;;  %vm1192_vm15 = vmpackc.low %vm6840_vm13, %vm6840_vm13  ;;  %v1384_v54 = vsel %vm6295_vm5, %v647_v33, 0  ;;  %v588_v9 = vadd.f32 %v6743_v42, %v6812_v49  ;;  %1853 = vst [vmem:[#allocation2 + $0xb8] sm:$0xf] %v647_v33  ;;  %v693_v63 = vadd.s32 208, %v6271_v38 }
 0x153   : > { %v1591_v55 = vor.u32 %v1589_v43, %v6846_v40  ;;  %v1998_v58 = vsel %vm6396_vm7, %v1993_v11, %v1997_v4  ;;  %v2002_v60 = vor.u32 %v2001_v32, %v1997_v4  ;;  %v1703_v5 = vshrl.u32 %v1236_v50, 16  ;;  %v4849_v16 = vld [vmem:[#allocation2 + $0x90] sm:$0xf]  ;;  %v5522_v1 = vld [vmem:[#allocation2 + $0x98] sm:$0xf0] }
 0x154   : > { %2244 = vst [vmem:[#allocation2 + $0xa4] sm:$0xf] %v1998_v58  ;;  %v1706_v6 = vshll.u32 %v1236_v50, 16  ;;  %v2125_v14 = vshll.u32 %v1396_v51, 16  ;;  %v2129_v41 = vshrl.u32 %v1396_v51, 16  ;;  %v1593_v62 = vrot.slane %v6846_v40, 4 }
 0x155   : > { %v1592_v49 = vsel %vm6404_vm8, %v1584_v7, %v1591_v55  ;;  %v1224_v11 = vsel %vm1192_vm15, %v647_v33, 0  ;;  %v2005_v20 = vshll.u32 %v1384_v54, 16  ;;  %v6871_v21 = vrot.slane %v1703_v5, 7  ;;  %2955 = vmatmul.bf16.gmra.mxu2 %v6838_v26  ;;  %v6887_v33 = vpop.f32.mrf.mxu2  ;;  %v5564_v4 = vld [vmem:[#allocation8 + $0x68] sm:$0xff]  ;;  %v5563_v5 = vld [vmem:[#allocation8 + $0x60] sm:$0xff] }
 0x156   : > { %1815 = vst [vmem:[#allocation2 + $0xa8] sm:$0xf] %v1592_v49  ;;  %v2127_v22 = vrot.slane %v2125_v14, 5  ;;  %v2131_v24 = vrot.slane %v2129_v41, 4  ;;  %v1595_v47 = vshrl.u32 %v1224_v11, 16  ;;  %v2003_v37 = vrot.slane %v2002_v60, 4  ;;  %3351 = vmatpush.bf16.msrb.mxu1 %v5564_v4 }
 0x157   : > { %v2007_v31 = vrot.slane %v2005_v20, 5  ;;  %v2009_v25 = vshrl.u32 %v1384_v54, 16  ;;  %v628_v7 = vmax.f32 %v588_v9, 0.0  ;;  %v1708_v52 = vor.u32 %v1706_v6, %v6871_v21 }
 0x158   : > { %v2128_v45 = vsel %vm6396_vm7, %v2123_v27, %v2127_v22  ;;  %v2132_v39 = vor.u32 %v2131_v24, %v2127_v22  ;;  %v1598_v19 = vshll.u32 %v1224_v11, 16  ;;  %v6877_v8 = vrot.slane %v1595_v47, 7 }
 0x159   : > { %2257 = vst [vmem:[#allocation2 + $0x140] sm:$0xf] %v2128_v45  ;;  %v2008_v10 = vsel %vm6396_vm7, %v2003_v37, %v2007_v31  ;;  %v2011_v0 = vrot.slane %v2009_v25, 4  ;;  %v660_v30 = vpack.c.bf16 %v628_v7, %v628_v7  ;;  %v1709_v28 = vsel %vm6404_vm8, %v1701_v15, %v1708_v52  ;;  %v5562_v45 = vld [vmem:[#allocation8 + $0x58] sm:$0xff] }
 0x15a   : > { %v1710_v23 = vrot.slane %v6871_v21, 4  ;;  %2245 = vst [vmem:[#allocation2 + $0xb0] sm:$0xf] %v2008_v10  ;;  %v885_v27 = vand.u32 15, %v693_v63  ;;  %v558_v3 = vadd.f32 %v6743_v42, %v557_v2  ;;  %v2133_v35 = vrot.slane %v2132_v39, 4  ;;  %3352 = vmatpush.bf16.msrb.mxu1 %v5563_v5 }
 0x15b   : > { %1828 = vst [vmem:[#allocation2 + $0x144] sm:$0xf] %v1709_v28  ;;  %v1600_v40 = vor.u32 %v1598_v19, %v6877_v8  ;;  %v2012_v43 = vor.u32 %v2011_v0, %v2007_v31  ;;  %v1237_v34 = vsel %vm6295_vm5, %v660_v30, 0  ;;  %v1602_v54 = vrot.slane %v6877_v8, 4 }
 0x15c   : > { %vm1269_vm0 = vcmp.gt.s32.totalorder %v885_v27, 0  ;;  %v1712_v15 = vshrl.u32 %v1237_v34, 16  ;;  %v1715_v32 = vshll.u32 %v1237_v34, 16  ;;  %1866 = vst [vmem:[#allocation2 + $0x154] sm:$0xf] %v660_v30  ;;  %v616_v50 = vmax.f32 %v558_v3, 0.0  ;;  %v559_v27 = vpop.f32.mrf.mxu0 }
 0x15d   : > { %v1601_v51 = vsel %vm6404_vm8, %v1593_v62, %v1600_v40  ;;  %vm1365_vm4 = vmpackc.low %vm1269_vm0, %vm1269_vm0  ;;  %v681_v9 = vadd.s32 112, %v6271_v38  ;;  %v4850_v55 = vor.u32 %v5522_v1, %v4849_v16  ;;  %v590_v29 = vadd.f32 %v6743_v42, %v6844_v56  ;;  %v594_v10 = vpop.f32.mrf.mxu2  ;;  %v4863_v40 = vld [vmem:[#allocation2 + $0xb4] sm:$0xf0] }
 0x15e   : > { %1816 = vst [vmem:[#allocation2 + $0xb4] sm:$0xf] %v1601_v51  ;;  %v1397_v58 = vsel %vm1365_vm4, %v660_v30, 0  ;;  %v6896_v60 = vrot.slane %v1712_v15, 7  ;;  %v648_v63 = vpack.c.bf16 %v616_v50, %v616_v50  ;;  %v694_v49 = vadd.s32 216, %v6271_v38  ;;  %3353 = vmatpush.bf16.msrb.mxu1 %v5562_v45 }
 0x15f   : > { %v2135_v6 = vshll.u32 %v1397_v58, 16  ;;  %v2139_v14 = vshrl.u32 %v1397_v58, 16  ;;  %v801_v41 = vand.u32 15, %v681_v9  ;;  %2866 = vmatmul.bf16.gmra.mxu1 %v4850_v55  ;;  %3298 = vmatmul.bf16.gmra.mxu0 %v4850_v55  ;;  %v2013_v62 = vrot.slane %v2012_v43, 4  ;;  %v5524_v58 = vld [vmem:[#allocation2 + $0xac] sm:$0xf] }
 0x160   : > { %v1717_v11 = vor.u32 %v1715_v32, %v6896_v60  ;;  %v1225_v20 = vsel %vm6295_vm5, %v648_v63, 0  ;;  %1854 = vst [vmem:[#allocation2 + $0xc4] sm:$0xf] %v648_v63  ;;  %v629_v21 = vmax.f32 %v590_v29, 0.0  ;;  %v892_v25 = vand.u32 15, %v694_v49  ;;  %v5601_v32 = vld [vmem:[#allocation8 + $0x178] sm:$0xff] }
 0x161   : > { %v2137_v22 = vrot.slane %v2135_v6, 5  ;;  %v2141_v24 = vrot.slane %v2139_v14, 4  ;;  %vm1257_vm6 = vcmp.gt.s32.totalorder %v801_v41, 0  ;;  %v1604_v56 = vshrl.u32 %v1225_v20, 16  ;;  %3011 = vmatpush.bf16.msrb.mxu3 %v5601_v32 }
 0x162   : > { %v1718_v47 = vsel %vm6404_vm8, %v1710_v23, %v1717_v11  ;;  %vm1353_vm1 = vmpackc.low %vm1257_vm6, %vm1257_vm6  ;;  %v1607_v37 = vshll.u32 %v1225_v20, 16  ;;  %v661_v31 = vpack.c.bf16 %v629_v21, %v629_v21  ;;  %vm1110_vm9 = vcmp.lt.s32.totalorder %v892_v25, 15 }
 0x163   : > { %1829 = vst [vmem:[#allocation2 + $0x150] sm:$0xf] %v1718_v47  ;;  %v2138_v7 = vsel %vm6396_vm7, %v2133_v35, %v2137_v22  ;;  %v2142_v2 = vor.u32 %v2141_v24, %v2137_v22  ;;  %v1385_v13 = vsel %vm1353_vm1, %v648_v63, 0  ;;  %v6908_v52 = vrot.slane %v1604_v56, 7  ;;  %vm1206_vm10 = vmpackc.low %vm1110_vm9, %vm1110_vm9  ;;  %v4861_v24 = vld [vmem:[#allocation2 + $0xa8] sm:$0xf] }
 0x164   : > { %2258 = vst [vmem:[#allocation2 + $0x14c] sm:$0xf] %v2138_v7  ;;  %v2015_v39 = vshll.u32 %v1385_v13, 16  ;;  %v2019_v19 = vshrl.u32 %v1385_v13, 16  ;;  %v1398_v8 = vsel %vm6295_vm5, %v661_v31, 0  ;;  %v1719_v0 = vrot.slane %v6896_v60, 4 }
 0x165   : > { %v2143_v30 = vrot.slane %v2142_v2, 4  ;;  %v1609_v28 = vor.u32 %v1607_v37, %v6908_v52  ;;  %1867 = vst [vmem:[#allocation2 + $0x160] sm:$0xf] %v661_v31  ;;  %v2145_v23 = vshll.u32 %v1398_v8, 16  ;;  %v1238_v1 = vsel %vm1206_vm10, %v661_v31, 0  ;;  %v5561_v60 = vld [vmem:[#allocation8 + $0x50] sm:$0xff] }
 0x166   : > { %v2017_v3 = vrot.slane %v2015_v39, 5  ;;  %v2021_v16 = vrot.slane %v2019_v19, 4  ;;  %v2149_v35 = vshrl.u32 %v1398_v8, 16  ;;  %v1721_v34 = vshrl.u32 %v1238_v1, 16  ;;  %v5525_v6 = vld [vmem:[#allocation2 + $0xb0] sm:$0xf0]  ;;  %3354 = vmatpush.bf16.msrb.mxu1 %v5561_v60  ;;  %v597_v8 = vpop.f32.mrf.mxu2 }
 0x167   : > { %v1610_v43 = vsel %vm6404_vm8, %v1602_v54, %v1609_v28  ;;  %v1724_v4 = vshll.u32 %v1238_v1, 16  ;;  %v2147_v15 = vrot.slane %v2145_v23, 5  ;;  %v560_v55 = vadd.f32 %v6743_v42, %v559_v27  ;;  %v5560_v2 = vld [vmem:[#allocation8 + $0x48] sm:$0xff]  ;;  %v5600_v60 = vld [vmem:[#allocation8 + $0x170] sm:$0xff] }
 0x168   : > { %1817 = vst [vmem:[#allocation2 + $0xc0] sm:$0xf] %v1610_v43  ;;  %v2018_v50 = vsel %vm6396_vm7, %v2013_v62, %v2017_v3  ;;  %v2022_v51 = vor.u32 %v2021_v16, %v2017_v3  ;;  %v2151_v9 = vrot.slane %v2149_v35, 4  ;;  %v6919_v63 = vrot.slane %v1721_v34, 7  ;;  %v6943_v34 = vpop.f32.mrf.mxu0  ;;  %3012 = vmatpush.bf16.msrb.mxu3 %v5600_v60 }
 0x169   : > { %2246 = vst [vmem:[#allocation2 + $0xbc] sm:$0xf] %v2018_v50  ;;  %v2148_v54 = vsel %vm6396_vm7, %v2143_v30, %v2147_v15  ;;  %v682_v29 = vadd.s32 120, %v6271_v38  ;;  %v6924_v5 = vor.u32 %v5524_v58, %v4863_v40  ;;  %v1611_v14 = vrot.slane %v6908_v52, 4  ;;  %v5559_v30 = vld [vmem:[#allocation8 + $0x40] sm:$0xff] }
 0x16a   : > { %v2152_v41 = vor.u32 %v2151_v9, %v2147_v15  ;;  %2259 = vst [vmem:[#allocation2 + $0x158] sm:$0xf] %v2148_v54  ;;  %v617_v49 = vmax.f32 %v560_v55, 0.0  ;;  %v593_v62 = vadd.f32 %v6743_v42, %v6887_v33  ;;  %v2023_v11 = vrot.slane %v2022_v51, 4  ;;  %3355 = vmatpush.bf16.msrb.mxu1 %v5560_v2 }
 0x16b   : > { %v1726_v20 = vor.u32 %v1724_v4, %v6919_v63  ;;  %v808_v21 = vand.u32 15, %v682_v29  ;;  %2960 = vmatmul.bf16.gmra.mxu2 %v6924_v5  ;;  %v695_v22 = vadd.s32 224, %v6271_v38  ;;  %v1728_v56 = vrot.slane %v6919_v63, 4 }
 0x16c   : > { %v649_v47 = vpack.c.bf16 %v617_v49, %v617_v49  ;;  %v630_v37 = vmax.f32 %v593_v62, 0.0  ;;  %v4862_v31 = vor.u32 %v5525_v6, %v4861_v24  ;;  %v595_v7 = vadd.f32 %v6743_v42, %v594_v10 }
 0x16d   : > { %v1727_v25 = vsel %vm6404_vm8, %v1719_v0, %v1726_v20  ;;  %vm1098_vm11 = vcmp.lt.s32.totalorder %v808_v21, 15  ;;  %v899_v33 = vand.u32 15, %v695_v22  ;;  %v6936_v13 = vrot.slane %v2152_v41, 4 }
 0x16e   : > { %1830 = vst [vmem:[#allocation2 + $0x15c] sm:$0xf] %v1727_v25  ;;  %vm1194_vm12 = vmpackc.low %vm1098_vm11, %vm1098_vm11  ;;  %v1386_v45 = vsel %vm6295_vm5, %v649_v47, 0  ;;  %v662_v39 = vpack.c.bf16 %v630_v37, %v630_v37  ;;  %v696_v19 = vadd.s32 232, %v6271_v38  ;;  %v631_v16 = vmax.f32 %v595_v7, 0.0  ;;  %3356 = vmatpush.bf16.msrb.mxu1 %v5559_v30 }
 0x16f   : > { %v1226_v28 = vsel %vm1194_vm12, %v649_v47, 0  ;;  %1855 = vst [vmem:[#allocation2 + $0xd0] sm:$0xf] %v649_v47  ;;  %v2025_v0 = vshll.u32 %v1386_v45, 16  ;;  %v2029_v23 = vshrl.u32 %v1386_v45, 16  ;;  %vm1271_vm13 = vcmp.gt.s32.totalorder %v899_v33, 0  ;;  %2871 = vmatmul.bf16.gmra.mxu1 %v4862_v31  ;;  %3303 = vmatmul.bf16.gmra.mxu0 %v4862_v31 }
 0x170   : > { %v1613_v10 = vshrl.u32 %v1226_v28, 16  ;;  %v1616_v27 = vshll.u32 %v1226_v28, 16  ;;  %v1239_v3 = vsel %vm6295_vm5, %v662_v39, 0  ;;  %vm1367_vm14 = vmpackc.low %vm1271_vm13, %vm1271_vm13  ;;  %1868 = vst [vmem:[#allocation2 + $0x16c] sm:$0xf] %v662_v39  ;;  %v663_v58 = vpack.c.bf16 %v631_v16, %v631_v16 }
 0x171   : > { %v2027_v1 = vrot.slane %v2025_v0, 5  ;;  %v2031_v35 = vrot.slane %v2029_v23, 4  ;;  %v1399_v40 = vsel %vm1367_vm14, %v662_v39, 0  ;;  %v1730_v43 = vshrl.u32 %v1239_v3, 16 }
 0x172   : > { %v1615_v4 = vrot.slane %v1613_v10, 7  ;;  %v1733_v15 = vshll.u32 %v1239_v3, 16  ;;  %v2155_v32 = vshll.u32 %v1399_v40, 16  ;;  %v2159_v50 = vshrl.u32 %v1399_v40, 16  ;;  %1869 = vst [vmem:[#allocation2 + $0x178] sm:$0xf] %v663_v58 }
 0x173   : > { %v2028_v51 = vsel %vm6396_vm7, %v2023_v11, %v2027_v1  ;;  %v2032_v9 = vor.u32 %v2031_v35, %v2027_v1  ;;  %v6947_v55 = vrot.slane %v1730_v43, 7  ;;  %v906_v20 = vand.u32 15, %v696_v19 }
 0x174   : > { %v1618_v54 = vor.u32 %v1616_v27, %v1615_v4  ;;  %v1620_v29 = vrot.slane %v1615_v4, 4  ;;  %2247 = vst [vmem:[#allocation2 + $0xc8] sm:$0xf] %v2028_v51  ;;  %v2157_v6 = vrot.slane %v2155_v32, 5  ;;  %v2161_v41 = vrot.slane %v2159_v50, 4  ;;  %v6976_v27 = vpop.f32.mrf.mxu0 }
 0x175   : > { %v2033_v49 = vrot.slane %v2032_v9, 4  ;;  %v1735_v62 = vor.u32 %v1733_v15, %v6947_v55  ;;  %v598_v21 = vadd.f32 %v6743_v42, %v597_v8  ;;  %vm1112_vm15 = vcmp.lt.s32.totalorder %v906_v20, 15  ;;  %v4873_v50 = vld [vmem:[#allocation2 + $0xc0] sm:$0xf]  ;;  %v5531_v51 = vld [vmem:[#allocation2 + $0xe0] sm:$0xf0] }
 0x176   : > { %v1619_v11 = vsel %vm6404_vm8, %v1611_v14, %v1618_v54  ;;  %v1628_v22 = vsel %vm6404_vm8, %v1620_v29, %v6485_v57  ;;  %v2158_v24 = vsel %vm6396_vm7, %v6936_v13, %v2157_v6  ;;  %v2162_v47 = vor.u32 %v2161_v41, %v2157_v6  ;;  %v4875_v37 = vld [vmem:[#allocation2 + $0xcc] sm:$0xf0]  ;;  %v5527_v14 = vld [vmem:[#allocation2 + $0xc4] sm:$0xf]  ;;  %vm1208_vm0 = vmpackc.low %vm1112_vm15, %vm1112_vm15  ;;  %v599_v13 = vpop.f32.mrf.mxu2 }
 0x177   : > { %1818 = vst [vmem:[#allocation2 + $0xcc] sm:$0xf] %v1619_v11  ;;  %v2038_v31 = vsel %vm6396_vm7, %v2033_v49, %v6470_v48  ;;  %v1736_v52 = vsel %vm6404_vm8, %v1728_v56, %v1735_v62  ;;  %v1400_v57 = vsel %vm6295_vm5, %v663_v58, 0  ;;  %v6970_v2 = vor.u32 %v5527_v14, %v4875_v37 }
 0x178   : > { %1819 = vst [vmem:[#allocation2 + $0xd8] sm:$0xf] %v1628_v22  ;;  %v2163_v25 = vrot.slane %v2162_v47, 4  ;;  %v2165_v33 = vshll.u32 %v1400_v57, 16  ;;  %v2169_v7 = vshrl.u32 %v1400_v57, 16  ;;  %v1240_v48 = vsel %vm1208_vm0, %v663_v58, 0 }
 0x179   : > { %2248 = vst [vmem:[#allocation2 + $0xd4] sm:$0xf] %v2038_v31  ;;  %v632_v45 = vmax.f32 %v598_v21, 0.0  ;;  %v697_v63 = vadd.s32 240, %v6271_v38  ;;  %v600_v56 = vadd.f32 %v6743_v42, %v599_v13  ;;  %v1739_v39 = vshrl.u32 %v1240_v48, 16 }
 0x17a   : > { %1831 = vst [vmem:[#allocation2 + $0x168] sm:$0xf] %v1736_v52  ;;  %v1742_v19 = vshll.u32 %v1240_v48, 16  ;;  %v2167_v8 = vrot.slane %v2165_v33, 5  ;;  %v2171_v30 = vrot.slane %v2169_v7, 4  ;;  %v698_v10 = vadd.s32 248, %v6271_v38 }
 0x17b   : > { %2260 = vst [vmem:[#allocation2 + $0x164] sm:$0xf] %v2158_v24  ;;  %2965 = vmatmul.bf16.gmra.mxu2 %v6970_v2  ;;  %v664_v28 = vpack.c.bf16 %v632_v45, %v632_v45  ;;  %v913_v0 = vand.u32 15, %v697_v63  ;;  %v633_v23 = vmax.f32 %v600_v56, 0.0  ;;  %v1737_v3 = vrot.slane %v6947_v55, 4  ;;  %v5599_v52 = vld [vmem:[#allocation8 + $0x168] sm:$0xff] }
 0x17c   : > { %v1741_v16 = vrot.slane %v1739_v39, 7  ;;  %v2168_v42 = vsel %vm6396_vm7, %v2163_v25, %v2167_v8  ;;  %v2172_v1 = vor.u32 %v2171_v30, %v2167_v8  ;;  %v920_v43 = vand.u32 15, %v698_v10  ;;  %v5530_v33 = vld [vmem:[#allocation2 + $0xdc] sm:$0xf]  ;;  %v4887_v7 = vld [vmem:[#allocation2 + $0xe4] sm:$0xf0]  ;;  %3013 = vmatpush.bf16.msrb.mxu3 %v5599_v52 }
 0x17d   : > { %2261 = vst [vmem:[#allocation2 + $0x170] sm:$0xf] %v2168_v42  ;;  %v1241_v35 = vsel %vm6295_vm5, %v664_v28, 0  ;;  %vm1273_vm4 = vcmp.gt.s32.totalorder %v913_v0, 0  ;;  %v665_v40 = vpack.c.bf16 %v633_v23, %v633_v23  ;;  %vm1835_vm10 = vcmask 1040384  }
 0x17e   : > { %v1744_v4 = vor.u32 %v1742_v19, %v1741_v16  ;;  %v1746_v15 = vrot.slane %v1741_v16, 4  ;;  %v2173_v32 = vrot.slane %v2172_v1, 4  ;;  %vm1369_vm6 = vmpackc.low %vm1273_vm4, %vm1273_vm4  ;;  %v1748_v38 = vshrl.u32 %v1241_v35, 16  ;;  %1870 = vst [vmem:[#allocation2 + $0x184] sm:$0xf] %v664_v28 }
 0x17f   : > { %v1401_v9 = vsel %vm1369_vm6, %v664_v28, 0  ;;  %v1751_v55 = vshll.u32 %v1241_v35, 16  ;;  %v5528_v58 = vld [vmem:[#allocation2 + $0xc8] sm:$0xf0]  ;;  %v4885_v60 = vld [vmem:[#allocation2 + $0xd8] sm:$0xf]  ;;  %v2842_v31 = vpop.f32.mrf.mxu1  ;;  %v6994_v63 = vpop.f32.mrf.mxu0  ;;  %v7000_v16 = vor.u32 %v5530_v33, %v4887_v7 }
 0x180   : > { %v1745_v54 = vsel %vm6404_vm8, %v1737_v3, %v1744_v4  ;;  %v1750_v29 = vrot.slane %v1748_v38, 7  ;;  %v2175_v6 = vshll.u32 %v1401_v9, 16  ;;  %v2179_v41 = vshrl.u32 %v1401_v9, 16  ;;  %1871 = vst [vmem:[#allocation2 + $0x190] sm:$0xf] %v665_v40 }
 0x181   : > { %1832 = vst [vmem:[#allocation2 + $0x174] sm:$0xf] %v1745_v54  ;;  %v4874_v49 = vor.u32 %v5528_v58, %v4873_v50  ;;  %v6985_v62 = vor.u32 %v5531_v51, %v4885_v60  ;;  %vm1114_vm1 = vcmp.lt.s32.totalorder %v920_v43, 15  ;;  %v1402_v20 = vsel %vm6295_vm5, %v665_v40, 0  ;;  %vm1836_vm5 = vmand %vm1835_vm10, %vm1475_vm3  ;;  %v1837_v8 = vld [vmem:[#allocation2 + $0x198] sm:$0x1] }
 0x182   : > { %v1753_v21 = vor.u32 %v1751_v55, %v1750_v29  ;;  %v2177_v11 = vrot.slane %v2175_v6, 5  ;;  %v2181_v22 = vrot.slane %v2179_v41, 4  ;;  %vm1210_vm9 = vmpackc.low %vm1114_vm1, %vm1114_vm1  ;;  %v2185_v47 = vshll.u32 %v1402_v20, 16  ;;  %v2265_v10 = vld [vmem:[#allocation2 + $0x194] sm:$0xf] }
 0x183   : > { %2876 = vmatmul.bf16.gmra.mxu1 %v4874_v49  ;;  %2881 = vmatmul.bf16.vlgmr.msra.gmra.mxu3 %v6985_v62  ;;  %v1242_v24 = vsel %vm1210_vm9, %v665_v40, 0  ;;  %v2189_v37 = vshrl.u32 %v1402_v20, 16  ;;  %v1755_v56 = vrot.slane %v1750_v29, 4  ;;  %v5503_v4 = vld [vmem:[#allocation2 + $0x4] sm:$0xf]  ;;  %v5598_v58 = vld [vmem:[#allocation8 + $0x160] sm:$0xff] }
 0x184   : > { %v1754_v57 = vsel %vm6404_vm8, %v1746_v15, %v1753_v21  ;;  %v2178_v46 = vsel %vm6396_vm7, %v2173_v32, %v2177_v11  ;;  %v2182_v14 = vor.u32 %v2181_v22, %v2177_v11  ;;  %3308 = vmatmul.bf16.gmra.mxu0 %v4874_v49  ;;  %v1757_v25 = vshrl.u32 %v1242_v24, 16  ;;  %v5079_v15 = vld [vmem:[#allocation2 + $0xc] sm:$0xf0]  ;;  %v5534_v38 = vld [vmem:[#allocation2 + $0xf8] sm:$0xf0]  ;;  %3014 = vmatpush.bf16.msrb.mxu3 %v5598_v58 }
 0x185   : > { %1833 = vst [vmem:[#allocation2 + $0x180] sm:$0xf] %v1754_v57  ;;  %v1760_v13 = vshll.u32 %v1242_v24, 16  ;;  %v2187_v48 = vrot.slane %v2185_v47, 5  ;;  %v2191_v45 = vrot.slane %v2189_v37, 4  ;;  %v5082_v50 = vor.u32 %v5503_v4, %v5079_v15  ;;  %v5595_v4 = vld [vmem:[#allocation8 + $0x148] sm:$0xff] }
 0x186   : > { %v2183_v39 = vrot.slane %v2182_v14, 4  ;;  %2262 = vst [vmem:[#allocation2 + $0x17c] sm:$0xf] %v2178_v46  ;;  %v1759_v19 = vrot.slane %v1757_v25, 7  ;;  %v4897_v32 = vld [vmem:[#allocation2 + $0xf0] sm:$0xf] }
 0x187   : > { %v2192_v30 = vor.u32 %v2191_v45, %v2187_v48  ;;  %v2931_v35 = vpop.f32.mrf.mxu2  ;;  %v2844_v53 = vpop.f32.mrf.mxu1  ;;  %v4898_v51 = vor.u32 %v5534_v38, %v4897_v32  ;;  %v5533_v60 = vld [vmem:[#allocation2 + $0xf4] sm:$0xf]  ;;  %v4899_v54 = vld [vmem:[#allocation2 + $0xfc] sm:$0xf0]  ;;  %v4909_v21 = vld [vmem:[#allocation2 + $0x108] sm:$0xf] }
 0x188   : > { %v1762_v28 = vor.u32 %v1760_v13, %v1759_v19  ;;  %v1764_v0 = vrot.slane %v1759_v19, 4  ;;  %v2188_v23 = vsel %vm6396_vm7, %v2183_v39, %v2187_v48  ;;  %v7007_v43 = vadd.f32 %v2931_v35, %v2842_v31  ;;  %v7009_v59 = vpop.f32.mrf.mxu0  ;;  %v5537_v11 = vld [vmem:[#allocation2 + $0x110] sm:$0xf0]  ;;  %v5597_v31 = vld [vmem:[#allocation8 + $0x158] sm:$0xff]  ;;  %v4911_v57 = vld [vmem:[#allocation2 + $0x114] sm:$0xf0] }
 0x189   : > { %v2193_v3 = vrot.slane %v2192_v30, 4  ;;  %2263 = vst [vmem:[#allocation2 + $0x188] sm:$0xf] %v2188_v23  ;;  %v7014_v29 = vor.u32 %v5533_v60, %v4899_v54  ;;  %v4910_v22 = vor.u32 %v5537_v11, %v4909_v21  ;;  %3015 = vmatpush.bf16.msrb.mxu3 %v5597_v31  ;;  %v5536_v52 = vld [vmem:[#allocation2 + $0x10c] sm:$0xf]  ;;  %v5596_v39 = vld [vmem:[#allocation8 + $0x150] sm:$0xff] }
 0x18a   : > { %v1763_v42 = vsel %vm6404_vm8, %v1755_v56, %v1762_v28  ;;  %v1838_v1 = vsel %vm1836_vm5, %v1764_v0, %v1837_v8  ;;  %v7026_v46 = vor.u32 %v5536_v52, %v4911_v57  ;;  %v5540_v13 = vld [vmem:[#allocation2 + $0x128] sm:$0xf0]  ;;  %v5539_v8 = vld [vmem:[#allocation2 + $0x124] sm:$0xf]  ;;  %v4923_v30 = vld [vmem:[#allocation2 + $0x12c] sm:$0xf0] }
 0x18b   : > { %1834 = vst [vmem:[#allocation2 + $0x18c] sm:$0xf] %v1763_v42  ;;  %v2266_v40 = vsel %vm6259_vm2, %v2193_v3, %v2265_v10  ;;  %2970 = vmatmul.bf16.gmra.mxu2 %v7000_v16  ;;  %v7038_v0 = vor.u32 %v5539_v8, %v4923_v30  ;;  %v4933_v3 = vld [vmem:[#allocation2 + $0x138] sm:$0xf]  ;;  %v5543_v42 = vld [vmem:[#allocation2 + $0x140] sm:$0xf0] }
 0x18c   : > { %1839 = vst [vmem:[#allocation2 + $0x198] sm:$0x1] %v1838_v1  ;;  %v4934_v35 = vor.u32 %v5543_v42, %v4933_v3  ;;  %v5665_v15 = vld [vmem:[#allocation8 + $0x1f8] sm:$0xff]  ;;  %v5542_v32 = vld [vmem:[#allocation2 + $0x13c] sm:$0xf]  ;;  %v5573_v21 = vld [vmem:[#allocation8 + $0xb0] sm:$0xff] }
 0x18d   : > { %2267 = vst [vmem:[#allocation2 + $0x194] sm:$0xf] %v2266_v40  ;;  %3016 = vmatpush.bf16.msrb.mxu3 %v5596_v39  ;;  %v4935_v38 = vld [vmem:[#allocation2 + $0x144] sm:$0xf0]  ;;  %4129 = vmatpush.bf16.msra.mxu0 %v5665_v15  ;;  %v5663_v54 = vld [vmem:[#allocation8 + $0x1e8] sm:$0xff]  ;;  %v5662_v11 = vld [vmem:[#allocation8 + $0x1e0] sm:$0xff] }
 0x18e   : > { %v5574_v60 = vld [vmem:[#allocation8 + $0xb8] sm:$0xff]  ;;  %v5594_v52 = vld [vmem:[#allocation8 + $0x140] sm:$0xff]  ;;  %v5572_v57 = vld [vmem:[#allocation8 + $0xa8] sm:$0xff] }
 0x18f   : > { %v2933_v9 = vpop.f32.mrf.mxu2  ;;  %v2847_v55 = vpop.f32.mrf.mxu1  ;;  %3438 = vmatpush.bf16.msra.mxu2 %v5574_v60  ;;  %v5659_v8 = vld [vmem:[#allocation8 + $0x1c8] sm:$0xff]  ;;  %v4957_v3 = vld [vmem:[#allocation2 + $0x168] sm:$0xf]  ;;  %v5549_v42 = vld [vmem:[#allocation2 + $0x170] sm:$0xf0] }
 0x190   : > { %v7011_v36 = vadd.f32 %v2933_v9, %v2844_v53  ;;  %v7016_v6 = vpop.f32.mrf.mxu0  ;;  %v5657_v15 = vld [vmem:[#allocation8 + $0x1b8] sm:$0xff]  ;;  %v4959_v60 = vld [vmem:[#allocation2 + $0x174] sm:$0xf0] }
 0x191   : > { %3017 = vmatpush.bf16.msrb.mxu3 %v5595_v4  ;;  %v5658_v4 = vld [vmem:[#allocation8 + $0x1c0] sm:$0xff] }
 0x193   : > { %2886 = vmatmul.bf16.gmra.mxu3 %v4898_v51  ;;  %3357 = vmatmul.bf16.vlgmr.msrb.gmra.mxu1 %v5082_v50  ;;  %v5664_v50 = vld [vmem:[#allocation8 + $0x1f0] sm:$0xff] }
 0x194   : > { %3313 = vmatmul.bf16.gmra.mxu0 %v6985_v62  ;;  %3439 = vmatpush.bf16.msra.mxu2 %v5573_v21 }
 0x195   : > { %4130 = vmatpush.bf16.msra.mxu0 %v5664_v50  ;;  %3018 = vmatpush.bf16.msrb.mxu3 %v5594_v52  ;;  %v5568_v50 = vld [vmem:[#allocation8 + $0x88] sm:$0xff] }
 0x197   : > { %v2936_v41 = vpop.f32.mrf.mxu2  ;;  %v2849_v20 = vpop.f32.mrf.mxu1 }
 0x198   : > { %v7019_v49 = vadd.f32 %v2936_v41, %v2847_v55  ;;  %v7024_v47 = vpop.f32.mrf.mxu0  ;;  %v4945_v41 = vld [vmem:[#allocation2 + $0x150] sm:$0xf]  ;;  %3440 = vmatpush.bf16.msra.mxu2 %v5572_v57 }
 0x199   : > { %4131 = vmatpush.bf16.msra.mxu0 %v5663_v54  ;;  %4040 = vmatpush.bf16.msra.mxu3 %v5657_v15 }
 0x19b   : > { %2975 = vmatmul.bf16.gmra.mxu2 %v7014_v29 }
 0x19d   : > { %4132 = vmatpush.bf16.msra.mxu0 %v5662_v11 }
 0x19f   : > { %v2938_v24 = vpop.f32.mrf.mxu2  ;;  %v2852_v37 = vpop.f32.mrf.mxu1 }
 0x1a0   : > { %v7022_v62 = vadd.f32 %v2938_v24, %v2849_v20  ;;  %v7031_v7 = vpop.f32.mrf.mxu0  ;;  %v5546_v20 = vld [vmem:[#allocation2 + $0x158] sm:$0xf0] }
 0x1a3   : > { %2891 = vmatmul.bf16.gmra.mxu3 %v4910_v22  ;;  %3362 = vmatmul.bf16.gmra.mxu1 %v6613_v18  ;;  %v4921_v18 = vld [vmem:[#allocation2 + $0x120] sm:$0xf] }
 0x1a4   : > { %3318 = vmatmul.bf16.gmra.mxu0 %v4898_v51  ;;  %v4922_v48 = vor.u32 %v5540_v13, %v4921_v18  ;;  %v7048_v51 = vor.u32 %v5542_v32, %v4935_v38  ;;  %v5545_v18 = vld [vmem:[#allocation2 + $0x154] sm:$0xf]  ;;  %v4947_v13 = vld [vmem:[#allocation2 + $0x15c] sm:$0xf0] }
 0x1a5   : > { %v7060_v39 = vor.u32 %v5545_v18, %v4947_v13  ;;  %v5575_v13 = vld [vmem:[#allocation2 + $0x184] sm:$0xf] }
 0x1a7   : > { %v2941_v14 = vpop.f32.mrf.mxu2  ;;  %v2854_v33 = vpop.f32.mrf.mxu1 }
 0x1a8   : > { %v7029_v25 = vadd.f32 %v2941_v14, %v2852_v37  ;;  %v7036_v28 = vpop.f32.mrf.mxu0  ;;  %v5661_v14 = vld [vmem:[#allocation8 + $0x1d8] sm:$0xff] }
 0x1a9   : > { %4133 = vmatpush.bf16.msra.mxu0 %v5661_v14 }
 0x1ab   : > { %2980 = vmatmul.bf16.gmra.mxu2 %v7026_v46 }
 0x1af   : > { %v2943_v45 = vpop.f32.mrf.mxu2 }
 0x1b0   : > { %v7034_v56 = vadd.f32 %v2943_v45, %v2854_v33  ;;  %v5660_v45 = vld [vmem:[#allocation8 + $0x1d0] sm:$0xff] }
 0x1b1   : > { %v2857_v19 = vpop.f32.mrf.mxu1  ;;  %v7043_v1 = vpop.f32.mrf.mxu0  ;;  %4134 = vmatpush.bf16.msra.mxu0 %v5660_v45 }
 0x1b2   : > { %7679 = vst [vmem:[#allocation16_spill] sm:$0xff] %v7043_v1 }
 0x1b3   : > { %2896 = vmatmul.bf16.gmra.mxu3 %v4922_v48  ;;  %3367 = vmatmul.bf16.gmra.mxu1 %v6648_v12 }
 0x1b4   : > { %3323 = vmatmul.bf16.gmra.mxu0 %v4910_v22  ;;  %v4946_v22 = vor.u32 %v5546_v20, %v4945_v41  ;;  %v5567_v20 = vld [vmem:[#allocation8 + $0x80] sm:$0xff] }
 0x1b5   : > { %4135 = vmatpush.bf16.msra.mxu0 %v5659_v8 }
 0x1b8   : > { %v2946_v23 = vpop.f32.mrf.mxu2 }
 0x1b9   : > { %v7041_v10 = vadd.f32 %v2946_v23, %v2857_v19  ;;  %v2859_v12 = vpop.f32.mrf.mxu1  ;;  %v7050_v58 = vpop.f32.mrf.mxu0  ;;  %4136 = vmatpush.bf16.msra.mxu0 %v5658_v4 }
 0x1ba   : > { %7680 = vst [vmem:[#allocation17_spill] sm:$0xff] %v7050_v58 }
 0x1bb   : > { %2985 = vmatmul.bf16.gmra.mxu2 %v7038_v0 }
 0x1c0   : > { %v2948_v40 = vpop.f32.mrf.mxu2 }
 0x1c1   : > { %v7046_v53 = vadd.f32 %v2948_v40, %v2859_v12  ;;  %v5569_v40 = vld [vmem:[#allocation8 + $0x90] sm:$0xff] }
 0x1c3   : > { %2901 = vmatmul.bf16.gmra.mxu3 %v4934_v35  ;;  %3372 = vmatmul.bf16.gmra.mxu1 %v6683_v44 }
 0x1c4   : > { %3328 = vmatmul.bf16.gmra.mxu0 %v4922_v48  ;;  %v5571_v48 = vld [vmem:[#allocation8 + $0xa0] sm:$0xff] }
 0x1c5   : > { %3441 = vmatpush.bf16.msra.mxu2 %v5571_v48  ;;  %v4971_v48 = vld [vmem:[#allocation2 + $0x18c] sm:$0xf0] }
 0x1c8   : > { %v2862_v9 = vpop.f32.mrf.mxu1  ;;  %v2951_v55 = vpop.f32.mrf.mxu2 }
 0x1c9   : > { %v7053_v44 = vadd.f32 %v2951_v55, %v2862_v9  ;;  %v7058_v33 = vpop.f32.mrf.mxu0  ;;  %v5548_v55 = vld [vmem:[#allocation2 + $0x16c] sm:$0xf] }
 0x1ca   : > { %7681 = vst [vmem:[#allocation18_spill] sm:$0xff] %v7058_v33  ;;  %v7072_v41 = vor.u32 %v5548_v55, %v4959_v60  ;;  %v5085_v55 = vld [vmem:[#allocation2 + $0x8] sm:$0xf]  ;;  %v5505_v60 = vld [vmem:[#allocation2 + $0x10] sm:$0xf0] }
 0x1cb   : > { %2990 = vmatmul.bf16.gmra.mxu2 %v7048_v51  ;;  %v5526_v33 = vld [vmem:[#allocation2 + $0xb8] sm:$0xf0] }
 0x1d0   : > { %v2864_v24 = vpop.f32.mrf.mxu1  ;;  %v2953_v37 = vpop.f32.mrf.mxu2 }
 0x1d1   : > { %v7056_v31 = vadd.f32 %v2953_v37, %v2864_v24  ;;  %v7065_v12 = vpop.f32.mrf.mxu0  ;;  %v5576_v24 = vld [vmem:[#allocation2 + $0x188] sm:$0xf0] }
 0x1d2   : > { %7682 = vst [vmem:[#allocation19_spill] sm:$0xff] %v7065_v12 }
 0x1d3   : > { %2906 = vmatmul.bf16.gmra.mxu3 %v4946_v22  ;;  %3377 = vmatmul.bf16.gmra.mxu1 %v6724_v17  ;;  %v5570_v17 = vld [vmem:[#allocation8 + $0x98] sm:$0xff] }
 0x1d4   : > { %3333 = vmatmul.bf16.gmra.mxu0 %v4934_v35  ;;  %3442 = vmatpush.bf16.msra.mxu2 %v5570_v17  ;;  %v4958_v35 = vor.u32 %v5549_v42, %v4957_v3  ;;  %v5187_v3 = vld [vmem:[#allocation2 + $0x3c] sm:$0xf0] }
 0x1d8   : > { %v2956_v19 = vpop.f32.mrf.mxu2  ;;  %3443 = vmatpush.bf16.msra.mxu2 %v5569_v40  ;;  %v4797_v40 = vld [vmem:[#allocation2 + $0x20] sm:$0xf] }
 0x1db   : > { %2995 = vmatmul.bf16.gmra.mxu2 %v7060_v39 }
 0x1dc   : > { %v2867_v30 = vpop.f32.mrf.mxu1  ;;  %3444 = vmatpush.bf16.msra.mxu2 %v5568_v50  ;;  %v7070_v54 = vpop.f32.mrf.mxu0 }
 0x1dd   : > { %v7063_v23 = vadd.f32 %v2956_v19, %v2867_v30  ;;  %7683 = vst [vmem:[#allocation20_spill] sm:$0xff] %v7070_v54  ;;  %v4974_v19 = vor.u32 %v5575_v13, %v4971_v48  ;;  %v5508_v30 = vld [vmem:[#allocation2 + $0x28] sm:$0xf0]  ;;  %v4809_v48 = vld [vmem:[#allocation2 + $0x38] sm:$0xf] }
 0x1de   : > { %v4798_v15 = vor.u32 %v5508_v30, %v4797_v40  ;;  %v5605_v30 = vld [vmem:[#allocation2 + $0x4c] sm:$0xf] }
 0x1df   : > { %v5617_v54 = vld [vmem:[#allocation2 + $0xac] sm:$0xf] }
 0x1e0   : > { %v2958_v32 = vpop.f32.mrf.mxu2  ;;  %3445 = vmatpush.bf16.msra.mxu2 %v5567_v20 }
 0x1e3   : > { %2911 = vmatmul.bf16.gmra.mxu3 %v4958_v35  ;;  %3382 = vmatmul.bf16.gmra.mxu1 %v6793_v61  ;;  %v5673_v61 = vld [vmem:[#allocation8 + $0x238] sm:$0xff] }
 0x1e4   : > { %3338 = vmatmul.bf16.gmra.mxu0 %v4946_v22  ;;  %v2869_v38 = vpop.f32.mrf.mxu1  ;;  %4218 = vmatpush.bf16.msra.mxu1 %v5673_v61  ;;  %v4969_v22 = vld [vmem:[#allocation2 + $0x180] sm:$0xf]  ;;  %v7077_v57 = vpop.f32.mrf.mxu0 }
 0x1e5   : > { %v7068_v9 = vadd.f32 %v2958_v32, %v2869_v38  ;;  %v4970_v52 = vor.u32 %v5576_v24, %v4969_v22  ;;  %7684 = vst [vmem:[#allocation21_spill] sm:$0xff] %v7077_v57  ;;  %v5656_v32 = vld [vmem:[#allocation8 + $0x1b0] sm:$0xff] }
 0x1e6   : > { %4041 = vmatpush.bf16.msra.mxu3 %v5656_v32  ;;  %v5672_v22 = vld [vmem:[#allocation8 + $0x230] sm:$0xff] }
 0x1e8   : > { %4219 = vmatpush.bf16.msra.mxu1 %v5672_v22  ;;  %v4821_v22 = vld [vmem:[#allocation2 + $0x50] sm:$0xf] }
 0x1eb   : > { %3000 = vmatmul.bf16.gmra.mxu2 %v7072_v41 }
 0x1ec   : > { %v2872_v21 = vpop.f32.mrf.mxu1  ;;  %v7082_v17 = vpop.f32.mrf.mxu0 }
 0x1ed   : > { %7685 = vst [vmem:[#allocation22_spill] sm:$0xff] %v7082_v17 }
 0x1ee   : > { %v2961_v11 = vpop.f32.mrf.mxu2 }
 0x1ef   : > { %v7075_v37 = vadd.f32 %v2961_v11, %v2872_v21  ;;  %v5086_v11 = vor.u32 %v5505_v60, %v5085_v55  ;;  %v5514_v55 = vld [vmem:[#allocation2 + $0x58] sm:$0xf0] }
 0x1f3   : > { %2916 = vmatmul.bf16.gmra.mxu3 %v4970_v52  ;;  %3387 = vmatmul.bf16.gmra.mxu1 %v6838_v26  ;;  %v5602_v26 = vld [vmem:[#allocation2 + $0x34] sm:$0xf] }
 0x1f4   : > { %3343 = vmatmul.bf16.gmra.mxu0 %v4958_v35  ;;  %v2874_v14 = vpop.f32.mrf.mxu1  ;;  %v5190_v35 = vor.u32 %v5602_v26, %v5187_v3  ;;  %v7087_v20 = vpop.f32.mrf.mxu0 }
 0x1f5   : > { %7686 = vst [vmem:[#allocation23_spill] sm:$0xff] %v7087_v20 }
 0x1f6   : > { %v2963_v18 = vpop.f32.mrf.mxu2 }
 0x1f7   : > { %v7080_v45 = vadd.f32 %v2963_v18, %v2874_v14  ;;  %v5511_v14 = vld [vmem:[#allocation2 + $0x40] sm:$0xf0]  ;;  %v5199_v18 = vld [vmem:[#allocation2 + $0x54] sm:$0xf0] }
 0x1f8   : > { %v5202_v3 = vor.u32 %v5605_v30, %v5199_v18 }
 0x1fb   : > { %3005 = vmatmul.bf16.gmra.mxu2 %v4974_v19 }
 0x1fe   : > { %v2966_v8 = vpop.f32.mrf.mxu2 }
 0x200   : > { %v2877_v42 = vpop.f32.mrf.mxu1 }
 0x201   : > { %v7084_v4 = vadd.f32 %v2966_v8, %v2877_v42  ;;  %v7095_v19 = vpop.f32.mrf.mxu0  ;;  %v4810_v8 = vor.u32 %v5511_v14, %v4809_v48 }
 0x202   : > { %7687 = vst [vmem:[#allocation24_spill] sm:$0xff] %v7095_v19  ;;  %v5520_v19 = vld [vmem:[#allocation2 + $0x88] sm:$0xf0] }
 0x203   : > { %3019 = vmatmul.bf16.vlgmr.msrb.gmra.mxu3 %v4798_v15  ;;  %3392 = vmatmul.bf16.gmra.mxu1 %v6924_v5 }
 0x204   : > { %4137 = vmatmul.bf16.vlgmr.msra.gmra.mxu0 %v5190_v35 }
 0x206   : > { %v2882_v38 = vpop.f32.mrf.mxu3  ;;  %v2968_v50 = vpop.f32.mrf.mxu2 }
 0x208   : > { %v2879_v61 = vpop.f32.mrf.mxu1 }
 0x209   : > { %v7089_v21 = vadd.f32 %v2968_v50, %v2879_v61  ;;  %v7102_v32 = vpop.f32.mrf.mxu0  ;;  %v5211_v61 = vld [vmem:[#allocation2 + $0x6c] sm:$0xf0] }
 0x20a   : > { %7688 = vst [vmem:[#allocation25_spill] sm:$0xff] %v7102_v32 }
 0x20b   : > { %3446 = vmatmul.bf16.vlgmr.msra.gmra.mxu2 %v5086_v11 }
 0x20e   : > { %v2884_v24 = vpop.f32.mrf.mxu3  ;;  %v2971_v52 = vpop.f32.mrf.mxu2 }
 0x20f   : > { %v7091_v5 = vadd.f32 %v2971_v52, %v2882_v38  ;;  %v5608_v52 = vld [vmem:[#allocation2 + $0x64] sm:$0xf] }
 0x210   : > { %v7093_v13 = vpop.f32.mrf.mxu1  ;;  %v5214_v14 = vor.u32 %v5608_v52, %v5211_v61 }
 0x211   : > { %v7109_v18 = vpop.f32.mrf.mxu0 }
 0x212   : > { %7689 = vst [vmem:[#allocation26_spill] sm:$0xff] %v7109_v18  ;;  %v5611_v18 = vld [vmem:[#allocation2 + $0x7c] sm:$0xf] }
 0x213   : > { %3024 = vmatmul.bf16.gmra.mxu3 %v4810_v8  ;;  %3397 = vmatmul.bf16.gmra.mxu1 %v6970_v2  ;;  %v4822_v2 = vor.u32 %v5514_v55, %v4821_v22  ;;  %v5517_v55 = vld [vmem:[#allocation2 + $0x70] sm:$0xf0]  ;;  %v5223_v22 = vld [vmem:[#allocation2 + $0x84] sm:$0xf0] }
 0x214   : > { %4142 = vmatmul.bf16.gmra.mxu0 %v5202_v3 }
 0x216   : > { %v2887_v42 = vpop.f32.mrf.mxu3  ;;  %v2973_v40 = vpop.f32.mrf.mxu2 }
 0x217   : > { %v7098_v26 = vadd.f32 %v2973_v40, %v2884_v24  ;;  %v5655_v24 = vld [vmem:[#allocation8 + $0x1a8] sm:$0xff] }
 0x218   : > { %v7100_v35 = vpop.f32.mrf.mxu1  ;;  %4042 = vmatpush.bf16.msra.mxu3 %v5655_v24 }
 0x219   : > { %v7115_v61 = vpop.f32.mrf.mxu0 }
 0x21a   : > { %7690 = vst [vmem:[#allocation27_spill] sm:$0xff] %v7115_v61 }
 0x21b   : > { %3451 = vmatmul.bf16.gmra.mxu2 %v4798_v15 }
 0x21e   : > { %v2889_v38 = vpop.f32.mrf.mxu3  ;;  %v2976_v50 = vpop.f32.mrf.mxu2 }
 0x21f   : > { %v7104_v60 = vadd.f32 %v2976_v50, %v2887_v42  ;;  %v5671_v42 = vld [vmem:[#allocation8 + $0x228] sm:$0xff] }
 0x220   : > { %v7106_v11 = vpop.f32.mrf.mxu1  ;;  %4220 = vmatpush.bf16.msra.mxu1 %v5671_v42 }
 0x221   : > { %v7126_v61 = vpop.f32.mrf.mxu0 }
 0x222   : > { %7691 = vst [vmem:[#allocation28_spill] sm:$0xff] %v7126_v61 }
 0x223   : > { %3029 = vmatmul.bf16.gmra.mxu3 %v4822_v2  ;;  %3402 = vmatmul.bf16.gmra.mxu1 %v7000_v16 }
 0x224   : > { %4147 = vmatmul.bf16.gmra.mxu0 %v5214_v14  ;;  %v4833_v14 = vld [vmem:[#allocation2 + $0x68] sm:$0xf] }
 0x225   : > { %v4834_v24 = vor.u32 %v5517_v55, %v4833_v14  ;;  %v5235_v55 = vld [vmem:[#allocation2 + $0x9c] sm:$0xf0]  ;;  %v5614_v14 = vld [vmem:[#allocation2 + $0x94] sm:$0xf] }
 0x226   : > { %v2892_v15 = vpop.f32.mrf.mxu3  ;;  %v2978_v48 = vpop.f32.mrf.mxu2 }
 0x227   : > { %v7111_v30 = vadd.f32 %v2978_v48, %v2889_v38  ;;  %v5226_v38 = vor.u32 %v5611_v18, %v5223_v22  ;;  %v4845_v22 = vld [vmem:[#allocation2 + $0x80] sm:$0xf] }
 0x228   : > { %v7113_v3 = vpop.f32.mrf.mxu1 }
 0x229   : > { %v7132_v17 = vpop.f32.mrf.mxu0 }
 0x22a   : > { %7692 = vst [vmem:[#allocation29_spill] sm:$0xff] %v7132_v17  ;;  %v4857_v17 = vld [vmem:[#allocation2 + $0x98] sm:$0xf] }
 0x22b   : > { %3456 = vmatmul.bf16.gmra.mxu2 %v4810_v8 }
 0x22e   : > { %v2894_v40 = vpop.f32.mrf.mxu3  ;;  %v2981_v50 = vpop.f32.mrf.mxu2 }
 0x22f   : > { %v7117_v16 = vadd.f32 %v2981_v50, %v2892_v15 }
 0x230   : > { %v7119_v52 = vpop.f32.mrf.mxu1 }
 0x231   : > { %v7139_v57 = vpop.f32.mrf.mxu0 }
 0x232   : > { %7693 = vst [vmem:[#allocation30_spill] sm:$0xff] %v7139_v57 }
 0x233   : > { %3034 = vmatmul.bf16.gmra.mxu3 %v4834_v24  ;;  %3407 = vmatmul.bf16.gmra.mxu1 %v7014_v29  ;;  %v4846_v29 = vor.u32 %v5520_v19, %v4845_v22  ;;  %v5523_v22 = vld [vmem:[#allocation2 + $0xa0] sm:$0xf0] }
 0x234   : > { %4152 = vmatmul.bf16.gmra.mxu0 %v5226_v38  ;;  %v5238_v38 = vor.u32 %v5614_v14, %v5235_v55 }
 0x236   : > { %v2897_v8 = vpop.f32.mrf.mxu3  ;;  %v2983_v48 = vpop.f32.mrf.mxu2 }
 0x237   : > { %v7122_v42 = vadd.f32 %v2983_v48, %v2894_v40  ;;  %v5654_v40 = vld [vmem:[#allocation8 + $0x1a0] sm:$0xff] }
 0x238   : > { %v7124_v32 = vpop.f32.mrf.mxu1  ;;  %4043 = vmatpush.bf16.msra.mxu3 %v5654_v40  ;;  %v4858_v40 = vor.u32 %v5523_v22, %v4857_v17  ;;  %v5259_v17 = vld [vmem:[#allocation2 + $0xcc] sm:$0xf0] }
 0x239   : > { %v7146_v57 = vpop.f32.mrf.mxu0 }
 0x23a   : > { %7695 = vst [vmem:[#allocation32_spill] sm:$0xff] %v7146_v57 }
 0x23b   : > { %3461 = vmatmul.bf16.gmra.mxu2 %v4822_v2 }
 0x23e   : > { %v2899_v15 = vpop.f32.mrf.mxu3  ;;  %v2986_v50 = vpop.f32.mrf.mxu2 }
 0x23f   : > { %v7128_v20 = vadd.f32 %v2986_v50, %v2897_v8  ;;  %v5670_v50 = vld [vmem:[#allocation8 + $0x220] sm:$0xff] }
 0x240   : > { %v7130_v18 = vpop.f32.mrf.mxu1  ;;  %4221 = vmatpush.bf16.msra.mxu1 %v5670_v50 }
 0x241   : > { %v7154_v22 = vpop.f32.mrf.mxu0 }
 0x242   : > { %7697 = vst [vmem:[#allocation34_spill] sm:$0xff] %v7154_v22  ;;  %v5623_v22 = vld [vmem:[#allocation2 + $0xdc] sm:$0xf] }
 0x243   : > { %3039 = vmatmul.bf16.gmra.mxu3 %v4846_v29  ;;  %3412 = vmatmul.bf16.gmra.mxu1 %v7026_v46  ;;  %v5247_v46 = vld [vmem:[#allocation2 + $0xb4] sm:$0xf0] }
 0x244   : > { %4157 = vmatmul.bf16.gmra.mxu0 %v5238_v38 }
 0x246   : > { %v2902_v2 = vpop.f32.mrf.mxu3  ;;  %v2988_v48 = vpop.f32.mrf.mxu2 }
 0x247   : > { %v7135_v61 = vadd.f32 %v2988_v48, %v2899_v15  ;;  %v5250_v15 = vor.u32 %v5617_v54, %v5247_v46  ;;  %v4869_v54 = vld [vmem:[#allocation2 + $0xb0] sm:$0xf]  ;;  %v5620_v46 = vld [vmem:[#allocation2 + $0xc4] sm:$0xf] }
 0x248   : > { %v7137_v8 = vpop.f32.mrf.mxu1 }
 0x24b   : > { %3466 = vmatmul.bf16.gmra.mxu2 %v4834_v24 }
 0x24e   : > { %v2904_v19 = vpop.f32.mrf.mxu3  ;;  %v2991_v55 = vpop.f32.mrf.mxu2 }
 0x24f   : > { %v7141_v14 = vadd.f32 %v2991_v55, %v2902_v2 }
 0x250   : > { %v7143_v38 = vpop.f32.mrf.mxu1 }
 0x251   : > { %7694 = vst [vmem:[#allocation31_spill] sm:$0xff] %v7143_v38  ;;  %v7161_v38 = vpop.f32.mrf.mxu0 }
 0x252   : > { %7699 = vst [vmem:[#allocation36_spill] sm:$0xff] %v7161_v38 }
 0x253   : > { %3044 = vmatmul.bf16.gmra.mxu3 %v4858_v40  ;;  %3417 = vmatmul.bf16.gmra.mxu1 %v7038_v0  ;;  %v4870_v0 = vor.u32 %v5526_v33, %v4869_v54  ;;  %v5667_v33 = vld [vmem:[#allocation8 + $0x208] sm:$0xff] }
 0x254   : > { %4162 = vmatmul.bf16.gmra.mxu0 %v5250_v15  ;;  %v5262_v15 = vor.u32 %v5620_v46, %v5259_v17 }
 0x256   : > { %v2907_v24 = vpop.f32.mrf.mxu3  ;;  %v2993_v48 = vpop.f32.mrf.mxu2 }
 0x257   : > { %v7148_v50 = vadd.f32 %v2993_v48, %v2904_v19  ;;  %v5653_v19 = vld [vmem:[#allocation8 + $0x198] sm:$0xff] }
 0x258   : > { %v7150_v12 = vpop.f32.mrf.mxu1  ;;  %v5669_v48 = vld [vmem:[#allocation8 + $0x218] sm:$0xff]  ;;  %4044 = vmatpush.bf16.msra.mxu3 %v5653_v19 }
 0x259   : > { %7696 = vst [vmem:[#allocation33_spill] sm:$0xff] %v7150_v12  ;;  %4222 = vmatpush.bf16.msra.mxu1 %v5669_v48  ;;  %v5271_v19 = vld [vmem:[#allocation2 + $0xe4] sm:$0xf0] }
 0x25b   : > { %3471 = vmatmul.bf16.gmra.mxu2 %v4846_v29 }
 0x25e   : > { %v2909_v2 = vpop.f32.mrf.mxu3  ;;  %v2996_v55 = vpop.f32.mrf.mxu2 }
 0x25f   : > { %v7152_v58 = vadd.f32 %v2996_v55, %v2907_v24  ;;  %v5668_v55 = vld [vmem:[#allocation8 + $0x210] sm:$0xff] }
 0x260   : > { %v7157_v57 = vpop.f32.mrf.mxu1  ;;  %4223 = vmatpush.bf16.msra.mxu1 %v5668_v55 }
 0x261   : > { %7698 = vst [vmem:[#allocation35_spill] sm:$0xff] %v7157_v57  ;;  %v4881_v57 = vld [vmem:[#allocation2 + $0xc8] sm:$0xf] }
 0x263   : > { %3049 = vmatmul.bf16.gmra.mxu3 %v4870_v0  ;;  %3422 = vmatmul.bf16.gmra.mxu1 %v7048_v51  ;;  %v5529_v51 = vld [vmem:[#allocation2 + $0xd0] sm:$0xf0] }
 0x264   : > { %4167 = vmatmul.bf16.gmra.mxu0 %v5262_v15  ;;  %4224 = vmatpush.bf16.msra.mxu1 %v5667_v33  ;;  %v4882_v48 = vor.u32 %v5529_v51, %v4881_v57  ;;  %v5532_v57 = vld [vmem:[#allocation2 + $0xe8] sm:$0xf0] }
 0x266   : > { %v2912_v29 = vpop.f32.mrf.mxu3  ;;  %v2998_v12 = vpop.f32.mrf.mxu2 }
 0x267   : > { %v7159_v24 = vadd.f32 %v2998_v12, %v2909_v2  ;;  %v5666_v12 = vld [vmem:[#allocation8 + $0x200] sm:$0xff]  ;;  %v5274_v2 = vor.u32 %v5623_v22, %v5271_v19  ;;  %v5283_v19 = vld [vmem:[#allocation2 + $0xfc] sm:$0xf0] }
 0x268   : > { %v7163_v46 = vpop.f32.mrf.mxu1  ;;  %4225 = vmatpush.bf16.msra.mxu1 %v5666_v12 }
 0x269   : > { %7700 = vst [vmem:[#allocation37_spill] sm:$0xff] %v7163_v46  ;;  %v4893_v46 = vld [vmem:[#allocation2 + $0xe0] sm:$0xf] }
 0x26a   : > { %v4894_v12 = vor.u32 %v5532_v57, %v4893_v46 }
 0x26b   : > { %3476 = vmatmul.bf16.gmra.mxu2 %v4858_v40  ;;  %v7168_v40 = vpop.f32.mrf.mxu0 }
 0x26c   : > { %7701 = vst [vmem:[#allocation38_spill] sm:$0xff] %v7168_v40 }
 0x26e   : > { %v2914_v17 = vpop.f32.mrf.mxu3  ;;  %v3001_v54 = vpop.f32.mrf.mxu2 }
 0x26f   : > { %v7165_v15 = vadd.f32 %v3001_v54, %v2912_v29 }
 0x270   : > { %v7172_v29 = vpop.f32.mrf.mxu1 }
 0x271   : > { %7702 = vst [vmem:[#allocation39_spill] sm:$0xff] %v7172_v29 }
 0x273   : > { %3054 = vmatmul.bf16.gmra.mxu3 %v4882_v48  ;;  %3427 = vmatmul.bf16.gmra.mxu1 %v7060_v39  ;;  %v7174_v51 = vpop.f32.mrf.mxu0  ;;  %v5626_v39 = vld [vmem:[#allocation2 + $0xf4] sm:$0xf] }
 0x274   : > { %4172 = vmatmul.bf16.gmra.mxu0 %v5274_v2  ;;  %7703 = vst [vmem:[#allocation40_spill] sm:$0xff] %v7174_v51  ;;  %v5286_v2 = vor.u32 %v5626_v39, %v5283_v19  ;;  %v4905_v19 = vld [vmem:[#allocation2 + $0xf8] sm:$0xf] }
 0x276   : > { %v2917_v55 = vpop.f32.mrf.mxu3  ;;  %v3003_v38 = vpop.f32.mrf.mxu2 }
 0x277   : > { %v7170_v1 = vadd.f32 %v3003_v38, %v2914_v17  ;;  %v5652_v38 = vld [vmem:[#allocation8 + $0x190] sm:$0xff] }
 0x278   : > { %v7178_v40 = vpop.f32.mrf.mxu1  ;;  %4045 = vmatpush.bf16.msra.mxu3 %v5652_v38  ;;  %v5604_v38 = vld [vmem:[#allocation2 + $0x40] sm:$0xf0] }
 0x279   : > { %7704 = vst [vmem:[#allocation41_spill] sm:$0xff] %v7178_v40 }
 0x27b   : > { %3481 = vmatmul.bf16.gmra.mxu2 %v4870_v0 }
 0x27e   : > { %v2919_v54 = vpop.f32.mrf.mxu3  ;;  %v3006_v33 = vpop.f32.mrf.mxu2 }
 0x27f   : > { %v7176_v22 = vadd.f32 %v3006_v33, %v2917_v55  ;;  %v7184_v55 = vpop.f32.mrf.mxu0 }
 0x280   : > { %7706 = vst [vmem:[#allocation43_spill] sm:$0xff] %v7184_v55  ;;  %v7187_v46 = vpop.f32.mrf.mxu1 }
 0x281   : > { %7707 = vst [vmem:[#allocation44_spill] sm:$0xff] %v7187_v46 }
 0x283   : > { %3059 = vmatmul.bf16.gmra.mxu3 %v4894_v12  ;;  %3432 = vmatmul.bf16.gmra.mxu1 %v7072_v41 }
 0x284   : > { %4177 = vmatmul.bf16.gmra.mxu0 %v5286_v2  ;;  %v5535_v2 = vld [vmem:[#allocation2 + $0x100] sm:$0xf0] }
 0x286   : > { %v3008_v0 = vpop.f32.mrf.mxu2  ;;  %v3020_v17 = vpop.f32.mrf.mxu3 }
 0x287   : > { %v7181_v29 = vadd.f32 %v3008_v0, %v2919_v54  ;;  %v3021_v51 = vadd.f32 %v3020_v17, %v7007_v43  ;;  %v5629_v0 = vld [vmem:[#allocation2 + $0x10c] sm:$0xf]  ;;  %v5295_v43 = vld [vmem:[#allocation2 + $0x114] sm:$0xf0]  ;;  %v7194_v46 = vpop.f32.mrf.mxu0 }
 0x288   : > { %v5193_v17 = vld [vmem:[#allocation2 + $0x38] sm:$0xf]  ;;  %7708 = vst [vmem:[#allocation45_spill] sm:$0xff] %v7194_v46 }
 0x289   : > { %7705 = vst [vmem:[#allocation42_spill] sm:$0xff] %v7181_v29  ;;  %v3270_v33 = vadd.f32 %v6943_v34, %v3021_v51  ;;  %v4906_v34 = vor.u32 %v5535_v2, %v4905_v19  ;;  %v5298_v51 = vor.u32 %v5629_v0, %v5295_v43  ;;  %v5538_v0 = vld [vmem:[#allocation2 + $0x118] sm:$0xf0] }
 0x28b   : > { %3486 = vmatmul.bf16.gmra.mxu2 %v4882_v48  ;;  %v3359_v57 = vadd.f32 %v7093_v13, %v3270_v33  ;;  %v5194_v48 = vor.u32 %v5604_v38, %v5193_v17  ;;  %v4917_v38 = vld [vmem:[#allocation2 + $0x110] sm:$0xf]  ;;  %v5632_v17 = vld [vmem:[#allocation2 + $0x124] sm:$0xf] }
 0x28e   : > { %v3022_v39 = vpop.f32.mrf.mxu3  ;;  %v3447_v41 = vpop.f32.mrf.mxu2 }
 0x28f   : > { %v3023_v40 = vadd.f32 %v3022_v39, %v7011_v36  ;;  %v7191_v54 = vadd.f32 %v3447_v41, %v3359_v57  ;;  %v7197_v36 = vpop.f32.mrf.mxu1 }
 0x291   : > { %v3272_v55 = vadd.f32 %v6976_v27, %v3023_v40  ;;  %v7203_v40 = vpop.f32.mrf.mxu0 }
 0x292   : > { %7709 = vst [vmem:[#allocation46_spill] sm:$0xff] %v7203_v40  ;;  %v5625_v40 = vld [vmem:[#allocation2 + $0xe8] sm:$0xf0] }
 0x293   : > { %3064 = vmatmul.bf16.gmra.mxu3 %v4906_v34  ;;  %4226 = vmatmul.bf16.vlgmr.msra.gmra.mxu1 %v5194_v48  ;;  %v3361_v13 = vadd.f32 %v7100_v35, %v3272_v55  ;;  %v5607_v35 = vld [vmem:[#allocation2 + $0x58] sm:$0xf0] }
 0x294   : > { %4182 = vmatmul.bf16.gmra.mxu0 %v5298_v51 }
 0x296   : > { %v3025_v33 = vpop.f32.mrf.mxu3  ;;  %v3449_v29 = vpop.f32.mrf.mxu2 }
 0x297   : > { %v3026_v57 = vadd.f32 %v3025_v33, %v7019_v49  ;;  %v7200_v39 = vadd.f32 %v3449_v29, %v3361_v13  ;;  %v5307_v49 = vld [vmem:[#allocation2 + $0x12c] sm:$0xf0]  ;;  %v7209_v48 = vpop.f32.mrf.mxu1 }
 0x298   : > { %v5205_v29 = vld [vmem:[#allocation2 + $0x50] sm:$0xf]  ;;  %v5310_v13 = vor.u32 %v5632_v17, %v5307_v49  ;;  %v5610_v17 = vld [vmem:[#allocation2 + $0x70] sm:$0xf0] }
 0x299   : > { %v3275_v27 = vadd.f32 %v6994_v63, %v3026_v57  ;;  %v5206_v51 = vor.u32 %v5607_v35, %v5205_v29 }
 0x29b   : > { %3491 = vmatmul.bf16.gmra.mxu2 %v4894_v12  ;;  %v3364_v41 = vadd.f32 %v7106_v11, %v3275_v27  ;;  %v4918_v12 = vor.u32 %v5538_v0, %v4917_v38  ;;  %v5651_v11 = vld [vmem:[#allocation8 + $0x188] sm:$0xff]  ;;  %v7213_v27 = vpop.f32.mrf.mxu0 }
 0x29c   : > { %4046 = vmatpush.bf16.msra.mxu3 %v5651_v11  ;;  %7710 = vst [vmem:[#allocation47_spill] sm:$0xff] %v7213_v27  ;;  %v5622_v27 = vld [vmem:[#allocation2 + $0xd0] sm:$0xf0] }
 0x29e   : > { %v3027_v19 = vpop.f32.mrf.mxu3  ;;  %v3452_v2 = vpop.f32.mrf.mxu2 }
 0x29f   : > { %v3028_v55 = vadd.f32 %v3027_v19, %v7022_v62  ;;  %v7207_v43 = vadd.f32 %v3452_v2, %v3364_v41  ;;  %v7219_v2 = vpop.f32.mrf.mxu1 }
 0x2a1   : > { %v3277_v63 = vadd.f32 %v7009_v59, %v3028_v55  ;;  %v4929_v55 = vld [vmem:[#allocation2 + $0x128] sm:$0xf] }
 0x2a3   : > { %3069 = vmatmul.bf16.gmra.mxu3 %v4918_v12  ;;  %4231 = vmatmul.bf16.gmra.mxu1 %v5206_v51  ;;  %v3366_v33 = vadd.f32 %v7113_v3, %v3277_v63  ;;  %v5541_v3 = vld [vmem:[#allocation2 + $0x130] sm:$0xf0]  ;;  %v5635_v63 = vld [vmem:[#allocation2 + $0x13c] sm:$0xf]  ;;  %v5217_v51 = vld [vmem:[#allocation2 + $0x68] sm:$0xf] }
 0x2a4   : > { %4187 = vmatmul.bf16.gmra.mxu0 %v5310_v13  ;;  %v7225_v13 = vpop.f32.mrf.mxu0  ;;  %v4930_v11 = vor.u32 %v5541_v3, %v4929_v55  ;;  %v4941_v3 = vld [vmem:[#allocation2 + $0x140] sm:$0xf] }
 0x2a6   : > { %v3030_v62 = vpop.f32.mrf.mxu3  ;;  %v3454_v57 = vpop.f32.mrf.mxu2 }
 0x2a7   : > { %v3031_v41 = vadd.f32 %v3030_v62, %v7029_v25  ;;  %v7216_v19 = vadd.f32 %v3454_v57, %v3366_v33  ;;  %v5319_v25 = vld [vmem:[#allocation2 + $0x144] sm:$0xf0] }
 0x2a8   : > { %v5322_v33 = vor.u32 %v5635_v63, %v5319_v25 }
 0x2a9   : > { %v3280_v59 = vadd.f32 %v7016_v6, %v3031_v41 }
 0x2ab   : > { %3496 = vmatmul.bf16.gmra.mxu2 %v4906_v34  ;;  %v3369_v38 = vadd.f32 %v7119_v52, %v3280_v59  ;;  %v5218_v34 = vor.u32 %v5610_v17, %v5217_v51  ;;  %v7228_v52 = vpop.f32.mrf.mxu1  ;;  %v5544_v17 = vld [vmem:[#allocation2 + $0x148] sm:$0xf0]  ;;  %v5331_v51 = vld [vmem:[#allocation2 + $0x15c] sm:$0xf0] }
 0x2ae   : > { %v3032_v0 = vpop.f32.mrf.mxu3  ;;  %v3457_v35 = vpop.f32.mrf.mxu2 }
 0x2af   : > { %v3033_v49 = vadd.f32 %v3032_v0, %v7034_v56  ;;  %v7223_v29 = vadd.f32 %v3457_v35, %v3369_v38  ;;  %v7235_v0 = vpop.f32.mrf.mxu0 }
 0x2b1   : > { %v3282_v6 = vadd.f32 %v7024_v47, %v3033_v49  ;;  %v5613_v49 = vld [vmem:[#allocation2 + $0x88] sm:$0xf0] }
 0x2b3   : > { %3074 = vmatmul.bf16.gmra.mxu3 %v4930_v11  ;;  %4236 = vmatmul.bf16.gmra.mxu1 %v5218_v34  ;;  %v3371_v62 = vadd.f32 %v7124_v32, %v3282_v6  ;;  %v7238_v63 = vpop.f32.mrf.mxu1  ;;  %v5229_v6 = vld [vmem:[#allocation2 + $0x80] sm:$0xf]  ;;  %v4942_v34 = vor.u32 %v5544_v17, %v4941_v3  ;;  %v5616_v3 = vld [vmem:[#allocation2 + $0xa0] sm:$0xf0] }
 0x2b4   : > { %4192 = vmatmul.bf16.gmra.mxu0 %v5322_v33 }
 0x2b6   : > { %v3035_v56 = vpop.f32.mrf.mxu3  ;;  %v3459_v57 = vpop.f32.mrf.mxu2 }
 0x2b7   : > { %v3036_v41 = vadd.f32 %v3035_v56, %v7041_v10  ;;  %v7232_v59 = vadd.f32 %v3459_v57, %v3371_v62  ;;  %v5638_v10 = vld [vmem:[#allocation2 + $0x154] sm:$0xf]  ;;  %v7244_v62 = vpop.f32.mrf.mxu0 }
 0x2b8   : > { %v5334_v33 = vor.u32 %v5638_v10, %v5331_v51  ;;  %v5241_v10 = vld [vmem:[#allocation2 + $0x98] sm:$0xf] }
 0x2b9   : > { %v3285_v38 = vadd.f32 %v7031_v7, %v3036_v41 }
 0x2bb   : > { %3501 = vmatmul.bf16.gmra.mxu2 %v4918_v12  ;;  %v3374_v47 = vadd.f32 %v7130_v18, %v3285_v38  ;;  %v5230_v12 = vor.u32 %v5613_v49, %v5229_v6  ;;  %v5650_v18 = vld [vmem:[#allocation8 + $0x180] sm:$0xff]  ;;  %v5641_v49 = vld [vmem:[#allocation2 + $0x16c] sm:$0xf] }
 0x2bc   : > { %4047 = vmatpush.bf16.msra.mxu3 %v5650_v18 }
 0x2be   : > { %v3037_v35 = vpop.f32.mrf.mxu3  ;;  %v3462_v55 = vpop.f32.mrf.mxu2 }
 0x2bf   : > { %v3038_v32 = vadd.f32 %v3037_v35, %v7046_v53  ;;  %v7241_v25 = vadd.f32 %v3462_v55, %v3374_v47  ;;  %v4953_v35 = vld [vmem:[#allocation2 + $0x158] sm:$0xf]  ;;  %v5547_v55 = vld [vmem:[#allocation2 + $0x160] sm:$0xf0] }
 0x2c0   : > { %v4954_v51 = vor.u32 %v5547_v55, %v4953_v35  ;;  %v5644_v35 = vld [vmem:[#allocation2 + $0x184] sm:$0xf]  ;;  %v5355_v55 = vld [vmem:[#allocation2 + $0x18c] sm:$0xf0] }
 0x2c1   : > { %v3287_v7 = vadd.f32 %v7036_v28, %v3038_v32  ;;  %v7252_v28 = vpop.f32.mrf.mxu1  ;;  %v7257_v32 = vpop.f32.mrf.mxu0 }
 0x2c3   : > { %3079 = vmatmul.bf16.gmra.mxu3 %v4942_v34  ;;  %4241 = vmatmul.bf16.gmra.mxu1 %v5230_v12  ;;  %v3376_v56 = vadd.f32 %v7137_v8, %v3287_v7  ;;  %v5343_v8 = vld [vmem:[#allocation2 + $0x174] sm:$0xf0] }
 0x2c4   : > { %4197 = vmatmul.bf16.gmra.mxu0 %v5334_v33  ;;  %v5346_v6 = vor.u32 %v5641_v49, %v5343_v8 }
 0x2c6   : > { %v3040_v53 = vpop.f32.mrf.mxu3  ;;  %v3464_v57 = vpop.f32.mrf.mxu2 }
 0x2c7   : > { %v7248_v41 = vadd.f32 %v3040_v53, %v7053_v44  ;;  %v7250_v38 = vadd.f32 %v3464_v57, %v3376_v56  ;;  %v5242_v44 = vor.u32 %v5616_v3, %v5241_v10  ;;  %v4965_v56 = vld [vmem:[#allocation2 + $0x170] sm:$0xf]  ;;  %v5550_v53 = vld [vmem:[#allocation2 + $0x178] sm:$0xf0]  ;;  %v5358_v10 = vor.u32 %v5644_v35, %v5355_v55 }
 0x2c8   : > { %v5619_v57 = vld [vmem:[#allocation2 + $0xb8] sm:$0xf0]  ;;  %v5253_v3 = vld [vmem:[#allocation2 + $0xb0] sm:$0xf]  ;;  %v4966_v49 = vor.u32 %v5550_v53, %v4965_v56  ;;  %v5265_v53 = vld [vmem:[#allocation2 + $0xc8] sm:$0xf] }
 0x2c9   : > { %v7259_v7 = vpop.f32.mrf.mxu1  ;;  %v7264_v33 = vpop.f32.mrf.mxu0  ;;  %v5254_v8 = vor.u32 %v5619_v57, %v5253_v3  ;;  %v5266_v55 = vor.u32 %v5622_v27, %v5265_v53 }
 0x2cb   : > { %3506 = vmatmul.bf16.gmra.mxu2 %v4930_v11 }
 0x2ce   : > { %v3042_v47 = vpop.f32.mrf.mxu3 }
 0x2cf   : > { %v7255_v17 = vadd.f32 %v3042_v47, %v7056_v31 }
 0x2d1   : > { %v7266_v31 = vpop.f32.mrf.mxu1 }
 0x2d3   : > { %3084 = vmatmul.bf16.gmra.mxu3 %v4954_v51  ;;  %4246 = vmatmul.bf16.gmra.mxu1 %v5242_v44 }
 0x2d4   : > { %4202 = vmatmul.bf16.gmra.mxu0 %v5346_v6 }
 0x2d6   : > { %v3045_v11 = vpop.f32.mrf.mxu3 }
 0x2d7   : > { %v7262_v12 = vadd.f32 %v3045_v11, %v7063_v23  ;;  %v7271_v23 = vpop.f32.mrf.mxu0  ;;  %v4977_v11 = vld [vmem:[#allocation2 + $0x188] sm:$0xf] }
 0x2d9   : > { %v7273_v44 = vpop.f32.mrf.mxu1 }
 0x2db   : > { %3511 = vmatmul.bf16.gmra.mxu2 %v4942_v34 }
 0x2de   : > { %v3047_v18 = vpop.f32.mrf.mxu3 }
 0x2df   : > { %v7269_v47 = vadd.f32 %v3047_v18, %v7068_v9  ;;  %v5577_v18 = vld [vmem:[#allocation2 + $0x190] sm:$0xf0] }
 0x2e0   : > { %v4978_v35 = vor.u32 %v5577_v18, %v4977_v11 }
 0x2e1   : > { %v7281_v57 = vpop.f32.mrf.mxu1 }
 0x2e2   : > { %7711 = vst [vmem:[#allocation48_spill] sm:$0xff] %v7281_v57 }
 0x2e3   : > { %3089 = vmatmul.bf16.gmra.mxu3 %v4966_v49  ;;  %4251 = vmatmul.bf16.gmra.mxu1 %v5254_v8 }
 0x2e4   : > { %4207 = vmatmul.bf16.gmra.mxu0 %v5358_v10  ;;  %v5603_v10 = vld [vmem:[#allocation2 + $0x38] sm:$0xf0] }
 0x2e6   : > { %v3050_v34 = vpop.f32.mrf.mxu3 }
 0x2e7   : > { %v7276_v6 = vadd.f32 %v3050_v34, %v7075_v37  ;;  %v5277_v34 = vld [vmem:[#allocation2 + $0xe0] sm:$0xf] }
 0x2e8   : > { %v5278_v11 = vor.u32 %v5625_v40, %v5277_v34 }
 0x2e9   : > { %v7286_v37 = vpop.f32.mrf.mxu1 }
 0x2ea   : > { %7712 = vst [vmem:[#allocation49_spill] sm:$0xff] %v7286_v37 }
 0x2eb   : > { %3516 = vmatmul.bf16.gmra.mxu2 %v4954_v51 }
 0x2ee   : > { %v3052_v9 = vpop.f32.mrf.mxu3 }
 0x2ef   : > { %v7279_v56 = vadd.f32 %v3052_v9, %v7080_v45  ;;  %v5185_v9 = vld [vmem:[#allocation2 + $0x30] sm:$0xf] }
 0x2f0   : > { %v5186_v46 = vor.u32 %v5603_v10, %v5185_v9 }
 0x2f1   : > { %v7291_v27 = vpop.f32.mrf.mxu1 }
 0x2f2   : > { %7713 = vst [vmem:[#allocation50_spill] sm:$0xff] %v7291_v27  ;;  %v5631_v27 = vld [vmem:[#allocation2 + $0x118] sm:$0xf0] }
 0x2f3   : > { %3094 = vmatmul.bf16.gmra.mxu3 %v4978_v35  ;;  %4256 = vmatmul.bf16.gmra.mxu1 %v5266_v55  ;;  %v5289_v35 = vld [vmem:[#allocation2 + $0xf8] sm:$0xf]  ;;  %v5628_v55 = vld [vmem:[#allocation2 + $0x100] sm:$0xf0] }
 0x2f4   : > { %v5290_v40 = vor.u32 %v5628_v55, %v5289_v35 }
 0x2f6   : > { %v3055_v3 = vpop.f32.mrf.mxu3 }
 0x2f7   : > { %v7284_v8 = vadd.f32 %v3055_v3, %v7084_v4 }
 0x2f9   : > { %v7296_v3 = vpop.f32.mrf.mxu1 }
 0x2fa   : > { %7714 = vst [vmem:[#allocation51_spill] sm:$0xff] %v7296_v3 }
 0x2fb   : > { %3521 = vmatmul.bf16.gmra.mxu2 %v4966_v49  ;;  %v5606_v49 = vld [vmem:[#allocation2 + $0x50] sm:$0xf0] }
 0x2fe   : > { %v3057_v51 = vpop.f32.mrf.mxu3 }
 0x2ff   : > { %v7289_v45 = vadd.f32 %v3057_v51, %v7089_v21  ;;  %v5197_v51 = vld [vmem:[#allocation2 + $0x48] sm:$0xf] }
 0x300   : > { %v5198_v10 = vor.u32 %v5606_v49, %v5197_v51 }
 0x303   : > { %4048 = vmatmul.bf16.vlgmr.msra.gmra.mxu3 %v5186_v46  ;;  %4261 = vmatmul.bf16.gmra.mxu1 %v5278_v11  ;;  %v5609_v11 = vld [vmem:[#allocation2 + $0x68] sm:$0xf0] }
 0x306   : > { %v3060_v18 = vpop.f32.mrf.mxu3 }
 0x307   : > { %v7294_v4 = vadd.f32 %v3060_v18, %v7091_v5  ;;  %v7304_v5 = vpop.f32.mrf.mxu1  ;;  %v5301_v18 = vld [vmem:[#allocation2 + $0x110] sm:$0xf] }
 0x308   : > { %7715 = vst [vmem:[#allocation52_spill] sm:$0xff] %v7304_v5  ;;  %v5302_v37 = vor.u32 %v5631_v27, %v5301_v18 }
 0x30e   : > { %v3062_v53 = vpop.f32.mrf.mxu3 }
 0x30f   : > { %v7299_v21 = vadd.f32 %v3062_v53, %v7098_v26  ;;  %v5209_v26 = vld [vmem:[#allocation2 + $0x60] sm:$0xf]  ;;  %v7309_v49 = vpop.f32.mrf.mxu1 }
 0x310   : > { %v5210_v53 = vor.u32 %v5609_v11, %v5209_v26  ;;  %7716 = vst [vmem:[#allocation53_spill] sm:$0xff] %v7309_v49 }
 0x313   : > { %4053 = vmatmul.bf16.gmra.mxu3 %v5198_v10  ;;  %4266 = vmatmul.bf16.gmra.mxu1 %v5290_v40  ;;  %v5612_v10 = vld [vmem:[#allocation2 + $0x80] sm:$0xf0]  ;;  %v5313_v40 = vld [vmem:[#allocation2 + $0x128] sm:$0xf] }
 0x316   : > { %v3065_v46 = vpop.f32.mrf.mxu3 }
 0x317   : > { %v7302_v34 = vadd.f32 %v3065_v46, %v7104_v60  ;;  %v7314_v55 = vpop.f32.mrf.mxu1  ;;  %v5634_v46 = vld [vmem:[#allocation2 + $0x130] sm:$0xf0] }
 0x318   : > { %7717 = vst [vmem:[#allocation54_spill] sm:$0xff] %v7314_v55  ;;  %v5314_v27 = vor.u32 %v5634_v46, %v5313_v40  ;;  %v5637_v55 = vld [vmem:[#allocation2 + $0x148] sm:$0xf0] }
 0x31e   : > { %v3067_v9 = vpop.f32.mrf.mxu3 }
 0x31f   : > { %v7307_v3 = vadd.f32 %v3067_v9, %v7111_v30  ;;  %v5221_v9 = vld [vmem:[#allocation2 + $0x78] sm:$0xf] }
 0x320   : > { %v5222_v11 = vor.u32 %v5612_v10, %v5221_v9 }
 0x323   : > { %4058 = vmatmul.bf16.gmra.mxu3 %v5210_v53  ;;  %4271 = vmatmul.bf16.gmra.mxu1 %v5302_v37  ;;  %v7319_v37 = vpop.f32.mrf.mxu1  ;;  %v5615_v53 = vld [vmem:[#allocation2 + $0x98] sm:$0xf0] }
 0x324   : > { %7718 = vst [vmem:[#allocation55_spill] sm:$0xff] %v7319_v37 }
 0x326   : > { %v3070_v35 = vpop.f32.mrf.mxu3 }
 0x327   : > { %v7312_v60 = vadd.f32 %v3070_v35, %v7117_v16  ;;  %v5325_v35 = vld [vmem:[#allocation2 + $0x140] sm:$0xf] }
 0x328   : > { %v5326_v10 = vor.u32 %v5637_v55, %v5325_v35  ;;  %v5621_v35 = vld [vmem:[#allocation2 + $0xc8] sm:$0xf0] }
 0x32e   : > { %v3072_v51 = vpop.f32.mrf.mxu3 }
 0x32f   : > { %v7317_v30 = vadd.f32 %v3072_v51, %v7122_v42  ;;  %v5233_v42 = vld [vmem:[#allocation2 + $0x90] sm:$0xf]  ;;  %v4227_v51 = vpop.f32.mrf.mxu1 }
 0x330   : > { %v5234_v5 = vor.u32 %v5615_v53, %v5233_v42  ;;  %v5349_v42 = vld [vmem:[#allocation2 + $0x170] sm:$0xf] }
 0x333   : > { %4063 = vmatmul.bf16.gmra.mxu3 %v5222_v11  ;;  %4276 = vmatmul.bf16.gmra.mxu1 %v5314_v27  ;;  %v5618_v11 = vld [vmem:[#allocation2 + $0xb0] sm:$0xf0]  ;;  %v5337_v27 = vld [vmem:[#allocation2 + $0x158] sm:$0xf] }
 0x336   : > { %v3075_v18 = vpop.f32.mrf.mxu3 }
 0x337   : > { %v7322_v16 = vadd.f32 %v3075_v18, %v7128_v20  ;;  %v4229_v9 = vpop.f32.mrf.mxu1  ;;  %v5640_v18 = vld [vmem:[#allocation2 + $0x160] sm:$0xf0] }
 0x338   : > { %v5338_v57 = vor.u32 %v5640_v18, %v5337_v27 }
 0x33e   : > { %v3077_v26 = vpop.f32.mrf.mxu3 }
 0x33f   : > { %v7325_v49 = vadd.f32 %v3077_v26, %v7135_v61  ;;  %v5245_v61 = vld [vmem:[#allocation2 + $0xa8] sm:$0xf]  ;;  %v4232_v55 = vpop.f32.mrf.mxu1 }
 0x340   : > { %v5246_v26 = vor.u32 %v5618_v11, %v5245_v61  ;;  %v5269_v61 = vld [vmem:[#allocation2 + $0xd8] sm:$0xf] }
 0x343   : > { %4068 = vmatmul.bf16.gmra.mxu3 %v5234_v5  ;;  %4281 = vmatmul.bf16.gmra.mxu1 %v5326_v10  ;;  %v5643_v10 = vld [vmem:[#allocation2 + $0x178] sm:$0xf0] }
 0x344   : > { %v5350_v11 = vor.u32 %v5643_v10, %v5349_v42 }
 0x346   : > { %v3080_v40 = vpop.f32.mrf.mxu3 }
 0x347   : > { %v7328_v46 = vadd.f32 %v3080_v40, %v7141_v14  ;;  %v7336_v40 = vpop.f32.mrf.mxu1 }
 0x349   : > { %7719 = vst [vmem:[#allocation56_spill] sm:$0xff] %v7328_v46 }
 0x34e   : > { %v3082_v20 = vpop.f32.mrf.mxu3 }
 0x34f   : > { %v7331_v37 = vadd.f32 %v3082_v20, %v7148_v50  ;;  %v5257_v50 = vld [vmem:[#allocation2 + $0xc0] sm:$0xf] }
 0x350   : > { %v5258_v20 = vor.u32 %v5621_v35, %v5257_v50  ;;  %v5281_v50 = vld [vmem:[#allocation2 + $0xf0] sm:$0xf] }
 0x353   : > { %4073 = vmatmul.bf16.gmra.mxu3 %v5246_v26  ;;  %4286 = vmatmul.bf16.gmra.mxu1 %v5338_v57  ;;  %v5361_v26 = vld [vmem:[#allocation2 + $0x188] sm:$0xf] }
 0x356   : > { %v3085_v5 = vpop.f32.mrf.mxu3 }
 0x357   : > { %v7334_v53 = vadd.f32 %v3085_v5, %v7152_v58  ;;  %v7344_v58 = vpop.f32.mrf.mxu1  ;;  %v5646_v5 = vld [vmem:[#allocation2 + $0x190] sm:$0xf0] }
 0x359   : > { %7720 = vst [vmem:[#allocation57_spill] sm:$0xff] %v7334_v53 }
 0x35e   : > { %v3087_v14 = vpop.f32.mrf.mxu3 }
 0x35f   : > { %v7339_v46 = vadd.f32 %v3087_v14, %v7159_v24  ;;  %v5624_v24 = vld [vmem:[#allocation2 + $0xe0] sm:$0xf0]  ;;  %v7349_v35 = vpop.f32.mrf.mxu1 }
 0x360   : > { %v5270_v14 = vor.u32 %v5624_v24, %v5269_v61  ;;  %v5293_v24 = vld [vmem:[#allocation2 + $0x108] sm:$0xf] }
 0x361   : > { %7721 = vst [vmem:[#allocation58_spill] sm:$0xff] %v7339_v46  ;;  %v5362_v46 = vor.u32 %v5646_v5, %v5361_v26 }
 0x363   : > { %4078 = vmatmul.bf16.gmra.mxu3 %v5258_v20  ;;  %4291 = vmatmul.bf16.gmra.mxu1 %v5350_v11  ;;  %v5627_v20 = vld [vmem:[#allocation2 + $0xf8] sm:$0xf0]  ;;  %v7724_v11 = vld [vmem:[#allocation42_spill] sm:$0xff] }
 0x366   : > { %v3090_v57 = vpop.f32.mrf.mxu3 }
 0x367   : > { %v7342_v27 = vadd.f32 %v3090_v57, %v7165_v15  ;;  %v7360_v26 = vpop.f32.mrf.mxu1 }
 0x369   : > { %7722 = vst [vmem:[#allocation59_spill] sm:$0xff] %v7342_v27  ;;  %v5282_v27 = vor.u32 %v5627_v20, %v5281_v50 }
 0x36e   : > { %v3092_v18 = vpop.f32.mrf.mxu3 }
 0x36f   : > { %v7347_v53 = vadd.f32 %v3092_v18, %v7170_v1  ;;  %v7357_v1 = vpop.f32.mrf.mxu0  ;;  %v7371_v20 = vpop.f32.mrf.mxu1 }
 0x373   : > { %4083 = vmatmul.bf16.gmra.mxu3 %v5270_v14  ;;  %4296 = vmatmul.bf16.gmra.mxu1 %v5362_v46  ;;  %v5630_v14 = vld [vmem:[#allocation2 + $0x110] sm:$0xf0] }
 0x376   : > { %v3095_v42 = vpop.f32.mrf.mxu3 }
 0x377   : > { %v7352_v15 = vadd.f32 %v3095_v42, %v7176_v22  ;;  %v7366_v42 = vld [vmem:[%s7635_s4] ss:$0 sm:$0xff] }
 0x379   : > { %7723 = vst [vmem:[#allocation60_spill] sm:$0xff] %v7352_v15 }
 0x37e   : > { %v3097_v10 = vpop.f32.mrf.mxu3 }
 0x37f   : > { %v7355_v57 = vadd.f32 %v3097_v10, %v7724_v11  ;;  %v7369_v10 = vpop.f32.mrf.mxu0 }
 0x381   : > { %7725 = vst [vmem:[#allocation42_spill] sm:$0xff] %v7355_v57 }
 0x383   : > { %4088 = vmatmul.bf16.gmra.mxu3 %v5282_v27 }
 0x386   : > { %v4049_v18 = vpop.f32.mrf.mxu3 }
 0x387   : > { %v4139_v61 = vadd.f32 %v7225_v13, %v4049_v18  ;;  %v5294_v13 = vor.u32 %v5630_v14, %v5293_v24  ;;  %v7379_v24 = vpop.f32.mrf.mxu0 }
 0x389   : > { %v4228_v46 = vadd.f32 %v4227_v51, %v4139_v61  ;;  %v7376_v61 = vpop.f32.mrf.mxu2 }
 0x38b   : > { %v4307_v5 = vadd.f32 %v4228_v46, %v7191_v54 }
 0x38d   : > { %v4343_v51 = vadd.f32 %v7366_v42, %v4307_v5  ;;  %v7387_v5 = vpop.f32.mrf.mxu1 }
 0x38e   : > { %v4051_v22 = vpop.f32.mrf.mxu3 }
 0x38f   : > { %v4141_v27 = vadd.f32 %v7235_v0, %v4051_v22  ;;  %v4375_v46 = vmax.f32 %v4343_v51, 0.0  ;;  %v5633_v51 = vld [vmem:[#allocation2 + $0x128] sm:$0xf0] }
 0x391   : > { %v4230_v50 = vadd.f32 %v4229_v9, %v4141_v27 }
 0x393   : > { %v4308_v54 = vadd.f32 %v4230_v50, %v7200_v39  ;;  %4093 = vmatmul.bf16.gmra.mxu3 %v5294_v13  ;;  %v5305_v13 = vld [vmem:[#allocation2 + $0x120] sm:$0xf] }
 0x395   : > { %v4344_v11 = vadd.f32 %v7366_v42, %v4308_v54 }
 0x396   : > { %v4054_v18 = vpop.f32.mrf.mxu3 }
 0x397   : > { %v4376_v57 = vmax.f32 %v4344_v11, 0.0  ;;  %v4144_v0 = vadd.f32 %v7244_v62, %v4054_v18  ;;  %v5306_v18 = vor.u32 %v5633_v51, %v5305_v13 }
 0x399   : > { %v5678_v22 = vpack.c.bf16 %v4376_v57, %v4375_v46  ;;  %v4471_v9 = vadd.f32 %v4376_v57, %v4375_v46  ;;  %v4233_v27 = vadd.f32 %v4232_v55, %v4144_v0  ;;  %v7391_v55 = vpop.f32.mrf.mxu2 }
 0x39b   : > { %5679 = vst [vmem:[%s7383_s10] sm:$0xff] %v5678_v22   ;;  %v4309_v39 = vadd.f32 %v4233_v27, %v7207_v43  ;;  %v7395_v43 = vpop.f32.mrf.mxu0  ;;  %v7398_v22 = vpop.f32.mrf.mxu1 }
 0x39d   : > { %v4345_v14 = vadd.f32 %v7366_v42, %v4309_v39 }
 0x39e   : > { %v4056_v50 = vpop.f32.mrf.mxu3 }
 0x39f   : > { %v4377_v62 = vmax.f32 %v4345_v14, 0.0  ;;  %v4146_v57 = vadd.f32 %v7257_v32, %v4056_v50 }
 0x3a1   : > { %v4472_v54 = vadd.f32 %v4471_v9, %v4377_v62  ;;  %v4235_v11 = vadd.f32 %v7336_v40, %v4146_v57  ;;  %v7402_v15 = vpop.f32.mrf.mxu2  ;;  %v5317_v57 = vld [vmem:[#allocation2 + $0x138] sm:$0xf] }
 0x3a3   : > { %v4310_v46 = vadd.f32 %v4235_v11, %v7216_v19  ;;  %4098 = vmatmul.bf16.gmra.mxu3 %v5306_v18  ;;  %v7407_v13 = vpop.f32.mrf.mxu0  ;;  %v5636_v11 = vld [vmem:[#allocation2 + $0x140] sm:$0xf0] }
 0x3a5   : > { %v4346_v0 = vadd.f32 %v7366_v42, %v4310_v46 }
 0x3a6   : > { %v4059_v27 = vpop.f32.mrf.mxu3 }
 0x3a7   : > { %v4378_v39 = vmax.f32 %v4346_v0, 0.0  ;;  %v4149_v32 = vadd.f32 %v7264_v33, %v4059_v27  ;;  %v7410_v33 = vpop.f32.mrf.mxu1 }
 0x3a9   : > { %v5683_v14 = vpack.c.bf16 %v4378_v39, %v4377_v62  ;;  %v4473_v50 = vadd.f32 %v4472_v54, %v4378_v39  ;;  %v4238_v9 = vadd.f32 %v7344_v58, %v4149_v32  ;;  %v5318_v54 = vor.u32 %v5636_v11, %v5317_v57  ;;  %v5329_v57 = vld [vmem:[#allocation2 + $0x150] sm:$0xf]  ;;  %v5639_v11 = vld [vmem:[#allocation2 + $0x158] sm:$0xf0] }
 0x3ab   : > { %5755 = vst [vmem:[%s7383_s10 + $0x8] sm:$0xff] %v5683_v14   ;;  %v4311_v19 = vadd.f32 %v4238_v9, %v7223_v29  ;;  %v7414_v29 = vpop.f32.mrf.mxu2  ;;  %v7418_v9 = vpop.f32.mrf.mxu0 }
 0x3ad   : > { %v4347_v40 = vadd.f32 %v7366_v42, %v4311_v19 }
 0x3ae   : > { %v4061_v51 = vpop.f32.mrf.mxu3 }
 0x3af   : > { %v4379_v18 = vmax.f32 %v4347_v40, 0.0  ;;  %v4151_v46 = vadd.f32 %v7271_v23, %v4061_v51  ;;  %v7421_v40 = vpop.f32.mrf.mxu1 }
 0x3b1   : > { %v4474_v62 = vadd.f32 %v4473_v50, %v4379_v18  ;;  %v4240_v58 = vadd.f32 %v7349_v35, %v4151_v46 }
 0x3b3   : > { %v4312_v0 = vadd.f32 %v4240_v58, %v7232_v59  ;;  %4103 = vmatmul.bf16.gmra.mxu3 %v5318_v54  ;;  %v7426_v46 = vpop.f32.mrf.mxu2 }
 0x3b5   : > { %v4348_v27 = vadd.f32 %v7366_v42, %v4312_v0  ;;  %v7726_v0 = vld [vmem:[#allocation16_spill] sm:$0xff] }
 0x3b6   : > { %v4064_v39 = vpop.f32.mrf.mxu3 }
 0x3b7   : > { %v4380_v32 = vmax.f32 %v4348_v27, 0.0  ;;  %v4154_v14 = vadd.f32 %v7357_v1, %v4064_v39  ;;  %v7435_v39 = vpop.f32.mrf.mxu1 }
 0x3b9   : > { %v5688_v23 = vpack.c.bf16 %v4380_v32, %v4379_v18  ;;  %v4475_v19 = vadd.f32 %v4474_v62, %v4380_v32  ;;  %v4243_v50 = vadd.f32 %v7360_v26, %v4154_v14  ;;  %v5330_v62 = vor.u32 %v5639_v11, %v5329_v57  ;;  %v7430_v26 = vpop.f32.mrf.mxu0 }
 0x3bb   : > { %5756 = vst [vmem:[%s7383_s10 + $0x10] sm:$0xff] %v5688_v23   ;;  %v4313_v59 = vadd.f32 %v4243_v50, %v7241_v25  ;;  %v3290_v25 = vadd.f32 %v7726_v0, %v7248_v41  ;;  %v7727_v23 = vld [vmem:[#allocation31_spill] sm:$0xff]  ;;  %v5341_v0 = vld [vmem:[#allocation2 + $0x168] sm:$0xf] }
 0x3bd   : > { %v4349_v35 = vadd.f32 %v7366_v42, %v4313_v59  ;;  %v7441_v59 = vpop.f32.mrf.mxu2 }
 0x3be   : > { %v4066_v51 = vpop.f32.mrf.mxu3 }
 0x3bf   : > { %v4381_v58 = vmax.f32 %v4349_v35, 0.0  ;;  %v4156_v1 = vadd.f32 %v7369_v10, %v4066_v51  ;;  %v3379_v10 = vadd.f32 %v7727_v23, %v3290_v25  ;;  %v7729_v25 = vld [vmem:[#allocation33_spill] sm:$0xff]  ;;  %v7730_v23 = vld [vmem:[#allocation18_spill] sm:$0xff] }
 0x3c1   : > { %v4476_v54 = vadd.f32 %v4475_v19, %v4381_v58  ;;  %v4245_v18 = vadd.f32 %v7371_v20, %v4156_v1  ;;  %v3468_v50 = vadd.f32 %v7376_v61, %v3379_v10  ;;  %v7447_v1 = vpop.f32.mrf.mxu0  ;;  %v5642_v61 = vld [vmem:[#allocation2 + $0x170] sm:$0xf0]  ;;  %v3295_v10 = vadd.f32 %v7730_v23, %v7262_v12 }
 0x3c3   : > { %v4314_v27 = vadd.f32 %v4245_v18, %v7250_v38  ;;  %4108 = vmatmul.bf16.gmra.mxu3 %v5330_v62  ;;  %v7728_v38 = vld [vmem:[#allocation17_spill] sm:$0xff]  ;;  %v7450_v62 = vpop.f32.mrf.mxu1 }
 0x3c4   : > { %v3292_v57 = vadd.f32 %v7728_v38, %v7255_v17 }
 0x3c5   : > { %v4350_v32 = vadd.f32 %v7366_v42, %v4314_v27 }
 0x3c6   : > { %v4069_v14 = vpop.f32.mrf.mxu3  ;;  %v3381_v27 = vadd.f32 %v7729_v25, %v3292_v57  ;;  %v5647_v25 = vld [vmem:[#allocation2 + $0x19c] sm:$0xf] }
 0x3c7   : > { %v4382_v19 = vmax.f32 %v4350_v32, 0.0  ;;  %v4159_v20 = vadd.f32 %v7379_v24, %v4069_v14  ;;  %v5342_v14 = vor.u32 %v5642_v61, %v5341_v0 }
 0x3c9   : > { %v5693_v35 = vpack.c.bf16 %v4382_v19, %v4381_v58  ;;  %v4477_v51 = vadd.f32 %v4476_v54, %v4382_v19  ;;  %v4248_v41 = vadd.f32 %v7387_v5, %v4159_v20  ;;  %v3470_v5 = vadd.f32 %v7391_v55, %v3381_v27  ;;  %v7458_v19 = vpop.f32.mrf.mxu2  ;;  %v5367_v27 = vld [vmem:[#allocation2 + $0x1a4] sm:$0xf0] }
 0x3cb   : > { %5757 = vst [vmem:[%s7383_s10 + $0x18] sm:$0xff] %v5693_v35   ;;  %v4315_v11 = vadd.f32 %v4248_v41, %v3468_v50  ;;  %v7461_v35 = vpop.f32.mrf.mxu0 }
 0x3cd   : > { %v4351_v18 = vadd.f32 %v7366_v42, %v4315_v11 }
 0x3ce   : > { %v4071_v24 = vpop.f32.mrf.mxu3 }
 0x3cf   : > { %v4383_v58 = vmax.f32 %v4351_v18, 0.0  ;;  %v4161_v54 = vadd.f32 %v7395_v43, %v4071_v24  ;;  %v7731_v43 = vld [vmem:[#allocation35_spill] sm:$0xff] }
 0x3d0   : > { %v3384_v38 = vadd.f32 %v7731_v43, %v3295_v10  ;;  %v7732_v24 = vld [vmem:[#allocation19_spill] sm:$0xff] }
 0x3d1   : > { %v4478_v32 = vadd.f32 %v4477_v51, %v4383_v58  ;;  %v4250_v17 = vadd.f32 %v7398_v22, %v4161_v54  ;;  %v7465_v22 = vpop.f32.mrf.mxu1  ;;  %v3297_v0 = vadd.f32 %v7732_v24, %v7269_v47  ;;  %v5370_v54 = vor.u32 %v5647_v25, %v5367_v27 }
 0x3d2   : > { %v3473_v57 = vadd.f32 %v7402_v15, %v3384_v38 }
 0x3d3   : > { %v4316_v20 = vadd.f32 %v4250_v17, %v3470_v5  ;;  %4113 = vmatmul.bf16.gmra.mxu3 %v5342_v14  ;;  %v5373_v5 = vld [vmem:[#allocation2 + $0x1a0] sm:$0xf]  ;;  %v5649_v17 = vld [vmem:[#allocation2 + $0x1a8] sm:$0xf0]  ;;  %v7472_v14 = vpop.f32.mrf.mxu2  ;;  %4212 = vmatmul.bf16.gmra.mxu0 %v5370_v54 }
 0x3d4   : > { %v5374_v23 = vor.u32 %v5649_v17, %v5373_v5 }
 0x3d5   : > { %v4352_v50 = vadd.f32 %v7366_v42, %v4316_v20 }
 0x3d6   : > { %v4074_v41 = vpop.f32.mrf.mxu3  ;;  %4301 = vmatmul.bf16.gmra.mxu1 %v5374_v23 }
 0x3d7   : > { %v4384_v55 = vmax.f32 %v4352_v50, 0.0  ;;  %v4164_v51 = vadd.f32 %v7407_v13, %v4074_v41  ;;  %v4175_v50 = vpop.f32.mrf.mxu0 }
 0x3d9   : > { %v5698_v12 = vpack.c.bf16 %v4384_v55, %v4383_v58  ;;  %v4479_v11 = vadd.f32 %v4478_v32, %v4384_v55  ;;  %v4253_v18 = vadd.f32 %v7410_v33, %v4164_v51  ;;  %v5353_v58 = vld [vmem:[#allocation2 + $0x180] sm:$0xf]  ;;  %v5645_v32 = vld [vmem:[#allocation2 + $0x188] sm:$0xf0]  ;;  %v4264_v51 = vpop.f32.mrf.mxu1 }
 0x3da   : > { %v7733_v33 = vld [vmem:[#allocation37_spill] sm:$0xff]  ;;  %v5354_v55 = vor.u32 %v5645_v32, %v5353_v58 }
 0x3db   : > { %5758 = vst [vmem:[%s7383_s10 + $0x20] sm:$0xff] %v5698_v12   ;;  %v4317_v61 = vadd.f32 %v4253_v18, %v3473_v57  ;;  %v3386_v10 = vadd.f32 %v7733_v33, %v3297_v0  ;;  %v7734_v57 = vld [vmem:[#allocation20_spill] sm:$0xff]  ;;  %v3487_v25 = vpop.f32.mrf.mxu2  ;;  %v5365_v33 = vld [vmem:[#allocation2 + $0x198] sm:$0xf] }
 0x3dc   : > { %v3300_v12 = vadd.f32 %v7734_v57, %v7276_v6  ;;  %v7736_v6 = vld [vmem:[#allocation21_spill] sm:$0xff] }
 0x3dd   : > { %v4353_v13 = vadd.f32 %v7366_v42, %v4317_v61  ;;  %v3475_v41 = vadd.f32 %v7414_v29, %v3386_v10  ;;  %v7735_v61 = vld [vmem:[#allocation39_spill] sm:$0xff]  ;;  %v5648_v10 = vld [vmem:[#allocation2 + $0x1a0] sm:$0xf0] }
 0x3de   : > { %v4076_v15 = vpop.f32.mrf.mxu3 }
 0x3df   : > { %v4385_v20 = vmax.f32 %v4353_v13, 0.0  ;;  %v4166_v47 = vadd.f32 %v7418_v9, %v4076_v15  ;;  %v3389_v9 = vadd.f32 %v7735_v61, %v3300_v12  ;;  %v4178_v17 = vpop.f32.mrf.mxu0  ;;  %v3302_v13 = vadd.f32 %v7736_v6, %v7279_v56 }
 0x3e0   : > { %v5366_v56 = vor.u32 %v5648_v10, %v5365_v33 }
 0x3e1   : > { %v4480_v43 = vadd.f32 %v4479_v11, %v4385_v20  ;;  %v4255_v38 = vadd.f32 %v7421_v40, %v4166_v47  ;;  %v3478_v11 = vadd.f32 %v7426_v46, %v3389_v9  ;;  %v4267_v15 = vpop.f32.mrf.mxu1  ;;  %v7737_v47 = vld [vmem:[#allocation41_spill] sm:$0xff]  ;;  %v7739_v9 = vld [vmem:[#allocation44_spill] sm:$0xff] }
 0x3e3   : > { %v4318_v18 = vadd.f32 %v4255_v38, %v3475_v41  ;;  %4118 = vmatmul.bf16.gmra.mxu3 %v5354_v55  ;;  %v7738_v55 = vld [vmem:[#allocation22_spill] sm:$0xff] }
 0x3e4   : > { %v3305_v57 = vadd.f32 %v7738_v55, %v7284_v8  ;;  %v7740_v8 = vld [vmem:[#allocation23_spill] sm:$0xff] }
 0x3e5   : > { %v4354_v24 = vadd.f32 %v7366_v42, %v4318_v18 }
 0x3e6   : > { %v4079_v0 = vpop.f32.mrf.mxu3 }
 0x3e7   : > { %v4386_v27 = vmax.f32 %v4354_v24, 0.0  ;;  %v4169_v29 = vadd.f32 %v7430_v26, %v4079_v0  ;;  %v3391_v26 = vadd.f32 %v7737_v47, %v3302_v13  ;;  %v4180_v18 = vpop.f32.mrf.mxu0 }
 0x3e9   : > { %v5703_v40 = vpack.c.bf16 %v4386_v27, %v4385_v20  ;;  %v4481_v54 = vadd.f32 %v4480_v43, %v4386_v27  ;;  %v4258_v5 = vadd.f32 %v7435_v39, %v4169_v29  ;;  %v3480_v20 = vadd.f32 %v7441_v59, %v3391_v26  ;;  %v3489_v39 = vpop.f32.mrf.mxu2  ;;  %v4269_v0 = vpop.f32.mrf.mxu1 }
 0x3eb   : > { %5759 = vst [vmem:[%s7383_s10 + $0x28] sm:$0xff] %v5703_v40   ;;  %v4319_v23 = vadd.f32 %v4258_v5, %v3478_v11 }
 0x3ed   : > { %v4355_v58 = vadd.f32 %v7366_v42, %v4319_v23 }
 0x3ee   : > { %v4081_v32 = vpop.f32.mrf.mxu3 }
 0x3ef   : > { %v4387_v41 = vmax.f32 %v4355_v58, 0.0  ;;  %v4171_v46 = vadd.f32 %v7447_v1, %v4081_v32  ;;  %v3394_v1 = vadd.f32 %v7739_v9, %v3305_v57  ;;  %v4183_v23 = vpop.f32.mrf.mxu0 }
 0x3f1   : > { %v4482_v43 = vadd.f32 %v4481_v54, %v4387_v41  ;;  %v4260_v38 = vadd.f32 %v7450_v62, %v4171_v46  ;;  %v3483_v29 = vadd.f32 %v7458_v19, %v3394_v1  ;;  %v3307_v54 = vadd.f32 %v7740_v8, %v7289_v45  ;;  %v3492_v5 = vpop.f32.mrf.mxu2  ;;  %v4272_v10 = vpop.f32.mrf.mxu1 }
 0x3f3   : > { %v4320_v12 = vadd.f32 %v4260_v38, %v3480_v20  ;;  %4123 = vmatmul.bf16.gmra.mxu3 %v5366_v56  ;;  %v3396_v32 = vadd.f32 %v7197_v36, %v3307_v54 }
 0x3f5   : > { %v4356_v24 = vadd.f32 %v7366_v42, %v4320_v12  ;;  %v3485_v19 = vadd.f32 %v7472_v14, %v3396_v32 }
 0x3f6   : > { %v4084_v61 = vpop.f32.mrf.mxu3 }
 0x3f7   : > { %v4388_v27 = vmax.f32 %v4356_v24, 0.0  ;;  %v4174_v59 = vadd.f32 %v7461_v35, %v4084_v61  ;;  %v4185_v55 = vpop.f32.mrf.mxu0 }
 0x3f9   : > { %v5708_v62 = vpack.c.bf16 %v4388_v27, %v4387_v41  ;;  %v4483_v11 = vadd.f32 %v4482_v43, %v4388_v27  ;;  %v4263_v40 = vadd.f32 %v7465_v22, %v4174_v59  ;;  %v7741_v22 = vld [vmem:[#allocation24_spill] sm:$0xff]  ;;  %v3494_v46 = vpop.f32.mrf.mxu2  ;;  %v4274_v24 = vpop.f32.mrf.mxu1 }
 0x3fa   : > { %v3310_v45 = vadd.f32 %v7741_v22, %v7294_v4 }
 0x3fb   : > { %5760 = vst [vmem:[%s7383_s10 + $0x30] sm:$0xff] %v5708_v62   ;;  %v4321_v6 = vadd.f32 %v4263_v40, %v3483_v29 }
 0x3fc   : > { %v3399_v38 = vadd.f32 %v7209_v48, %v3310_v45 }
 0x3fd   : > { %v4357_v13 = vadd.f32 %v7366_v42, %v4321_v6 }
 0x3fe   : > { %v4086_v58 = vpop.f32.mrf.mxu3 }
 0x3ff   : > { %v4389_v33 = vmax.f32 %v4357_v13, 0.0  ;;  %v4176_v35 = vadd.f32 %v4175_v50, %v4086_v58  ;;  %v3488_v50 = vadd.f32 %v3487_v25, %v3399_v38  ;;  %v7745_v38 = vld [vmem:[#allocation28_spill] sm:$0xff] }
 0x401   : > { %v4484_v47 = vadd.f32 %v4483_v11, %v4389_v33  ;;  %v4265_v26 = vadd.f32 %v4264_v51, %v4176_v35  ;;  %v7742_v51 = vld [vmem:[#allocation25_spill] sm:$0xff]  ;;  %v3497_v59 = vpop.f32.mrf.mxu2  ;;  %v4188_v11 = vpop.f32.mrf.mxu0 }
 0x402   : > { %v3312_v61 = vadd.f32 %v7742_v51, %v7299_v21  ;;  %v4277_v21 = vpop.f32.mrf.mxu1 }
 0x403   : > { %v4322_v41 = vadd.f32 %v4265_v26, %v3485_v19 }
 0x404   : > { %v3401_v27 = vadd.f32 %v7219_v2, %v3312_v61 }
 0x405   : > { %v4358_v20 = vadd.f32 %v7366_v42, %v4322_v41 }
 0x406   : > { %v4089_v43 = vpop.f32.mrf.mxu3 }
 0x407   : > { %v4390_v56 = vmax.f32 %v4358_v20, 0.0  ;;  %v4179_v36 = vadd.f32 %v4178_v17, %v4089_v43  ;;  %v3490_v17 = vadd.f32 %v3489_v39, %v3401_v27 }
 0x409   : > { %v5713_v57 = vpack.c.bf16 %v4390_v56, %v4389_v33  ;;  %v4485_v12 = vadd.f32 %v4484_v47, %v4390_v56  ;;  %v4268_v14 = vadd.f32 %v4267_v15, %v4179_v36  ;;  %v7743_v15 = vld [vmem:[#allocation26_spill] sm:$0xff]  ;;  %v3499_v33 = vpop.f32.mrf.mxu2 }
 0x40a   : > { %v3315_v40 = vadd.f32 %v7743_v15, %v7302_v34  ;;  %v4190_v34 = vpop.f32.mrf.mxu0  ;;  %v4279_v22 = vpop.f32.mrf.mxu1 }
 0x40b   : > { %5761 = vst [vmem:[%s7383_s10 + $0x38] sm:$0xff] %v5713_v57   ;;  %v4323_v4 = vadd.f32 %v4268_v14, %v3488_v50 }
 0x40c   : > { %v3404_v13 = vadd.f32 %v7228_v52, %v3315_v40  ;;  %v7747_v40 = vld [vmem:[#allocation30_spill] sm:$0xff] }
 0x40d   : > { %v4359_v9 = vadd.f32 %v7366_v42, %v4323_v4 }
 0x40e   : > { %v4091_v1 = vpop.f32.mrf.mxu3  ;;  %v3493_v32 = vadd.f32 %v3492_v5, %v3404_v13 }
 0x40f   : > { %v4391_v48 = vmax.f32 %v4359_v9, 0.0  ;;  %v4181_v29 = vadd.f32 %v4180_v18, %v4091_v1 }
 0x411   : > { %v4486_v62 = vadd.f32 %v4485_v12, %v4391_v48  ;;  %v4270_v25 = vadd.f32 %v4269_v0, %v4181_v29  ;;  %v7744_v0 = vld [vmem:[#allocation27_spill] sm:$0xff]  ;;  %v3502_v56 = vpop.f32.mrf.mxu2 }
 0x412   : > { %v3317_v19 = vadd.f32 %v7744_v0, %v7307_v3  ;;  %v4193_v50 = vpop.f32.mrf.mxu0 }
 0x413   : > { %v4324_v8 = vadd.f32 %v4270_v25, %v3490_v17 }
 0x414   : > { %v3406_v41 = vadd.f32 %v7238_v63, %v3317_v19  ;;  %v4282_v63 = vpop.f32.mrf.mxu1 }
 0x415   : > { %v4360_v54 = vadd.f32 %v7366_v42, %v4324_v8  ;;  %v3325_v8 = vadd.f32 %v7747_v40, %v7322_v16 }
 0x416   : > { %v4094_v6 = vpop.f32.mrf.mxu3 }
 0x417   : > { %v4392_v58 = vmax.f32 %v4360_v54, 0.0  ;;  %v4184_v2 = vadd.f32 %v4183_v23, %v4094_v6  ;;  %v3495_v23 = vadd.f32 %v3494_v46, %v3406_v41  ;;  %v3414_v6 = vadd.f32 %v7266_v31, %v3325_v8 }
 0x419   : > { %v5718_v18 = vpack.c.bf16 %v4392_v58, %v4391_v48  ;;  %v4487_v39 = vadd.f32 %v4486_v62, %v4392_v58  ;;  %v4273_v35 = vadd.f32 %v4272_v10, %v4184_v2  ;;  %v3320_v10 = vadd.f32 %v7745_v38, %v7312_v60  ;;  %v3504_v1 = vpop.f32.mrf.mxu2 }
 0x41a   : > { %v4195_v62 = vpop.f32.mrf.mxu0  ;;  %v3503_v2 = vadd.f32 %v3502_v56, %v3414_v6 }
 0x41b   : > { %5762 = vst [vmem:[%s7383_s10 + $0x40] sm:$0xff] %v5718_v18   ;;  %v4325_v47 = vadd.f32 %v4273_v35, %v3493_v32  ;;  %v3409_v12 = vadd.f32 %v7252_v28, %v3320_v10  ;;  %v7748_v35 = vld [vmem:[#allocation32_spill] sm:$0xff] }
 0x41c   : > { %v4284_v15 = vpop.f32.mrf.mxu1  ;;  %v3327_v0 = vadd.f32 %v7748_v35, %v7325_v49  ;;  %v7758_v35 = vld [vmem:[#allocation40_spill] sm:$0xff] }
 0x41d   : > { %v4361_v26 = vadd.f32 %v7366_v42, %v4325_v47  ;;  %v3498_v61 = vadd.f32 %v3497_v59, %v3409_v12 }
 0x41e   : > { %v4096_v45 = vpop.f32.mrf.mxu3 }
 0x41f   : > { %v4393_v52 = vmax.f32 %v4361_v26, 0.0  ;;  %v4186_v20 = vadd.f32 %v4185_v55, %v4096_v45  ;;  %v3416_v26 = vadd.f32 %v7273_v44, %v3327_v0 }
 0x421   : > { %v4488_v5 = vadd.f32 %v4487_v39, %v4393_v52  ;;  %v4275_v43 = vadd.f32 %v4274_v24, %v4186_v20  ;;  %v7746_v24 = vld [vmem:[#allocation29_spill] sm:$0xff]  ;;  %v3507_v13 = vpop.f32.mrf.mxu2  ;;  %v3505_v45 = vadd.f32 %v3504_v1, %v3416_v26 }
 0x422   : > { %v3322_v9 = vadd.f32 %v7746_v24, %v7317_v30  ;;  %v4198_v39 = vpop.f32.mrf.mxu0  ;;  %v7753_v1 = vld [vmem:[#allocation49_spill] sm:$0xff] }
 0x423   : > { %v4326_v3 = vadd.f32 %v4275_v43, %v3495_v23  ;;  %v7749_v23 = vld [vmem:[#allocation56_spill] sm:$0xff] }
 0x424   : > { %v3411_v29 = vadd.f32 %v7259_v7, %v3322_v9  ;;  %v4287_v16 = vpop.f32.mrf.mxu1 }
 0x425   : > { %v4362_v36 = vadd.f32 %v7366_v42, %v4326_v3 }
 0x426   : > { %v4099_v57 = vpop.f32.mrf.mxu3  ;;  %v3500_v25 = vadd.f32 %v3499_v33, %v3411_v29 }
 0x427   : > { %v4394_v14 = vmax.f32 %v4362_v36, 0.0  ;;  %v4189_v51 = vadd.f32 %v4188_v11, %v4099_v57  ;;  %v7751_v36 = vld [vmem:[#allocation48_spill] sm:$0xff] }
 0x429   : > { %v5723_v55 = vpack.c.bf16 %v4394_v14, %v4393_v52  ;;  %v4489_v46 = vadd.f32 %v4488_v5, %v4394_v14  ;;  %v4278_v4 = vadd.f32 %v4277_v21, %v4189_v51  ;;  %v3509_v41 = vpop.f32.mrf.mxu2  ;;  %v7750_v5 = vld [vmem:[#allocation34_spill] sm:$0xff] }
 0x42a   : > { %v3330_v43 = vadd.f32 %v7750_v5, %v7749_v23  ;;  %v4200_v49 = vpop.f32.mrf.mxu0  ;;  %v7760_v5 = vld [vmem:[#allocation59_spill] sm:$0xff] }
 0x42b   : > { %5763 = vst [vmem:[%s7383_s10 + $0x48] sm:$0xff] %v5723_v55   ;;  %v4327_v60 = vadd.f32 %v4278_v4, %v3498_v61  ;;  %v7752_v61 = vld [vmem:[#allocation36_spill] sm:$0xff] }
 0x42c   : > { %v4289_v56 = vpop.f32.mrf.mxu1  ;;  %v3332_v55 = vadd.f32 %v7752_v61, %v7331_v37 }
 0x42d   : > { %v4363_v27 = vadd.f32 %v7366_v42, %v4327_v60 }
 0x42e   : > { %v4101_v48 = vpop.f32.mrf.mxu3 }
 0x42f   : > { %v4395_v17 = vmax.f32 %v4363_v27, 0.0  ;;  %v4191_v28 = vadd.f32 %v4190_v34, %v4101_v48  ;;  %v3421_v27 = vadd.f32 %v7753_v1, %v3332_v55  ;;  %v7763_v55 = vld [vmem:[#allocation45_spill] sm:$0xff] }
 0x431   : > { %v4490_v11 = vadd.f32 %v4489_v46, %v4395_v17  ;;  %v4280_v59 = vadd.f32 %v4279_v22, %v4191_v28  ;;  %v3512_v46 = vpop.f32.mrf.mxu2  ;;  %v3510_v28 = vadd.f32 %v3509_v41, %v3421_v27  ;;  %v7764_v27 = vld [vmem:[#allocation53_spill] sm:$0xff] }
 0x432   : > { %v4203_v9 = vpop.f32.mrf.mxu0 }
 0x433   : > { %v4328_v30 = vadd.f32 %v4280_v59, %v3500_v25  ;;  %v7755_v59 = vld [vmem:[#allocation38_spill] sm:$0xff] }
 0x435   : > { %v4364_v21 = vadd.f32 %v7366_v42, %v4328_v30 }
 0x436   : > { %v4104_v54 = vpop.f32.mrf.mxu3 }
 0x437   : > { %v4396_v58 = vmax.f32 %v4364_v21, 0.0  ;;  %v4194_v7 = vadd.f32 %v4193_v50, %v4104_v54  ;;  %v3419_v50 = vadd.f32 %v7751_v36, %v3330_v43  ;;  %v7756_v21 = vld [vmem:[#allocation50_spill] sm:$0xff]  ;;  %v7761_v43 = vld [vmem:[#allocation43_spill] sm:$0xff]  ;;  %v7762_v36 = vld [vmem:[#allocation52_spill] sm:$0xff] }
 0x439   : > { %v5728_v32 = vpack.c.bf16 %v4396_v58, %v4395_v17  ;;  %v4491_v18 = vadd.f32 %v4490_v11, %v4396_v58  ;;  %v4283_v33 = vadd.f32 %v4282_v63, %v4194_v7  ;;  %v3508_v12 = vadd.f32 %v3507_v13, %v3419_v50  ;;  %v4292_v17 = vpop.f32.mrf.mxu1  ;;  %v7754_v11 = vld [vmem:[#allocation57_spill] sm:$0xff]  ;;  %v3514_v40 = vpop.f32.mrf.mxu2 }
 0x43a   : > { %v4205_v58 = vpop.f32.mrf.mxu0 }
 0x43b   : > { %5764 = vst [vmem:[%s7383_s10 + $0x50] sm:$0xff] %v5728_v32   ;;  %v4329_v19 = vadd.f32 %v4283_v33, %v3503_v2 }
 0x43d   : > { %v4365_v47 = vadd.f32 %v7366_v42, %v4329_v19 }
 0x43e   : > { %v4106_v34 = vpop.f32.mrf.mxu3 }
 0x43f   : > { %v4397_v31 = vmax.f32 %v4365_v47, 0.0  ;;  %v4196_v22 = vadd.f32 %v4195_v62, %v4106_v34  ;;  %v7759_v34 = vld [vmem:[#allocation51_spill] sm:$0xff] }
 0x441   : > { %v4492_v52 = vadd.f32 %v4491_v18, %v4397_v31  ;;  %v4285_v20 = vadd.f32 %v4284_v15, %v4196_v22  ;;  %v3335_v15 = vadd.f32 %v7755_v59, %v7754_v11  ;;  %v4294_v33 = vpop.f32.mrf.mxu1  ;;  %v7765_v11 = vld [vmem:[#allocation60_spill] sm:$0xff]  ;;  %v7766_v59 = vld [vmem:[#allocation46_spill] sm:$0xff] }
 0x442   : > { %v4208_v23 = vpop.f32.mrf.mxu0 }
 0x443   : > { %v4330_v38 = vadd.f32 %v4285_v20, %v3505_v45  ;;  %v3424_v54 = vadd.f32 %v7756_v21, %v3335_v15  ;;  %v3345_v15 = vadd.f32 %v7766_v59, %v7765_v11 }
 0x445   : > { %v4366_v10 = vadd.f32 %v7366_v42, %v4330_v38  ;;  %v3513_v7 = vadd.f32 %v3512_v46, %v3424_v54  ;;  %v3340_v38 = vadd.f32 %v7761_v43, %v7760_v5  ;;  %v3342_v46 = vadd.f32 %v7763_v55, %v7347_v53  ;;  %v7767_v54 = vld [vmem:[#allocation54_spill] sm:$0xff] }
 0x446   : > { %v4109_v3 = vpop.f32.mrf.mxu3 }
 0x447   : > { %v4398_v57 = vmax.f32 %v4366_v10, 0.0  ;;  %v4199_v44 = vadd.f32 %v4198_v39, %v4109_v3  ;;  %v7757_v39 = vld [vmem:[#allocation58_spill] sm:$0xff]  ;;  %v3429_v50 = vadd.f32 %v7762_v36, %v3340_v38 }
 0x448   : > { %v3337_v0 = vadd.f32 %v7758_v35, %v7757_v39  ;;  %v7769_v39 = vld [vmem:[#allocation47_spill] sm:$0xff] }
 0x449   : > { %v5733_v14 = vpack.c.bf16 %v4398_v57, %v4397_v31  ;;  %v4493_v51 = vadd.f32 %v4492_v52, %v4398_v57  ;;  %v4288_v63 = vadd.f32 %v4287_v16, %v4199_v44  ;;  %v3517_v31 = vpop.f32.mrf.mxu2  ;;  %v4297_v10 = vpop.f32.mrf.mxu1 }
 0x44a   : > { %v3426_v26 = vadd.f32 %v7759_v34, %v3337_v0 }
 0x44b   : > { %5765 = vst [vmem:[%s7383_s10 + $0x58] sm:$0xff] %v5733_v14   ;;  %v4331_v4 = vadd.f32 %v4288_v63, %v3508_v12  ;;  %v3518_v12 = vadd.f32 %v3517_v31, %v3429_v50  ;;  %v7770_v31 = vld [vmem:[#allocation55_spill] sm:$0xff] }
 0x44c   : > { %v3515_v41 = vadd.f32 %v3514_v40, %v3426_v26 }
 0x44d   : > { %v4367_v24 = vadd.f32 %v7366_v42, %v4331_v4 }
 0x44e   : > { %v4111_v60 = vpop.f32.mrf.mxu3 }
 0x44f   : > { %v4399_v48 = vmax.f32 %v4367_v24, 0.0  ;;  %v4201_v29 = vadd.f32 %v4200_v49, %v4111_v60  ;;  %v4210_v24 = vpop.f32.mrf.mxu0 }
 0x451   : > { %v4494_v62 = vadd.f32 %v4493_v51, %v4399_v48  ;;  %v4290_v25 = vadd.f32 %v4289_v56, %v4201_v29  ;;  %v3519_v14 = vpop.f32.mrf.mxu2  ;;  %v4299_v60 = vpop.f32.mrf.mxu1 }
 0x453   : > { %v4332_v37 = vadd.f32 %v4290_v25, %v3510_v28 }
 0x455   : > { %v4368_v8 = vadd.f32 %v7366_v42, %v4332_v37 }
 0x456   : > { %v4114_v30 = vpop.f32.mrf.mxu3 }
 0x457   : > { %v4400_v6 = vmax.f32 %v4368_v8, 0.0  ;;  %v4204_v13 = vadd.f32 %v4203_v9, %v4114_v30  ;;  %v4213_v40 = vpop.f32.mrf.mxu0 }
 0x459   : > { %v5738_v2 = vpack.c.bf16 %v4400_v6, %v4399_v48  ;;  %v4495_v32 = vadd.f32 %v4494_v62, %v4400_v6  ;;  %v4293_v18 = vadd.f32 %v4292_v17, %v4204_v13  ;;  %v3431_v48 = vadd.f32 %v7764_v27, %v3342_v46  ;;  %v3522_v37 = vpop.f32.mrf.mxu2  ;;  %v4302_v30 = vpop.f32.mrf.mxu1 }
 0x45a   : > { %v3434_v6 = vadd.f32 %v7767_v54, %v3345_v15 }
 0x45b   : > { %5766 = vst [vmem:[%s7383_s10 + $0x60] sm:$0xff] %v5738_v2   ;;  %v4333_v19 = vadd.f32 %v4293_v18, %v3513_v7  ;;  %v3520_v28 = vadd.f32 %v3519_v14, %v3431_v48 }
 0x45c   : > { %v3523_v7 = vadd.f32 %v3522_v37, %v3434_v6 }
 0x45d   : > { %v4369_v16 = vadd.f32 %v7366_v42, %v4333_v19  ;;  %v6070_v19 = vmov 256.0  }
 0x45e   : > { %v4116_v47 = vpop.f32.mrf.mxu3  ;;  %5867 = vrcp.f32 %v6070_v19 }
 0x45f   : > { %v4401_v22 = vmax.f32 %v4369_v16, 0.0  ;;  %v4206_v45 = vadd.f32 %v4205_v58, %v4116_v47  ;;  %v4215_v34 = vpop.f32.mrf.mxu0 }
 0x461   : > { %v4496_v52 = vadd.f32 %v4495_v32, %v4401_v22  ;;  %v4295_v20 = vadd.f32 %v4294_v33, %v4206_v45  ;;  %v7768_v33 = vld [vmem:[#allocation42_spill] sm:$0xff]  ;;  %v3524_v16 = vpop.f32.mrf.mxu2 }
 0x462   : > { %v3347_v35 = vadd.f32 %v7769_v39, %v7768_v33 }
 0x463   : > { %v4334_v49 = vadd.f32 %v4295_v20, %v3515_v41 }
 0x464   : > { %v5868_v20 = vpop.eup %5867 }
 0x465   : > { %v4370_v56 = vadd.f32 %v7366_v42, %v4334_v49  ;;  %v4509_v49 = vmul.f32 256.0, %v5868_v20 }
 0x466   : > { %v4119_v3 = vpop.f32.mrf.mxu3 }
 0x467   : > { %v4402_v57 = vmax.f32 %v4370_v56, 0.0  ;;  %v4209_v44 = vadd.f32 %v4208_v23, %v4119_v3  ;;  %v4510_v3 = vsub.f32 1.0, %v4509_v49 }
 0x469   : > { %v5743_v51 = vpack.c.bf16 %v4402_v57, %v4401_v22  ;;  %v4497_v63 = vadd.f32 %v4496_v52, %v4402_v57  ;;  %v4298_v61 = vadd.f32 %v4297_v10, %v4209_v44  ;;  %v3436_v22 = vadd.f32 %v7770_v31, %v3347_v35  ;;  %v4304_v52 = vpop.f32.mrf.mxu1 }
 0x46b   : > { %5767 = vst [vmem:[%s7383_s10 + $0x68] sm:$0xff] %v5743_v51   ;;  %v4335_v4 = vadd.f32 %v4298_v61, %v3518_v12  ;;  %v3525_v23 = vadd.f32 %v3524_v16, %v3436_v22 }
 0x46d   : > { %v4371_v9 = vadd.f32 %v7366_v42, %v4335_v4 }
 0x46e   : > { %v4121_v1 = vpop.f32.mrf.mxu3 }
 0x46f   : > { %v4403_v29 = vmax.f32 %v4371_v9, 0.0  ;;  %v4211_v17 = vadd.f32 %v4210_v24, %v4121_v1 }
 0x471   : > { %v4498_v62 = vadd.f32 %v4497_v63, %v4403_v29  ;;  %v4300_v25 = vadd.f32 %v4299_v60, %v4211_v17 }
 0x473   : > { %v4336_v53 = vadd.f32 %v4300_v25, %v3520_v28 }
 0x475   : > { %v4372_v8 = vadd.f32 %v7366_v42, %v4336_v53 }
 0x476   : > { %v4124_v21 = vpop.f32.mrf.mxu3 }
 0x477   : > { %v4404_v13 = vmax.f32 %v4372_v8, 0.0  ;;  %v4214_v58 = vadd.f32 %v4213_v40, %v4124_v21 }
 0x479   : > { %v5748_v2 = vpack.c.bf16 %v4404_v13, %v4403_v29  ;;  %v4499_v32 = vadd.f32 %v4498_v62, %v4404_v13  ;;  %v4303_v18 = vadd.f32 %v4302_v30, %v4214_v58 }
 0x47b   : > { %5768 = vst [vmem:[%s7383_s10 + $0x70] sm:$0xff] %v5748_v2   ;;  %v4337_v0 = vadd.f32 %v4303_v18, %v3523_v7 }
 0x47d   : > { %v4373_v47 = vadd.f32 %v7366_v42, %v4337_v0 }
 0x47e   : > { %v4126_v26 = vpop.f32.mrf.mxu3 }
 0x47f   : > { %v4405_v45 = vmax.f32 %v4373_v47, 0.0  ;;  %v4216_v41 = vadd.f32 %v4215_v34, %v4126_v26 }
 0x481   : > { %v4500_v5 = vadd.f32 %v4499_v32, %v4405_v45  ;;  %v4305_v43 = vadd.f32 %v4304_v52, %v4216_v41 }
 0x483   : > { %v4338_v38 = vadd.f32 %v4305_v43, %v3525_v23 }
 0x485   : > { %v4374_v10 = vadd.f32 %v7366_v42, %v4338_v38 }
 0x487   : > { %v4406_v56 = vmax.f32 %v4374_v10, 0.0 }
 0x489   : > { %v5753_v36 = vpack.c.bf16 %v4406_v56, %v4405_v45  ;;  %v4501_v50 = vadd.f32 %v4500_v5, %v4406_v56 }
 0x48b   : > { %5769 = vst [vmem:[%s7383_s10 + $0x78] sm:$0xff] %v5753_v36   ;;  %v4502_v57 = vrot.slane %v4501_v50, 4 }
 0x48c   : > { %5987 = shalt.err (!%p5984_p10)
}
 0x48d   : > { %s6071_s10 = smov 64   ;;  %s6072_s12 = smov 4   ;;  %v4511_v42 = vmul.f32 %v5868_v20, %v4510_v3  ;;  %v4503_v44 = vadd.f32 %v4502_v57, %v4501_v50  ;;  %vm4513_vm2 = vweird.f32 %v5868_v20 }
 0x48e   : > { %5796 = dma.vmem_to_hbm [thread:$0]  (%p6180_p3), %s4536_s14, 2048, %s4538_s15, %s4518_s7, %s6071_s10, %s6071_s10, %s6072_s12  }
 0x48f   : > { %s4690_s30 = sshll.u32 %s6213_s9, 3  ;;  %s5475_s13 = sshll.u32 %s6129_s25, 3  ;;  %v4504_v12 = vrot.slane %v4503_v44, 2  ;;  %v4512_v14 = vadd.f32 %v5868_v20, %v4511_v42 }
 0x490   : > { %s4550_s16 = scalar_lea.hbm %s7637_s6, %s5475_s13  ;;  %s315_s17 = scalar_lea.vmem [#allocation10], %s4690_s30 }
 0x491   : > { %v4505_v51 = vadd.f32 %v4504_v12, %v4503_v44  ;;  %v4514_v61 = vsel %vm4513_vm2, %v5868_v20, %v4512_v14  ;;  %s4552_s20 = sshll.u32 %s315_s17, 4  ;;  %s4554_s19 = sshll.u32 %s4550_s16, 4  ;;  %s4553_s20 = int_to_ptr.vmem [resolvable:$true] %s4552_s20  ;;  %s4555_s19 = int_to_ptr.hbm [resolvable:$true] %s4554_s19 }
 0x492   : > { %s4523_s25 = scalar_lea.sflag [#allocation11], %s6213_s9  ;;  %s6002_s14 = sshra.s32 %s4555_s19, 4  ;;  %s6003_s14 = int_to_ptr.hbm [resolvable:$true] %s6002_s14 }
 0x493   : > { %v4506_v63 = vrot.slane %v4505_v51, 1  ;;  %s6004_s15 = scalar_lea.hbm %s6003_s14, 8  ;;  %s6008_s10 = scalar_lea.hbm %s7637_s6, 16 }
 0x494   : > { %p6005_p12 = scmp.ne.s32.totalorder %s6003_s14, %s6004_s15  ;;  %p6009_p5 = scmp.lt.s32.totalorder %s6003_s14, %s7637_s6 }
 0x495   : > { %v4507_v55 = vadd.f32 %v4506_v63, %v4505_v51  ;;  %p6010_p7 = scmp.lt.s32.totalorder %s6008_s10, %s6004_s15 }
 0x496   : > { %p6006_p13 = pnand %p6005_p12, %p6180_p3 }
 0x497   : > { %v4515_v46 = vmul.f32 %v4514_v61, %v4507_v55  ;;  %p6011_p1 = por %p6010_p7, %p6009_p5 }
 0x498   : > { %p6007_p0 = pneg %p6006_p13 }
 0x499   : > { %4516 = vst [vmem:[%s315_s17] sm:$0xff] %v4515_v46 }
 0x49a   : > { %p6012_p4 = pnand %p6011_p1, %p6007_p0 }
 0x49c   : > { %6015 = shalt.err (!%p6012_p4)
}
 0x49d   : > { %5797 = dma.vmem_to_hbm [thread:$0]  (%p6180_p3), %s4553_s20, 128, %s4555_s19, %s4523_s25  }
 0x49e PF: > { %s4566_s9 = sand.u32 1, %s6050_s21   ;;  %p7771_p8 = scmp.ge.s32.totalorder %s6062_s24, 2 }
 0x49f   : > { %s4567_s13 = scalar_lea.sflag [#allocation5], %s4566_s9 }
 0x4a0   : > { %p5812_p11 = pnand %p7771_p8, %p6143_p6 }
 0x4a2   : > { %p5813_p2 = pneg %p5812_p11 }
 0x4a4   : > { %6041 = dma.done.wait (%p5813_p2), %s4567_s13, 2048  }
 0x4a5   : > { %6043 = vsyncadd (%p5813_p2), %s4567_s13, 4294965248  ;;  %s4577_s27 = scalar_lea.sflag [#allocation11], %s4566_s9 }
 0x4a6   : > { %6045 = dma.done.wait (%p5813_p2), %s4577_s27, 128  }
 0x4a7   : > { %6047 = vsyncadd (%p5813_p2), %s4577_s27, 4294967168  ;;  %p24_p3 = scmp.ge.s32.totalorder %s6170_s18, 4   ;;  %s7772_s21 = smov %s6054_s22 }
 0x4a8   : > { %s7773_s22 = smov %s6058_s23  ;;  %s7774_s23 = smov %s6186_s29 }
 0x4a9   : > { %s7775_s24 = smov %s6170_s18  ;;  %26 = sbr.rel (!%p24_p3) target bundleno = 8 (0x8), region = 112 }
 0x4ae   :  { %4583 = vsyncpa [#allocation4], 1 }
 0x4af   :  { %4585 = vsyncpa [#allocation4 + $0x1], 1 }
 0x4b0   :  { %4586 = vsyncpa [#allocation7], 1 }
 0x4b1   :  { %4587 = vsyncpa [#allocation5], 1 }
 0x4b2   :  { %4589 = vsyncpa [#allocation5 + $0x1], 1 }
 0x4b3   :  { %4590 = vsyncpa [#allocation11], 1 }
 0x4b4   :  { %4592 = vsyncpa [#allocation11 + $0x1], 1 }

</bundles_post_ra>
